<compile_context>
chip_gen: v7x
topology: tpu7x:2x2x1
jax: 0.10.0
libtpu: 0.0.40
codegen_flags: <defaults>
</compile_context>

<pallas_src>
import jax
import jax.numpy as jnp
from jax.experimental import pallas as pl
from jax.experimental.pallas import tpu as pltpu


# ---------------------------------------------------------------------------
# Fused LeNet kernel (everything VMEM-resident, single invocation, no grid)
# ---------------------------------------------------------------------------
def _lenet_fused_kernel(x_ref, t1_ref, b1_ref, w2m_ref, b2_ref,
                        wf1_ref, bf1_ref, wf2_ref, bf2_ref, out_ref):
    f32 = jnp.float32
    n = x_ref.shape[0]                        # static batch size

    # ---------------- conv1 (5x5, 1->32) + ReLU -----------------------------
    # y1[b*24 + h, w*32 + c] = relu(conv1(x))[b, c, h, w]
    imgs = [x_ref[b] for b in range(n)]       # each (28, 28)
    acc1 = None
    for i in range(5):                        # one Toeplitz matmul per kernel row
        rows = jnp.concatenate([img[i:i + 24, :] for img in imgs], axis=0)  # (n*24, 28)
        term = jnp.dot(rows, t1_ref[i], preferred_element_type=f32)         # (n*24, 768)
        acc1 = term if acc1 is None else acc1 + term
    y1 = jnp.maximum(acc1 + b1_ref[...], 0.0)                               # (n*24, 768)

    # ---------------- pool1 (2x2, stride 2) ---------------------------------
    # height: pairwise max of adjacent rows, keep even anchors.
    y1s = jnp.concatenate([y1[1:, :], y1[:1, :]], axis=0)
    pm = jnp.maximum(y1, y1s)
    rm = jnp.concatenate([pm[2 * k:2 * k + 1, :] for k in range(n * 12)],
                         axis=0)                                            # (n*12, 768)
    # width: max of adjacent 32-lane channel blocks, then re-layout so spatial
    # position moves into rows: p1t[b*144 + W*12 + H, c] = pool1[b, c, H, W]
    blks = [jnp.maximum(rm[:, (2 * w) * 32:(2 * w) * 32 + 32],
                        rm[:, (2 * w + 1) * 32:(2 * w + 1) * 32 + 32])
            for w in range(12)]                                             # (n*12, 32) each
    p1t = jnp.concatenate([blks[w][b * 12:(b + 1) * 12, :]
                           for b in range(n) for w in range(12)], axis=0)   # (n*144, 32)

    # ---------------- conv2 (2x2, 32->64) + ReLU ----------------------------
    def shift_rows(v, k):                     # v[r] <- v[r + k] (wrap rows unused)
        return v if k == 0 else jnp.concatenate([v[k:, :], v[:k, :]], axis=0)

    acc2 = None
    for i in range(2):                        # kernel height offset
        for j in range(2):                    # kernel width offset
            term = jnp.dot(shift_rows(p1t, j * 12 + i), w2m_ref[i * 2 + j],
                           preferred_element_type=f32)                      # (n*144, 64)
            acc2 = term if acc2 is None else acc2 + term
    y2 = jnp.maximum(acc2 + b2_ref[...], 0.0)  # rows = b*144 + w2*12 + h2, lanes = c

    # ---------------- pool2 (2x2, stride 2) ---------------------------------
    # m[r] = max over the 2x2 window anchored at row r; pooled values are the
    # rows at even (h, w) anchors, gathered below while flattening.
    m = jnp.maximum(jnp.maximum(y2, shift_rows(y2, 1)),
                    jnp.maximum(shift_rows(y2, 12), shift_rows(y2, 13)))

    # ------ flatten (PyTorch NCHW order folded into wf1) + fc1/fc2/head -----
    feat_rows = []
    for b in range(n):
        cols = [m[b * 144 + 24 * w3 + 2 * h3: b * 144 + 24 * w3 + 2 * h3 + 1, :]
                for h3 in range(5) for w3 in range(5)]                      # 25 x (1, 64)
        feat_rows.append(jnp.concatenate(cols, axis=1))                     # (1, 1600)
    feat = jnp.concatenate(feat_rows, axis=0)                               # (n, 1600)

    # fc1 with bf16 weights (dominant HBM transfer halved), f32 accumulation.
    h1 = jnp.dot(feat.astype(jnp.bfloat16), wf1_ref[...],
                 preferred_element_type=f32)
    h1 = jnp.maximum(h1 + bf1_ref[...], 0.0)                                # (n, 512)
    logits = jnp.dot(h1, wf2_ref[...], preferred_element_type=f32) + bf2_ref[...]

    mx = jnp.max(logits, axis=-1, keepdims=True)
    s = logits - mx
    lse = jnp.log(jnp.sum(jnp.exp(s), axis=-1, keepdims=True))
    out_ref[...] = s - lse


_VMEM = pl.BlockSpec(memory_space=pltpu.MemorySpace.VMEM)


def lenet_forward(x_nchw, kp):
    """x_nchw: (N, 1, 28, 28) float; kp: packed kernel params (see pack_params)."""
    x2 = x_nchw[:, 0, :, :].astype(jnp.float32)         # (N, 28, 28)
    n = x2.shape[0]
    return pl.pallas_call(
        _lenet_fused_kernel,
        out_shape=jax.ShapeDtypeStruct((n, 10), jnp.float32),
        in_specs=[_VMEM] * 9,
        out_specs=_VMEM,
    )(x2, kp["t1"], kp["b1r"], kp["w2m"], kp["b2r"],
      kp["wf1p"], kp["bf1r"], kp["wf2p"], kp["bf2r"])


# ---------------------------------------------------------------------------
# One-time parameter packing (PyTorch layout -> kernel operands)
# ---------------------------------------------------------------------------
def pack_params(p):
    # conv1 (32,1,5,5) -> 5 Toeplitz matrices T1[i]: (28, 24*32)
    w1 = p["conv1_w"].astype(jnp.float32)
    t1 = jnp.zeros((5, 28, 24, 32), jnp.float32)
    wpos = jnp.arange(24)
    for i in range(5):
        for j in range(5):
            t1 = t1.at[i, wpos + j, wpos, :].set(
                jnp.broadcast_to(w1[:, 0, i, j], (24, 32)))
    t1 = t1.reshape(5, 28, 24 * 32)
    b1r = jnp.tile(p["conv1_b"].astype(jnp.float32), 24).reshape(1, 768)

    # conv2 (64,32,2,2) -> (4, 32, 64) with k = i*2 + j
    w2m = jnp.transpose(p["conv2_w"].astype(jnp.float32), (2, 3, 1, 0)).reshape(4, 32, 64)
    b2r = p["conv2_b"].astype(jnp.float32).reshape(1, 64)

    # fc1 (512,1600): fold the NCHW flatten permutation in, store as bf16.
    wf1p = (p["fc1_w"].astype(jnp.float32)
            .reshape(512, 64, 5, 5)          # [out, c, h, w]
            .transpose(2, 3, 1, 0)           # [h, w, c, out]
            .reshape(1600, 512)
            .astype(jnp.bfloat16))
    bf1r = p["fc1_b"].astype(jnp.float32).reshape(1, 512)

    # fc2 (10,512) -> (512,10)
    wf2p = jnp.transpose(p["fc2_w"].astype(jnp.float32)).reshape(512, 10)
    bf2r = p["fc2_b"].astype(jnp.float32).reshape(1, 10)

    return dict(t1=t1, b1r=b1r, w2m=w2m, b2r=b2r,
                wf1p=wf1p, bf1r=bf1r, wf2p=wf2p, bf2r=bf2r)


def init_params(key):
    ks = jax.random.split(key, 8)
    return {
        "conv1_w": jax.random.normal(ks[0], (32, 1, 5, 5), jnp.float32) * 0.1,
        "conv1_b": jax.random.normal(ks[1], (32,), jnp.float32) * 0.1,
        "conv2_w": jax.random.normal(ks[2], (64, 32, 2, 2), jnp.float32) * 0.05,
        "conv2_b": jax.random.normal(ks[3], (64,), jnp.float32) * 0.05,
        "fc1_w": jax.random.normal(ks[4], (512, 1600), jnp.float32) * 0.02,
        "fc1_b": jax.random.normal(ks[5], (512,), jnp.float32) * 0.02,
        "fc2_w": jax.random.normal(ks[6], (10, 512), jnp.float32) * 0.05,
        "fc2_b": jax.random.normal(ks[7], (10,), jnp.float32) * 0.05,
    }


# ---------------------------------------------------------------------------
# Pure-JAX reference (PyTorch semantics) for correctness checking
# ---------------------------------------------------------------------------
def lenet_reference(x_nchw, p):
    x = x_nchw.astype(jnp.float32)
    y = jax.lax.conv_general_dilated(x, p["conv1_w"], (1, 1), "VALID",
                                     dimension_numbers=("NCHW", "OIHW", "NCHW"))
    y = jax.nn.relu(y + p["conv1_b"][None, :, None, None])
    y = jax.lax.reduce_window(y, -jnp.inf, jax.lax.max,
                              (1, 1, 2, 2), (1, 1, 2, 2), "VALID")
    y = jax.lax.conv_general_dilated(y, p["conv2_w"], (1, 1), "VALID",
                                     dimension_numbers=("NCHW", "OIHW", "NCHW"))
    y = jax.nn.relu(y + p["conv2_b"][None, :, None, None])
    y = jax.lax.reduce_window(y, -jnp.inf, jax.lax.max,
                              (1, 1, 2, 2), (1, 1, 2, 2), "VALID")
    feat = y.reshape(y.shape[0], -1)                     # x.view(-1, 5*5*64)
    h1 = jax.nn.relu(feat @ p["fc1_w"].T + p["fc1_b"])
    logits = h1 @ p["fc2_w"].T + p["fc2_b"]
    return jax.nn.log_softmax(logits, axis=-1)


if __name__ == "__main__":
    key = jax.random.PRNGKey(0)
    k_in, k_params = jax.random.split(key)

    # fc1 (5*5*64 inputs) implies a 1x28x28 input; batch = 2.
    x = jax.random.normal(k_in, (2, 1, 28, 28), jnp.float32)
    params = init_params(k_params)
    packed = pack_params(params)                         # one-time weight packing

    out = jax.jit(lenet_forward)(x, packed)
    out = jax.block_until_ready(out)

    assert out.shape == (2, 10), out.shape
    # log_softmax sanity: probabilities sum to 1 per row.
    probs_sum = jnp.sum(jnp.exp(out), axis=1)
    assert bool(jnp.all(jnp.abs(probs_sum - 1.0) < 1e-3)), probs_sum
    # Match the PyTorch-semantics reference (loose tolerance covers bf16 fc1).
    ref = lenet_reference(x, params)
    max_err = float(jnp.max(jnp.abs(out - ref)))
    assert max_err < 5e-2, max_err

    print("KERNEL_OK")
</pallas_src>

<mosaic_0001>
module attributes {stable_mosaic.version = 11 : i64} {
  func.func @_lenet_fused_kernel(%arg0: memref<2x28x28xf32, #tpu.memory_space<vmem>>, %arg1: memref<5x28x768xf32, #tpu.memory_space<vmem>>, %arg2: memref<1x768xf32, #tpu.memory_space<vmem>>, %arg3: memref<4x32x64xf32, #tpu.memory_space<vmem>>, %arg4: memref<1x64xf32, #tpu.memory_space<vmem>>, %arg5: memref<1600x512xbf16, #tpu.memory_space<vmem>>, %arg6: memref<1x512xf32, #tpu.memory_space<vmem>>, %arg7: memref<512x10xf32, #tpu.memory_space<vmem>>, %arg8: memref<1x10xf32, #tpu.memory_space<vmem>>, %arg9: memref<2x10xf32, #tpu.memory_space<vmem>>) attributes {dimension_semantics = [], scalar_prefetch = 0 : i64, scratch_operands = 0 : i64, tpu.core_type = #tpu.core_type<tc>} {
    %c0 = arith.constant 0 : index
    %c0_0 = arith.constant 0 : index
    %c0_1 = arith.constant 0 : index
    %0 = vector.load %arg0[%c0, %c0_0, %c0_1] : memref<2x28x28xf32, #tpu.memory_space<vmem>>, vector<1x28x28xf32>
    %1 = vector.shape_cast %0 : vector<1x28x28xf32> to vector<28x28xf32>
    %c1 = arith.constant 1 : index
    %c0_2 = arith.constant 0 : index
    %c0_3 = arith.constant 0 : index
    %2 = vector.load %arg0[%c1, %c0_2, %c0_3] : memref<2x28x28xf32, #tpu.memory_space<vmem>>, vector<1x28x28xf32>
    %3 = vector.shape_cast %2 : vector<1x28x28xf32> to vector<28x28xf32>
    %4 = vector.extract_strided_slice %1 {offsets = [0, 0], sizes = [24, 28], strides = [1, 1]} : vector<28x28xf32> to vector<24x28xf32>
    %5 = vector.extract_strided_slice %3 {offsets = [0, 0], sizes = [24, 28], strides = [1, 1]} : vector<28x28xf32> to vector<24x28xf32>
    %6 = tpu.concatenate %4, %5 in 0 : vector<24x28xf32>, vector<24x28xf32> -> vector<48x28xf32>
    %c0_4 = arith.constant 0 : index
    %c0_5 = arith.constant 0 : index
    %c0_6 = arith.constant 0 : index
    %7 = vector.load %arg1[%c0_4, %c0_5, %c0_6] : memref<5x28x768xf32, #tpu.memory_space<vmem>>, vector<1x28x768xf32>
    %8 = vector.shape_cast %7 : vector<1x28x768xf32> to vector<28x768xf32>
    %cst = arith.constant dense<0.000000e+00> : vector<48x768xf32>
    %9 = tpu.matmul %6, %8, %cst {dimension_numbers = #tpu.dot_dimension_numbers<[1], [0], [0], [1], [0, 0, 1, 1], [], []>} : vector<48x28xf32>, vector<28x768xf32>, vector<48x768xf32> -> vector<48x768xf32>
    %10 = vector.extract_strided_slice %1 {offsets = [1, 0], sizes = [24, 28], strides = [1, 1]} : vector<28x28xf32> to vector<24x28xf32>
    %11 = vector.extract_strided_slice %3 {offsets = [1, 0], sizes = [24, 28], strides = [1, 1]} : vector<28x28xf32> to vector<24x28xf32>
    %12 = tpu.concatenate %10, %11 in 0 : vector<24x28xf32>, vector<24x28xf32> -> vector<48x28xf32>
    %c1_7 = arith.constant 1 : index
    %c0_8 = arith.constant 0 : index
    %c0_9 = arith.constant 0 : index
    %13 = vector.load %arg1[%c1_7, %c0_8, %c0_9] : memref<5x28x768xf32, #tpu.memory_space<vmem>>, vector<1x28x768xf32>
    %14 = vector.shape_cast %13 : vector<1x28x768xf32> to vector<28x768xf32>
    %cst_10 = arith.constant dense<0.000000e+00> : vector<48x768xf32>
    %15 = tpu.matmul %12, %14, %cst_10 {dimension_numbers = #tpu.dot_dimension_numbers<[1], [0], [0], [1], [0, 0, 1, 1], [], []>} : vector<48x28xf32>, vector<28x768xf32>, vector<48x768xf32> -> vector<48x768xf32>
    %16 = arith.addf %9, %15 : vector<48x768xf32>
    %17 = vector.extract_strided_slice %1 {offsets = [2, 0], sizes = [24, 28], strides = [1, 1]} : vector<28x28xf32> to vector<24x28xf32>
    %18 = vector.extract_strided_slice %3 {offsets = [2, 0], sizes = [24, 28], strides = [1, 1]} : vector<28x28xf32> to vector<24x28xf32>
    %19 = tpu.concatenate %17, %18 in 0 : vector<24x28xf32>, vector<24x28xf32> -> vector<48x28xf32>
    %c2 = arith.constant 2 : index
    %c0_11 = arith.constant 0 : index
    %c0_12 = arith.constant 0 : index
    %20 = vector.load %arg1[%c2, %c0_11, %c0_12] : memref<5x28x768xf32, #tpu.memory_space<vmem>>, vector<1x28x768xf32>
    %21 = vector.shape_cast %20 : vector<1x28x768xf32> to vector<28x768xf32>
    %cst_13 = arith.constant dense<0.000000e+00> : vector<48x768xf32>
    %22 = tpu.matmul %19, %21, %cst_13 {dimension_numbers = #tpu.dot_dimension_numbers<[1], [0], [0], [1], [0, 0, 1, 1], [], []>} : vector<48x28xf32>, vector<28x768xf32>, vector<48x768xf32> -> vector<48x768xf32>
    %23 = arith.addf %16, %22 : vector<48x768xf32>
    %24 = vector.extract_strided_slice %1 {offsets = [3, 0], sizes = [24, 28], strides = [1, 1]} : vector<28x28xf32> to vector<24x28xf32>
    %25 = vector.extract_strided_slice %3 {offsets = [3, 0], sizes = [24, 28], strides = [1, 1]} : vector<28x28xf32> to vector<24x28xf32>
    %26 = tpu.concatenate %24, %25 in 0 : vector<24x28xf32>, vector<24x28xf32> -> vector<48x28xf32>
    %c3 = arith.constant 3 : index
    %c0_14 = arith.constant 0 : index
    %c0_15 = arith.constant 0 : index
    %27 = vector.load %arg1[%c3, %c0_14, %c0_15] : memref<5x28x768xf32, #tpu.memory_space<vmem>>, vector<1x28x768xf32>
    %28 = vector.shape_cast %27 : vector<1x28x768xf32> to vector<28x768xf32>
    %cst_16 = arith.constant dense<0.000000e+00> : vector<48x768xf32>
    %29 = tpu.matmul %26, %28, %cst_16 {dimension_numbers = #tpu.dot_dimension_numbers<[1], [0], [0], [1], [0, 0, 1, 1], [], []>} : vector<48x28xf32>, vector<28x768xf32>, vector<48x768xf32> -> vector<48x768xf32>
    %30 = arith.addf %23, %29 : vector<48x768xf32>
    %31 = vector.extract_strided_slice %1 {offsets = [4, 0], sizes = [24, 28], strides = [1, 1]} : vector<28x28xf32> to vector<24x28xf32>
    %32 = vector.extract_strided_slice %3 {offsets = [4, 0], sizes = [24, 28], strides = [1, 1]} : vector<28x28xf32> to vector<24x28xf32>
    %33 = tpu.concatenate %31, %32 in 0 : vector<24x28xf32>, vector<24x28xf32> -> vector<48x28xf32>
    %c4 = arith.constant 4 : index
    %c0_17 = arith.constant 0 : index
    %c0_18 = arith.constant 0 : index
    %34 = vector.load %arg1[%c4, %c0_17, %c0_18] : memref<5x28x768xf32, #tpu.memory_space<vmem>>, vector<1x28x768xf32>
    %35 = vector.shape_cast %34 : vector<1x28x768xf32> to vector<28x768xf32>
    %cst_19 = arith.constant dense<0.000000e+00> : vector<48x768xf32>
    %36 = tpu.matmul %33, %35, %cst_19 {dimension_numbers = #tpu.dot_dimension_numbers<[1], [0], [0], [1], [0, 0, 1, 1], [], []>} : vector<48x28xf32>, vector<28x768xf32>, vector<48x768xf32> -> vector<48x768xf32>
    %37 = arith.addf %30, %36 : vector<48x768xf32>
    %c0_20 = arith.constant 0 : index
    %c0_21 = arith.constant 0 : index
    %38 = vector.load %arg2[%c0_20, %c0_21] : memref<1x768xf32, #tpu.memory_space<vmem>>, vector<1x768xf32>
    %39 = vector.broadcast %38 : vector<1x768xf32> to vector<48x768xf32>
    %40 = arith.addf %37, %39 : vector<48x768xf32>
    %cst_22 = arith.constant 0.000000e+00 : f32
    %41 = vector.broadcast %cst_22 : f32 to vector<48x768xf32>
    %42 = arith.maximumf %40, %41 : vector<48x768xf32>
    %43 = vector.extract_strided_slice %42 {offsets = [1, 0], sizes = [47, 768], strides = [1, 1]} : vector<48x768xf32> to vector<47x768xf32>
    %44 = vector.extract_strided_slice %42 {offsets = [0, 0], sizes = [1, 768], strides = [1, 1]} : vector<48x768xf32> to vector<1x768xf32>
    %45 = tpu.concatenate %43, %44 in 0 : vector<47x768xf32>, vector<1x768xf32> -> vector<48x768xf32>
    %46 = arith.maximumf %42, %45 : vector<48x768xf32>
    %47 = vector.extract_strided_slice %46 {offsets = [0, 0], sizes = [1, 768], strides = [1, 1]} : vector<48x768xf32> to vector<1x768xf32>
    %48 = vector.extract_strided_slice %46 {offsets = [2, 0], sizes = [1, 768], strides = [1, 1]} : vector<48x768xf32> to vector<1x768xf32>
    %49 = vector.extract_strided_slice %46 {offsets = [4, 0], sizes = [1, 768], strides = [1, 1]} : vector<48x768xf32> to vector<1x768xf32>
    %50 = vector.extract_strided_slice %46 {offsets = [6, 0], sizes = [1, 768], strides = [1, 1]} : vector<48x768xf32> to vector<1x768xf32>
    %51 = vector.extract_strided_slice %46 {offsets = [8, 0], sizes = [1, 768], strides = [1, 1]} : vector<48x768xf32> to vector<1x768xf32>
    %52 = vector.extract_strided_slice %46 {offsets = [10, 0], sizes = [1, 768], strides = [1, 1]} : vector<48x768xf32> to vector<1x768xf32>
    %53 = vector.extract_strided_slice %46 {offsets = [12, 0], sizes = [1, 768], strides = [1, 1]} : vector<48x768xf32> to vector<1x768xf32>
    %54 = vector.extract_strided_slice %46 {offsets = [14, 0], sizes = [1, 768], strides = [1, 1]} : vector<48x768xf32> to vector<1x768xf32>
    %55 = vector.extract_strided_slice %46 {offsets = [16, 0], sizes = [1, 768], strides = [1, 1]} : vector<48x768xf32> to vector<1x768xf32>
    %56 = vector.extract_strided_slice %46 {offsets = [18, 0], sizes = [1, 768], strides = [1, 1]} : vector<48x768xf32> to vector<1x768xf32>
    %57 = vector.extract_strided_slice %46 {offsets = [20, 0], sizes = [1, 768], strides = [1, 1]} : vector<48x768xf32> to vector<1x768xf32>
    %58 = vector.extract_strided_slice %46 {offsets = [22, 0], sizes = [1, 768], strides = [1, 1]} : vector<48x768xf32> to vector<1x768xf32>
    %59 = vector.extract_strided_slice %46 {offsets = [24, 0], sizes = [1, 768], strides = [1, 1]} : vector<48x768xf32> to vector<1x768xf32>
    %60 = vector.extract_strided_slice %46 {offsets = [26, 0], sizes = [1, 768], strides = [1, 1]} : vector<48x768xf32> to vector<1x768xf32>
    %61 = vector.extract_strided_slice %46 {offsets = [28, 0], sizes = [1, 768], strides = [1, 1]} : vector<48x768xf32> to vector<1x768xf32>
    %62 = vector.extract_strided_slice %46 {offsets = [30, 0], sizes = [1, 768], strides = [1, 1]} : vector<48x768xf32> to vector<1x768xf32>
    %63 = vector.extract_strided_slice %46 {offsets = [32, 0], sizes = [1, 768], strides = [1, 1]} : vector<48x768xf32> to vector<1x768xf32>
    %64 = vector.extract_strided_slice %46 {offsets = [34, 0], sizes = [1, 768], strides = [1, 1]} : vector<48x768xf32> to vector<1x768xf32>
    %65 = vector.extract_strided_slice %46 {offsets = [36, 0], sizes = [1, 768], strides = [1, 1]} : vector<48x768xf32> to vector<1x768xf32>
    %66 = vector.extract_strided_slice %46 {offsets = [38, 0], sizes = [1, 768], strides = [1, 1]} : vector<48x768xf32> to vector<1x768xf32>
    %67 = vector.extract_strided_slice %46 {offsets = [40, 0], sizes = [1, 768], strides = [1, 1]} : vector<48x768xf32> to vector<1x768xf32>
    %68 = vector.extract_strided_slice %46 {offsets = [42, 0], sizes = [1, 768], strides = [1, 1]} : vector<48x768xf32> to vector<1x768xf32>
    %69 = vector.extract_strided_slice %46 {offsets = [44, 0], sizes = [1, 768], strides = [1, 1]} : vector<48x768xf32> to vector<1x768xf32>
    %70 = vector.extract_strided_slice %46 {offsets = [46, 0], sizes = [1, 768], strides = [1, 1]} : vector<48x768xf32> to vector<1x768xf32>
    %71 = tpu.concatenate %47, %48, %49, %50, %51, %52, %53, %54, %55, %56, %57, %58, %59, %60, %61, %62 in 0 : vector<1x768xf32>, vector<1x768xf32>, vector<1x768xf32>, vector<1x768xf32>, vector<1x768xf32>, vector<1x768xf32>, vector<1x768xf32>, vector<1x768xf32>, vector<1x768xf32>, vector<1x768xf32>, vector<1x768xf32>, vector<1x768xf32>, vector<1x768xf32>, vector<1x768xf32>, vector<1x768xf32>, vector<1x768xf32> -> vector<16x768xf32>
    %72 = tpu.concatenate %63, %64, %65, %66, %67, %68, %69, %70 in 0 : vector<1x768xf32>, vector<1x768xf32>, vector<1x768xf32>, vector<1x768xf32>, vector<1x768xf32>, vector<1x768xf32>, vector<1x768xf32>, vector<1x768xf32> -> vector<8x768xf32>
    %73 = tpu.concatenate %71, %72 in 0 : vector<16x768xf32>, vector<8x768xf32> -> vector<24x768xf32>
    %74 = vector.extract_strided_slice %73 {offsets = [0, 0], sizes = [24, 32], strides = [1, 1]} : vector<24x768xf32> to vector<24x32xf32>
    %75 = vector.extract_strided_slice %73 {offsets = [0, 32], sizes = [24, 32], strides = [1, 1]} : vector<24x768xf32> to vector<24x32xf32>
    %76 = arith.maximumf %74, %75 : vector<24x32xf32>
    %77 = vector.extract_strided_slice %73 {offsets = [0, 64], sizes = [24, 32], strides = [1, 1]} : vector<24x768xf32> to vector<24x32xf32>
    %78 = vector.extract_strided_slice %73 {offsets = [0, 96], sizes = [24, 32], strides = [1, 1]} : vector<24x768xf32> to vector<24x32xf32>
    %79 = arith.maximumf %77, %78 : vector<24x32xf32>
    %80 = vector.extract_strided_slice %73 {offsets = [0, 128], sizes = [24, 32], strides = [1, 1]} : vector<24x768xf32> to vector<24x32xf32>
    %81 = vector.extract_strided_slice %73 {offsets = [0, 160], sizes = [24, 32], strides = [1, 1]} : vector<24x768xf32> to vector<24x32xf32>
    %82 = arith.maximumf %80, %81 : vector<24x32xf32>
    %83 = vector.extract_strided_slice %73 {offsets = [0, 192], sizes = [24, 32], strides = [1, 1]} : vector<24x768xf32> to vector<24x32xf32>
    %84 = vector.extract_strided_slice %73 {offsets = [0, 224], sizes = [24, 32], strides = [1, 1]} : vector<24x768xf32> to vector<24x32xf32>
    %85 = arith.maximumf %83, %84 : vector<24x32xf32>
    %86 = vector.extract_strided_slice %73 {offsets = [0, 256], sizes = [24, 32], strides = [1, 1]} : vector<24x768xf32> to vector<24x32xf32>
    %87 = vector.extract_strided_slice %73 {offsets = [0, 288], sizes = [24, 32], strides = [1, 1]} : vector<24x768xf32> to vector<24x32xf32>
    %88 = arith.maximumf %86, %87 : vector<24x32xf32>
    %89 = vector.extract_strided_slice %73 {offsets = [0, 320], sizes = [24, 32], strides = [1, 1]} : vector<24x768xf32> to vector<24x32xf32>
    %90 = vector.extract_strided_slice %73 {offsets = [0, 352], sizes = [24, 32], strides = [1, 1]} : vector<24x768xf32> to vector<24x32xf32>
    %91 = arith.maximumf %89, %90 : vector<24x32xf32>
    %92 = vector.extract_strided_slice %73 {offsets = [0, 384], sizes = [24, 32], strides = [1, 1]} : vector<24x768xf32> to vector<24x32xf32>
    %93 = vector.extract_strided_slice %73 {offsets = [0, 416], sizes = [24, 32], strides = [1, 1]} : vector<24x768xf32> to vector<24x32xf32>
    %94 = arith.maximumf %92, %93 : vector<24x32xf32>
    %95 = vector.extract_strided_slice %73 {offsets = [0, 448], sizes = [24, 32], strides = [1, 1]} : vector<24x768xf32> to vector<24x32xf32>
    %96 = vector.extract_strided_slice %73 {offsets = [0, 480], sizes = [24, 32], strides = [1, 1]} : vector<24x768xf32> to vector<24x32xf32>
    %97 = arith.maximumf %95, %96 : vector<24x32xf32>
    %98 = vector.extract_strided_slice %73 {offsets = [0, 512], sizes = [24, 32], strides = [1, 1]} : vector<24x768xf32> to vector<24x32xf32>
    %99 = vector.extract_strided_slice %73 {offsets = [0, 544], sizes = [24, 32], strides = [1, 1]} : vector<24x768xf32> to vector<24x32xf32>
    %100 = arith.maximumf %98, %99 : vector<24x32xf32>
    %101 = vector.extract_strided_slice %73 {offsets = [0, 576], sizes = [24, 32], strides = [1, 1]} : vector<24x768xf32> to vector<24x32xf32>
    %102 = vector.extract_strided_slice %73 {offsets = [0, 608], sizes = [24, 32], strides = [1, 1]} : vector<24x768xf32> to vector<24x32xf32>
    %103 = arith.maximumf %101, %102 : vector<24x32xf32>
    %104 = vector.extract_strided_slice %73 {offsets = [0, 640], sizes = [24, 32], strides = [1, 1]} : vector<24x768xf32> to vector<24x32xf32>
    %105 = vector.extract_strided_slice %73 {offsets = [0, 672], sizes = [24, 32], strides = [1, 1]} : vector<24x768xf32> to vector<24x32xf32>
    %106 = arith.maximumf %104, %105 : vector<24x32xf32>
    %107 = vector.extract_strided_slice %73 {offsets = [0, 704], sizes = [24, 32], strides = [1, 1]} : vector<24x768xf32> to vector<24x32xf32>
    %108 = vector.extract_strided_slice %73 {offsets = [0, 736], sizes = [24, 32], strides = [1, 1]} : vector<24x768xf32> to vector<24x32xf32>
    %109 = arith.maximumf %107, %108 : vector<24x32xf32>
    %110 = vector.extract_strided_slice %76 {offsets = [0, 0], sizes = [12, 32], strides = [1, 1]} : vector<24x32xf32> to vector<12x32xf32>
    %111 = vector.extract_strided_slice %79 {offsets = [0, 0], sizes = [12, 32], strides = [1, 1]} : vector<24x32xf32> to vector<12x32xf32>
    %112 = vector.extract_strided_slice %82 {offsets = [0, 0], sizes = [12, 32], strides = [1, 1]} : vector<24x32xf32> to vector<12x32xf32>
    %113 = vector.extract_strided_slice %85 {offsets = [0, 0], sizes = [12, 32], strides = [1, 1]} : vector<24x32xf32> to vector<12x32xf32>
    %114 = vector.extract_strided_slice %88 {offsets = [0, 0], sizes = [12, 32], strides = [1, 1]} : vector<24x32xf32> to vector<12x32xf32>
    %115 = vector.extract_strided_slice %91 {offsets = [0, 0], sizes = [12, 32], strides = [1, 1]} : vector<24x32xf32> to vector<12x32xf32>
    %116 = vector.extract_strided_slice %94 {offsets = [0, 0], sizes = [12, 32], strides = [1, 1]} : vector<24x32xf32> to vector<12x32xf32>
    %117 = vector.extract_strided_slice %97 {offsets = [0, 0], sizes = [12, 32], strides = [1, 1]} : vector<24x32xf32> to vector<12x32xf32>
    %118 = vector.extract_strided_slice %100 {offsets = [0, 0], sizes = [12, 32], strides = [1, 1]} : vector<24x32xf32> to vector<12x32xf32>
    %119 = vector.extract_strided_slice %103 {offsets = [0, 0], sizes = [12, 32], strides = [1, 1]} : vector<24x32xf32> to vector<12x32xf32>
    %120 = vector.extract_strided_slice %106 {offsets = [0, 0], sizes = [12, 32], strides = [1, 1]} : vector<24x32xf32> to vector<12x32xf32>
    %121 = vector.extract_strided_slice %109 {offsets = [0, 0], sizes = [12, 32], strides = [1, 1]} : vector<24x32xf32> to vector<12x32xf32>
    %122 = vector.extract_strided_slice %76 {offsets = [12, 0], sizes = [12, 32], strides = [1, 1]} : vector<24x32xf32> to vector<12x32xf32>
    %123 = vector.extract_strided_slice %79 {offsets = [12, 0], sizes = [12, 32], strides = [1, 1]} : vector<24x32xf32> to vector<12x32xf32>
    %124 = vector.extract_strided_slice %82 {offsets = [12, 0], sizes = [12, 32], strides = [1, 1]} : vector<24x32xf32> to vector<12x32xf32>
    %125 = vector.extract_strided_slice %85 {offsets = [12, 0], sizes = [12, 32], strides = [1, 1]} : vector<24x32xf32> to vector<12x32xf32>
    %126 = vector.extract_strided_slice %88 {offsets = [12, 0], sizes = [12, 32], strides = [1, 1]} : vector<24x32xf32> to vector<12x32xf32>
    %127 = vector.extract_strided_slice %91 {offsets = [12, 0], sizes = [12, 32], strides = [1, 1]} : vector<24x32xf32> to vector<12x32xf32>
    %128 = vector.extract_strided_slice %94 {offsets = [12, 0], sizes = [12, 32], strides = [1, 1]} : vector<24x32xf32> to vector<12x32xf32>
    %129 = vector.extract_strided_slice %97 {offsets = [12, 0], sizes = [12, 32], strides = [1, 1]} : vector<24x32xf32> to vector<12x32xf32>
    %130 = vector.extract_strided_slice %100 {offsets = [12, 0], sizes = [12, 32], strides = [1, 1]} : vector<24x32xf32> to vector<12x32xf32>
    %131 = vector.extract_strided_slice %103 {offsets = [12, 0], sizes = [12, 32], strides = [1, 1]} : vector<24x32xf32> to vector<12x32xf32>
    %132 = vector.extract_strided_slice %106 {offsets = [12, 0], sizes = [12, 32], strides = [1, 1]} : vector<24x32xf32> to vector<12x32xf32>
    %133 = vector.extract_strided_slice %109 {offsets = [12, 0], sizes = [12, 32], strides = [1, 1]} : vector<24x32xf32> to vector<12x32xf32>
    %134 = tpu.concatenate %110, %111, %112, %113, %114, %115, %116, %117, %118, %119, %120, %121, %122, %123, %124, %125 in 0 : vector<12x32xf32>, vector<12x32xf32>, vector<12x32xf32>, vector<12x32xf32>, vector<12x32xf32>, vector<12x32xf32>, vector<12x32xf32>, vector<12x32xf32>, vector<12x32xf32>, vector<12x32xf32>, vector<12x32xf32>, vector<12x32xf32>, vector<12x32xf32>, vector<12x32xf32>, vector<12x32xf32>, vector<12x32xf32> -> vector<192x32xf32>
    %135 = tpu.concatenate %126, %127, %128, %129, %130, %131, %132, %133 in 0 : vector<12x32xf32>, vector<12x32xf32>, vector<12x32xf32>, vector<12x32xf32>, vector<12x32xf32>, vector<12x32xf32>, vector<12x32xf32>, vector<12x32xf32> -> vector<96x32xf32>
    %136 = tpu.concatenate %134, %135 in 0 : vector<192x32xf32>, vector<96x32xf32> -> vector<288x32xf32>
    %c0_23 = arith.constant 0 : index
    %c0_24 = arith.constant 0 : index
    %c0_25 = arith.constant 0 : index
    %137 = vector.load %arg3[%c0_23, %c0_24, %c0_25] : memref<4x32x64xf32, #tpu.memory_space<vmem>>, vector<1x32x64xf32>
    %138 = vector.shape_cast %137 : vector<1x32x64xf32> to vector<32x64xf32>
    %cst_26 = arith.constant dense<0.000000e+00> : vector<288x64xf32>
    %139 = tpu.matmul %136, %138, %cst_26 {dimension_numbers = #tpu.dot_dimension_numbers<[1], [0], [0], [1], [0, 0, 1, 1], [], []>} : vector<288x32xf32>, vector<32x64xf32>, vector<288x64xf32> -> vector<288x64xf32>
    %140 = vector.extract_strided_slice %136 {offsets = [12, 0], sizes = [276, 32], strides = [1, 1]} : vector<288x32xf32> to vector<276x32xf32>
    %141 = vector.extract_strided_slice %136 {offsets = [0, 0], sizes = [12, 32], strides = [1, 1]} : vector<288x32xf32> to vector<12x32xf32>
    %142 = tpu.concatenate %140, %141 in 0 : vector<276x32xf32>, vector<12x32xf32> -> vector<288x32xf32>
    %c1_27 = arith.constant 1 : index
    %c0_28 = arith.constant 0 : index
    %c0_29 = arith.constant 0 : index
    %143 = vector.load %arg3[%c1_27, %c0_28, %c0_29] : memref<4x32x64xf32, #tpu.memory_space<vmem>>, vector<1x32x64xf32>
    %144 = vector.shape_cast %143 : vector<1x32x64xf32> to vector<32x64xf32>
    %cst_30 = arith.constant dense<0.000000e+00> : vector<288x64xf32>
    %145 = tpu.matmul %142, %144, %cst_30 {dimension_numbers = #tpu.dot_dimension_numbers<[1], [0], [0], [1], [0, 0, 1, 1], [], []>} : vector<288x32xf32>, vector<32x64xf32>, vector<288x64xf32> -> vector<288x64xf32>
    %146 = arith.addf %139, %145 : vector<288x64xf32>
    %147 = vector.extract_strided_slice %136 {offsets = [1, 0], sizes = [287, 32], strides = [1, 1]} : vector<288x32xf32> to vector<287x32xf32>
    %148 = vector.extract_strided_slice %136 {offsets = [0, 0], sizes = [1, 32], strides = [1, 1]} : vector<288x32xf32> to vector<1x32xf32>
    %149 = tpu.concatenate %147, %148 in 0 : vector<287x32xf32>, vector<1x32xf32> -> vector<288x32xf32>
    %c2_31 = arith.constant 2 : index
    %c0_32 = arith.constant 0 : index
    %c0_33 = arith.constant 0 : index
    %150 = vector.load %arg3[%c2_31, %c0_32, %c0_33] : memref<4x32x64xf32, #tpu.memory_space<vmem>>, vector<1x32x64xf32>
    %151 = vector.shape_cast %150 : vector<1x32x64xf32> to vector<32x64xf32>
    %cst_34 = arith.constant dense<0.000000e+00> : vector<288x64xf32>
    %152 = tpu.matmul %149, %151, %cst_34 {dimension_numbers = #tpu.dot_dimension_numbers<[1], [0], [0], [1], [0, 0, 1, 1], [], []>} : vector<288x32xf32>, vector<32x64xf32>, vector<288x64xf32> -> vector<288x64xf32>
    %153 = arith.addf %146, %152 : vector<288x64xf32>
    %154 = vector.extract_strided_slice %136 {offsets = [13, 0], sizes = [275, 32], strides = [1, 1]} : vector<288x32xf32> to vector<275x32xf32>
    %155 = vector.extract_strided_slice %136 {offsets = [0, 0], sizes = [13, 32], strides = [1, 1]} : vector<288x32xf32> to vector<13x32xf32>
    %156 = tpu.concatenate %154, %155 in 0 : vector<275x32xf32>, vector<13x32xf32> -> vector<288x32xf32>
    %c3_35 = arith.constant 3 : index
    %c0_36 = arith.constant 0 : index
    %c0_37 = arith.constant 0 : index
    %157 = vector.load %arg3[%c3_35, %c0_36, %c0_37] : memref<4x32x64xf32, #tpu.memory_space<vmem>>, vector<1x32x64xf32>
    %158 = vector.shape_cast %157 : vector<1x32x64xf32> to vector<32x64xf32>
    %cst_38 = arith.constant dense<0.000000e+00> : vector<288x64xf32>
    %159 = tpu.matmul %156, %158, %cst_38 {dimension_numbers = #tpu.dot_dimension_numbers<[1], [0], [0], [1], [0, 0, 1, 1], [], []>} : vector<288x32xf32>, vector<32x64xf32>, vector<288x64xf32> -> vector<288x64xf32>
    %160 = arith.addf %153, %159 : vector<288x64xf32>
    %c0_39 = arith.constant 0 : index
    %c0_40 = arith.constant 0 : index
    %161 = vector.load %arg4[%c0_39, %c0_40] : memref<1x64xf32, #tpu.memory_space<vmem>>, vector<1x64xf32>
    %162 = vector.broadcast %161 : vector<1x64xf32> to vector<288x64xf32>
    %163 = arith.addf %160, %162 : vector<288x64xf32>
    %cst_41 = arith.constant 0.000000e+00 : f32
    %164 = vector.broadcast %cst_41 : f32 to vector<288x64xf32>
    %165 = arith.maximumf %163, %164 : vector<288x64xf32>
    %166 = vector.extract_strided_slice %165 {offsets = [1, 0], sizes = [287, 64], strides = [1, 1]} : vector<288x64xf32> to vector<287x64xf32>
    %167 = vector.extract_strided_slice %165 {offsets = [0, 0], sizes = [1, 64], strides = [1, 1]} : vector<288x64xf32> to vector<1x64xf32>
    %168 = tpu.concatenate %166, %167 in 0 : vector<287x64xf32>, vector<1x64xf32> -> vector<288x64xf32>
    %169 = arith.maximumf %165, %168 : vector<288x64xf32>
    %170 = vector.extract_strided_slice %165 {offsets = [12, 0], sizes = [276, 64], strides = [1, 1]} : vector<288x64xf32> to vector<276x64xf32>
    %171 = vector.extract_strided_slice %165 {offsets = [0, 0], sizes = [12, 64], strides = [1, 1]} : vector<288x64xf32> to vector<12x64xf32>
    %172 = tpu.concatenate %170, %171 in 0 : vector<276x64xf32>, vector<12x64xf32> -> vector<288x64xf32>
    %173 = vector.extract_strided_slice %165 {offsets = [13, 0], sizes = [275, 64], strides = [1, 1]} : vector<288x64xf32> to vector<275x64xf32>
    %174 = vector.extract_strided_slice %165 {offsets = [0, 0], sizes = [13, 64], strides = [1, 1]} : vector<288x64xf32> to vector<13x64xf32>
    %175 = tpu.concatenate %173, %174 in 0 : vector<275x64xf32>, vector<13x64xf32> -> vector<288x64xf32>
    %176 = arith.maximumf %172, %175 : vector<288x64xf32>
    %177 = arith.maximumf %169, %176 : vector<288x64xf32>
    %178 = vector.extract_strided_slice %177 {offsets = [0, 0], sizes = [1, 64], strides = [1, 1]} : vector<288x64xf32> to vector<1x64xf32>
    %179 = vector.extract_strided_slice %177 {offsets = [24, 0], sizes = [1, 64], strides = [1, 1]} : vector<288x64xf32> to vector<1x64xf32>
    %180 = vector.extract_strided_slice %177 {offsets = [48, 0], sizes = [1, 64], strides = [1, 1]} : vector<288x64xf32> to vector<1x64xf32>
    %181 = vector.extract_strided_slice %177 {offsets = [72, 0], sizes = [1, 64], strides = [1, 1]} : vector<288x64xf32> to vector<1x64xf32>
    %182 = vector.extract_strided_slice %177 {offsets = [96, 0], sizes = [1, 64], strides = [1, 1]} : vector<288x64xf32> to vector<1x64xf32>
    %183 = vector.extract_strided_slice %177 {offsets = [2, 0], sizes = [1, 64], strides = [1, 1]} : vector<288x64xf32> to vector<1x64xf32>
    %184 = vector.extract_strided_slice %177 {offsets = [26, 0], sizes = [1, 64], strides = [1, 1]} : vector<288x64xf32> to vector<1x64xf32>
    %185 = vector.extract_strided_slice %177 {offsets = [50, 0], sizes = [1, 64], strides = [1, 1]} : vector<288x64xf32> to vector<1x64xf32>
    %186 = vector.extract_strided_slice %177 {offsets = [74, 0], sizes = [1, 64], strides = [1, 1]} : vector<288x64xf32> to vector<1x64xf32>
    %187 = vector.extract_strided_slice %177 {offsets = [98, 0], sizes = [1, 64], strides = [1, 1]} : vector<288x64xf32> to vector<1x64xf32>
    %188 = vector.extract_strided_slice %177 {offsets = [4, 0], sizes = [1, 64], strides = [1, 1]} : vector<288x64xf32> to vector<1x64xf32>
    %189 = vector.extract_strided_slice %177 {offsets = [28, 0], sizes = [1, 64], strides = [1, 1]} : vector<288x64xf32> to vector<1x64xf32>
    %190 = vector.extract_strided_slice %177 {offsets = [52, 0], sizes = [1, 64], strides = [1, 1]} : vector<288x64xf32> to vector<1x64xf32>
    %191 = vector.extract_strided_slice %177 {offsets = [76, 0], sizes = [1, 64], strides = [1, 1]} : vector<288x64xf32> to vector<1x64xf32>
    %192 = vector.extract_strided_slice %177 {offsets = [100, 0], sizes = [1, 64], strides = [1, 1]} : vector<288x64xf32> to vector<1x64xf32>
    %193 = vector.extract_strided_slice %177 {offsets = [6, 0], sizes = [1, 64], strides = [1, 1]} : vector<288x64xf32> to vector<1x64xf32>
    %194 = vector.extract_strided_slice %177 {offsets = [30, 0], sizes = [1, 64], strides = [1, 1]} : vector<288x64xf32> to vector<1x64xf32>
    %195 = vector.extract_strided_slice %177 {offsets = [54, 0], sizes = [1, 64], strides = [1, 1]} : vector<288x64xf32> to vector<1x64xf32>
    %196 = vector.extract_strided_slice %177 {offsets = [78, 0], sizes = [1, 64], strides = [1, 1]} : vector<288x64xf32> to vector<1x64xf32>
    %197 = vector.extract_strided_slice %177 {offsets = [102, 0], sizes = [1, 64], strides = [1, 1]} : vector<288x64xf32> to vector<1x64xf32>
    %198 = vector.extract_strided_slice %177 {offsets = [8, 0], sizes = [1, 64], strides = [1, 1]} : vector<288x64xf32> to vector<1x64xf32>
    %199 = vector.extract_strided_slice %177 {offsets = [32, 0], sizes = [1, 64], strides = [1, 1]} : vector<288x64xf32> to vector<1x64xf32>
    %200 = vector.extract_strided_slice %177 {offsets = [56, 0], sizes = [1, 64], strides = [1, 1]} : vector<288x64xf32> to vector<1x64xf32>
    %201 = vector.extract_strided_slice %177 {offsets = [80, 0], sizes = [1, 64], strides = [1, 1]} : vector<288x64xf32> to vector<1x64xf32>
    %202 = vector.extract_strided_slice %177 {offsets = [104, 0], sizes = [1, 64], strides = [1, 1]} : vector<288x64xf32> to vector<1x64xf32>
    %203 = tpu.concatenate %178, %179, %180, %181, %182, %183, %184, %185, %186, %187, %188, %189, %190, %191, %192, %193 in 1 : vector<1x64xf32>, vector<1x64xf32>, vector<1x64xf32>, vector<1x64xf32>, vector<1x64xf32>, vector<1x64xf32>, vector<1x64xf32>, vector<1x64xf32>, vector<1x64xf32>, vector<1x64xf32>, vector<1x64xf32>, vector<1x64xf32>, vector<1x64xf32>, vector<1x64xf32>, vector<1x64xf32>, vector<1x64xf32> -> vector<1x1024xf32>
    %204 = tpu.concatenate %194, %195, %196, %197, %198, %199, %200, %201, %202 in 1 : vector<1x64xf32>, vector<1x64xf32>, vector<1x64xf32>, vector<1x64xf32>, vector<1x64xf32>, vector<1x64xf32>, vector<1x64xf32>, vector<1x64xf32>, vector<1x64xf32> -> vector<1x576xf32>
    %205 = tpu.concatenate %203, %204 in 1 : vector<1x1024xf32>, vector<1x576xf32> -> vector<1x1600xf32>
    %206 = vector.extract_strided_slice %177 {offsets = [144, 0], sizes = [1, 64], strides = [1, 1]} : vector<288x64xf32> to vector<1x64xf32>
    %207 = vector.extract_strided_slice %177 {offsets = [168, 0], sizes = [1, 64], strides = [1, 1]} : vector<288x64xf32> to vector<1x64xf32>
    %208 = vector.extract_strided_slice %177 {offsets = [192, 0], sizes = [1, 64], strides = [1, 1]} : vector<288x64xf32> to vector<1x64xf32>
    %209 = vector.extract_strided_slice %177 {offsets = [216, 0], sizes = [1, 64], strides = [1, 1]} : vector<288x64xf32> to vector<1x64xf32>
    %210 = vector.extract_strided_slice %177 {offsets = [240, 0], sizes = [1, 64], strides = [1, 1]} : vector<288x64xf32> to vector<1x64xf32>
    %211 = vector.extract_strided_slice %177 {offsets = [146, 0], sizes = [1, 64], strides = [1, 1]} : vector<288x64xf32> to vector<1x64xf32>
    %212 = vector.extract_strided_slice %177 {offsets = [170, 0], sizes = [1, 64], strides = [1, 1]} : vector<288x64xf32> to vector<1x64xf32>
    %213 = vector.extract_strided_slice %177 {offsets = [194, 0], sizes = [1, 64], strides = [1, 1]} : vector<288x64xf32> to vector<1x64xf32>
    %214 = vector.extract_strided_slice %177 {offsets = [218, 0], sizes = [1, 64], strides = [1, 1]} : vector<288x64xf32> to vector<1x64xf32>
    %215 = vector.extract_strided_slice %177 {offsets = [242, 0], sizes = [1, 64], strides = [1, 1]} : vector<288x64xf32> to vector<1x64xf32>
    %216 = vector.extract_strided_slice %177 {offsets = [148, 0], sizes = [1, 64], strides = [1, 1]} : vector<288x64xf32> to vector<1x64xf32>
    %217 = vector.extract_strided_slice %177 {offsets = [172, 0], sizes = [1, 64], strides = [1, 1]} : vector<288x64xf32> to vector<1x64xf32>
    %218 = vector.extract_strided_slice %177 {offsets = [196, 0], sizes = [1, 64], strides = [1, 1]} : vector<288x64xf32> to vector<1x64xf32>
    %219 = vector.extract_strided_slice %177 {offsets = [220, 0], sizes = [1, 64], strides = [1, 1]} : vector<288x64xf32> to vector<1x64xf32>
    %220 = vector.extract_strided_slice %177 {offsets = [244, 0], sizes = [1, 64], strides = [1, 1]} : vector<288x64xf32> to vector<1x64xf32>
    %221 = vector.extract_strided_slice %177 {offsets = [150, 0], sizes = [1, 64], strides = [1, 1]} : vector<288x64xf32> to vector<1x64xf32>
    %222 = vector.extract_strided_slice %177 {offsets = [174, 0], sizes = [1, 64], strides = [1, 1]} : vector<288x64xf32> to vector<1x64xf32>
    %223 = vector.extract_strided_slice %177 {offsets = [198, 0], sizes = [1, 64], strides = [1, 1]} : vector<288x64xf32> to vector<1x64xf32>
    %224 = vector.extract_strided_slice %177 {offsets = [222, 0], sizes = [1, 64], strides = [1, 1]} : vector<288x64xf32> to vector<1x64xf32>
    %225 = vector.extract_strided_slice %177 {offsets = [246, 0], sizes = [1, 64], strides = [1, 1]} : vector<288x64xf32> to vector<1x64xf32>
    %226 = vector.extract_strided_slice %177 {offsets = [152, 0], sizes = [1, 64], strides = [1, 1]} : vector<288x64xf32> to vector<1x64xf32>
    %227 = vector.extract_strided_slice %177 {offsets = [176, 0], sizes = [1, 64], strides = [1, 1]} : vector<288x64xf32> to vector<1x64xf32>
    %228 = vector.extract_strided_slice %177 {offsets = [200, 0], sizes = [1, 64], strides = [1, 1]} : vector<288x64xf32> to vector<1x64xf32>
    %229 = vector.extract_strided_slice %177 {offsets = [224, 0], sizes = [1, 64], strides = [1, 1]} : vector<288x64xf32> to vector<1x64xf32>
    %230 = vector.extract_strided_slice %177 {offsets = [248, 0], sizes = [1, 64], strides = [1, 1]} : vector<288x64xf32> to vector<1x64xf32>
    %231 = tpu.concatenate %206, %207, %208, %209, %210, %211, %212, %213, %214, %215, %216, %217, %218, %219, %220, %221 in 1 : vector<1x64xf32>, vector<1x64xf32>, vector<1x64xf32>, vector<1x64xf32>, vector<1x64xf32>, vector<1x64xf32>, vector<1x64xf32>, vector<1x64xf32>, vector<1x64xf32>, vector<1x64xf32>, vector<1x64xf32>, vector<1x64xf32>, vector<1x64xf32>, vector<1x64xf32>, vector<1x64xf32>, vector<1x64xf32> -> vector<1x1024xf32>
    %232 = tpu.concatenate %222, %223, %224, %225, %226, %227, %228, %229, %230 in 1 : vector<1x64xf32>, vector<1x64xf32>, vector<1x64xf32>, vector<1x64xf32>, vector<1x64xf32>, vector<1x64xf32>, vector<1x64xf32>, vector<1x64xf32>, vector<1x64xf32> -> vector<1x576xf32>
    %233 = tpu.concatenate %231, %232 in 1 : vector<1x1024xf32>, vector<1x576xf32> -> vector<1x1600xf32>
    %234 = tpu.concatenate %205, %233 in 0 : vector<1x1600xf32>, vector<1x1600xf32> -> vector<2x1600xf32>
    %235 = arith.truncf %234 : vector<2x1600xf32> to vector<2x1600xbf16>
    %c0_42 = arith.constant 0 : index
    %c0_43 = arith.constant 0 : index
    %236 = vector.load %arg5[%c0_42, %c0_43] : memref<1600x512xbf16, #tpu.memory_space<vmem>>, vector<1600x512xbf16>
    %cst_44 = arith.constant dense<0.000000e+00> : vector<2x512xf32>
    %237 = tpu.matmul %235, %236, %cst_44 {dimension_numbers = #tpu.dot_dimension_numbers<[1], [0], [0], [1], [0, 0, 1, 1], [], []>} : vector<2x1600xbf16>, vector<1600x512xbf16>, vector<2x512xf32> -> vector<2x512xf32>
    %c0_45 = arith.constant 0 : index
    %c0_46 = arith.constant 0 : index
    %238 = vector.load %arg6[%c0_45, %c0_46] : memref<1x512xf32, #tpu.memory_space<vmem>>, vector<1x512xf32>
    %239 = vector.broadcast %238 : vector<1x512xf32> to vector<2x512xf32>
    %240 = arith.addf %237, %239 : vector<2x512xf32>
    %cst_47 = arith.constant 0.000000e+00 : f32
    %241 = vector.broadcast %cst_47 : f32 to vector<2x512xf32>
    %242 = arith.maximumf %240, %241 : vector<2x512xf32>
    %c0_48 = arith.constant 0 : index
    %c0_49 = arith.constant 0 : index
    %243 = vector.load %arg7[%c0_48, %c0_49] : memref<512x10xf32, #tpu.memory_space<vmem>>, vector<512x10xf32>
    %cst_50 = arith.constant dense<0.000000e+00> : vector<2x10xf32>
    %244 = tpu.matmul %242, %243, %cst_50 {dimension_numbers = #tpu.dot_dimension_numbers<[1], [0], [0], [1], [0, 0, 1, 1], [], []>} : vector<2x512xf32>, vector<512x10xf32>, vector<2x10xf32> -> vector<2x10xf32>
    %c0_51 = arith.constant 0 : index
    %c0_52 = arith.constant 0 : index
    %245 = vector.load %arg8[%c0_51, %c0_52] : memref<1x10xf32, #tpu.memory_space<vmem>>, vector<1x10xf32>
    %246 = vector.broadcast %245 : vector<1x10xf32> to vector<2x10xf32>
    %247 = arith.addf %244, %246 : vector<2x10xf32>
    %cst_53 = arith.constant dense<0xFF800000> : vector<2xf32>
    %248 = vector.multi_reduction <maximumf>, %247, %cst_53 [1] : vector<2x10xf32> to vector<2xf32>
    %249 = vector.shape_cast %248 : vector<2xf32> to vector<2x1xf32>
    %250 = vector.broadcast %249 : vector<2x1xf32> to vector<2x10xf32>
    %251 = arith.subf %247, %250 : vector<2x10xf32>
    %252 = math.exp %251 : vector<2x10xf32>
    %cst_54 = arith.constant dense<0.000000e+00> : vector<2xf32>
    %253 = vector.multi_reduction <add>, %252, %cst_54 [1] : vector<2x10xf32> to vector<2xf32>
    %254 = vector.shape_cast %253 : vector<2xf32> to vector<2x1xf32>
    %255 = math.log %254 : vector<2x1xf32>
    %256 = vector.broadcast %255 : vector<2x1xf32> to vector<2x10xf32>
    %257 = arith.subf %251, %256 : vector<2x10xf32>
    %c0_55 = arith.constant 0 : index
    %c0_56 = arith.constant 0 : index
    %258 = vector.load %arg9[%c0_55, %c0_56] : memref<2x10xf32, #tpu.memory_space<vmem>>, vector<2x10xf32>
    tpu.vector_store %arg9[%c0_55, %c0_56], %257 {strides = array<i32>} : memref<2x10xf32, #tpu.memory_space<vmem>>, vector<2x10xf32>,
    return
  }
}

</mosaic_0001>

<bundles_post_ra>
// kernel: lenet_forward.1
= control target key start
LH: loop header
LB: loop body
LE: loop exit
PB: predicated region body
PF: predicated region fallthrough
CT: control target
= control target key end

     0   :  { %14 = vsyncpa [#allocation3], 0  ;;  %s13876_s0 = inlined_call_operand.vmem [shape: f32[2,28,28], index: 0, kind: input, shape index: {}]   ;;  %s13877_s1 = inlined_call_operand.hbm [shape: f32[5,28,768], index: 1, kind: input, shape index: {}]   ;;  %s13878_s2 = inlined_call_operand.hbm [shape: f32[1,768], index: 2, kind: input, shape index: {}]   ;;  %s13879_s3 = inlined_call_operand.hbm [shape: f32[4,32,64], index: 3, kind: input, shape index: {}]   ;;  %s13880_s4 = inlined_call_operand.hbm [shape: f32[1,64], index: 4, kind: input, shape index: {}]   ;;  %s13881_s5 = inlined_call_operand.hbm [shape: bf16[1600,512], index: 5, kind: input, shape index: {}]   ;;  %s13882_s6 = inlined_call_operand.hbm [shape: f32[1,512], index: 6, kind: input, shape index: {}]   ;;  %s13883_s7 = inlined_call_operand.vmem [shape: f32[512,10], index: 7, kind: input, shape index: {}]   ;;  %s13884_s8 = inlined_call_operand.hbm [shape: f32[1,10], index: 8, kind: input, shape index: {}]   ;;  %s13885_s9 = inlined_call_operand.hbm [shape: f32[2,10], index: 9, kind: output, shape index: {}]  }
   0x1   :  { %15 = vsyncpa [#allocation6], 0 }
   0x2   :  { %16 = vsyncpa [#allocation9], 0 }
   0x3   :  { %17 = vsyncpa [#allocation12], 0 }
   0x4   :  { %18 = vsyncpa [#allocation4], 0  ;;  %s11031_s30 = smov [#allocation5]   ;;  %s11032_s11 = smov [#allocation8]  }
   0x5   :  { %s39_s10 = sshll.u32 %s11031_s30, 4  ;;  %s61_s12 = sshll.u32 %s11032_s11, 4  ;;  %s40_s10 = int_to_ptr.vmem [resolvable:$true] %s39_s10  ;;  %s62_s12 = int_to_ptr.vmem [resolvable:$true] %s61_s12 }
   0x6   :  { %s10845_s15 = scalar_lea.hbm %s13878_s2, 96 }
   0x7   :  { %p10846_p0 = scmp.ne.s32.totalorder %s13878_s2, %s10845_s15  ;;  %p10849_p1 = scmp.lt.u32.totalorder %s10845_s15, %s13878_s2 }
   0x9   :  { %p10851_p2 = pnand %p10849_p1, %p10846_p0 }
   0xb   :  { %10854 = shalt.err (!%p10851_p2)
}
   0xc   :  { %s10855_s20 = scalar_lea.vmem %s40_s10, 96  ;;  %p10860_p4 = scmp.lt.s32.totalorder %s40_s10, %s40_s10 }
   0xd   :  { %p10856_p3 = scmp.ne.s32.totalorder %s40_s10, %s10855_s20  ;;  %p10861_p5 = scmp.lt.s32.totalorder %s10855_s20, %s10855_s20 }
   0xf   :  { %p10862_p6 = por %p10861_p5, %p10860_p4 }
  0x11   :  { %p10863_p7 = pnand %p10862_p6, %p10856_p3 }
  0x13   :  { %10866 = shalt.err (!%p10863_p7)
}
  0x14   :  { %42 = dma.hbm_to_vmem [thread:$0]  %s13878_s2, 96, %s40_s10, [#allocation6]  }
  0x15   :  { %s10867_s25 = scalar_lea.hbm %s13880_s4, 16 }
  0x16   :  { %p10868_p8 = scmp.ne.s32.totalorder %s13880_s4, %s10867_s25  ;;  %p10871_p9 = scmp.lt.u32.totalorder %s10867_s25, %s13880_s4 }
  0x18   :  { %p10873_p10 = pnand %p10871_p9, %p10868_p8 }
  0x1a   :  { %10876 = shalt.err (!%p10873_p10)
}
  0x1b   :  { %s10877_s30 = scalar_lea.vmem %s62_s12, 16  ;;  %s10881_s11 = scalar_lea.vmem %s62_s12, 32 }
  0x1c   :  { %p10878_p11 = scmp.ne.s32.totalorder %s62_s12, %s10877_s30  ;;  %p10882_p12 = scmp.lt.s32.totalorder %s62_s12, %s62_s12 }
  0x1d   :  { %p10883_p13 = scmp.lt.s32.totalorder %s10881_s11, %s10877_s30 }
  0x1f   :  { %p10884_p0 = por %p10883_p13, %p10882_p12 }
  0x21   :  { %p10885_p1 = pnand %p10884_p0, %p10878_p11 }
  0x23   :  { %10888 = shalt.err (!%p10885_p1)
}
  0x24   :  { %64 = dma.hbm_to_vmem [thread:$0]  %s13880_s4, 16, %s62_s12, [#allocation9]  }
  0x25   :  { %s11033_s13 = smov [#allocation11]   ;;  %s11034_s15 = smov [#allocation2]  }
  0x26   :  { %s83_s14 = sshll.u32 %s11033_s13, 4  ;;  %s26_s16 = sshll.u32 %s11034_s15, 4  ;;  %s84_s14 = int_to_ptr.vmem [resolvable:$true] %s83_s14  ;;  %s11124_s16 = int_to_ptr.vmem [resolvable:$true] %s26_s16 }
  0x27   :  { %s10889_s19 = scalar_lea.hbm %s13882_s6, 64 }
  0x28   :  { %p10890_p2 = scmp.ne.s32.totalorder %s13882_s6, %s10889_s19  ;;  %p10893_p3 = scmp.lt.u32.totalorder %s10889_s19, %s13882_s6 }
  0x2a   :  { %p10895_p4 = pnand %p10893_p3, %p10890_p2 }
  0x2c   :  { %10898 = shalt.err (!%p10895_p4)
}
  0x2d   :  { %s10899_s4 = scalar_lea.vmem %s84_s14, 64  ;;  %p10904_p6 = scmp.lt.s32.totalorder %s84_s14, %s84_s14 }
  0x2e   :  { %p10900_p5 = scmp.ne.s32.totalorder %s84_s14, %s10899_s4  ;;  %p10905_p7 = scmp.lt.s32.totalorder %s10899_s4, %s10899_s4 }
  0x30   :  { %p10906_p8 = por %p10905_p7, %p10904_p6 }
  0x32   :  { %p10907_p9 = pnand %p10906_p8, %p10900_p5 }
  0x34   :  { %10910 = shalt.err (!%p10907_p9)
}
  0x35   :  { %86 = dma.hbm_to_vmem [thread:$0]  %s13882_s6, 64, %s84_s14, [#allocation12]  }
  0x36   :  { %s10911_s27 = scalar_lea.hbm %s13877_s1, 15360 }
  0x37   :  { %p10912_p10 = scmp.ne.s32.totalorder %s13877_s1, %s10911_s27  ;;  %p10915_p11 = scmp.lt.u32.totalorder %s10911_s27, %s13877_s1 }
  0x39   :  { %p10917_p12 = pnand %p10915_p11, %p10912_p10 }
  0x3b   :  { %10920 = shalt.err (!%p10917_p12)
}
  0x3c   :  { %s10921_s2 = scalar_lea.vmem %s11124_s16, 15360  ;;  %p10926_p0 = scmp.lt.s32.totalorder %s11124_s16, %s11124_s16 }
  0x3d   :  { %p10922_p13 = scmp.ne.s32.totalorder %s11124_s16, %s10921_s2  ;;  %p10927_p1 = scmp.lt.s32.totalorder %s10921_s2, %s10921_s2 }
  0x3f   :  { %p10928_p2 = por %p10927_p1, %p10926_p0 }
  0x41   :  { %p10929_p3 = pnand %p10928_p2, %p10922_p13 }
  0x43   :  { %10932 = shalt.err (!%p10929_p3)
}
  0x44   :  { %s11035_s6 = smov 768   ;;  %s11036_s10 = smov 48  }
  0x45   :  { %32 = dma.hbm_to_vmem [thread:$0]  %s13877_s1, 15360, %s11124_s16, [#allocation3], %s11035_s6, %s11035_s6, %s11036_s10  }
  0x46   :  { %s11037_s15 = smov [#allocation7]   ;;  %s10933_s20 = scalar_lea.hbm %s13879_s3, 2048 }
  0x47   :  { %s48_s17 = sshll.u32 %s11037_s15, 4  ;;  %p10934_p4 = scmp.ne.s32.totalorder %s13879_s3, %s10933_s20  ;;  %s49_s17 = int_to_ptr.vmem [resolvable:$true] %s48_s17 }
  0x48   :  { %p10937_p5 = scmp.lt.u32.totalorder %s10933_s20, %s13879_s3 }
  0x4a   :  { %p10939_p6 = pnand %p10937_p5, %p10934_p4 }
  0x4c   :  { %10942 = shalt.err (!%p10939_p6)
}
  0x4d   :  { %s10943_s12 = scalar_lea.vmem %s49_s17, 2048  ;;  %p10948_p8 = scmp.lt.s32.totalorder %s49_s17, %s49_s17 }
  0x4e   :  { %p10944_p7 = scmp.ne.s32.totalorder %s49_s17, %s10943_s12  ;;  %p10949_p9 = scmp.lt.s32.totalorder %s10943_s12, %s10943_s12 }
  0x50   :  { %p10950_p10 = por %p10949_p9, %p10948_p8 }
  0x52   :  { %p10951_p11 = pnand %p10950_p10, %p10944_p7 }
  0x54   :  { %10954 = shalt.err (!%p10951_p11)
}
  0x55   :  { %s11038_s1 = smov 128   ;;  %s11039_s16 = smov 8  }
  0x56   :  { %54 = dma.hbm_to_vmem [thread:$0]  %s13879_s3, 2048, %s49_s17, [#allocation6], %s11038_s1, %s11038_s1, %s11039_s16  }
  0x57   :  { %s11040_s26 = smov [#allocation10]   ;;  %s10955_s30 = scalar_lea.hbm %s13881_s5, 51200 }
  0x58   :  { %s70_s27 = sshll.u32 %s11040_s26, 4  ;;  %p10956_p12 = scmp.ne.s32.totalorder %s13881_s5, %s10955_s30  ;;  %s71_s27 = int_to_ptr.vmem [resolvable:$true] %s70_s27 }
  0x59   :  { %p10959_p13 = scmp.lt.u32.totalorder %s10955_s30, %s13881_s5 }
  0x5b   :  { %p10961_p0 = pnand %p10959_p13, %p10956_p12 }
  0x5d   :  { %10964 = shalt.err (!%p10961_p0)
}
  0x5e   :  { %s10965_s13 = scalar_lea.vmem %s71_s27, 51200  ;;  %p10970_p2 = scmp.lt.s32.totalorder %s71_s27, %s71_s27 }
  0x5f   :  { %p10966_p1 = scmp.ne.s32.totalorder %s71_s27, %s10965_s13  ;;  %p10971_p3 = scmp.lt.s32.totalorder %s10965_s13, %s10965_s13 }
  0x61   :  { %p10972_p4 = por %p10971_p3, %p10970_p2 }
  0x63   :  { %p10973_p5 = pnand %p10972_p4, %p10966_p1 }
  0x65   :  { %10976 = shalt.err (!%p10973_p5)
}
  0x66   :  { %s11041_s3 = smov 256   ;;  %s11042_s14 = smov 16  }
  0x67   :  { %76 = dma.hbm_to_vmem [thread:$0]  %s13881_s5, 51200, %s71_s27, [#allocation9], %s11041_s3, %s11041_s3, %s11042_s14  }
  0x68   :  { %s11043_s18 = smov [#allocation13]   ;;  %s10977_s22 = scalar_lea.hbm %s13884_s8, 16 }
  0x69   :  { %s95_s19 = sshll.u32 %s11043_s18, 4  ;;  %p10978_p6 = scmp.ne.s32.totalorder %s13884_s8, %s10977_s22  ;;  %s96_s19 = int_to_ptr.vmem [resolvable:$true] %s95_s19 }
  0x6a   :  { %p10981_p7 = scmp.lt.u32.totalorder %s10977_s22, %s13884_s8 }
  0x6c   :  { %p10983_p8 = pnand %p10981_p7, %p10978_p6 }
  0x6e   :  { %10986 = shalt.err (!%p10983_p8)
}
  0x6f   :  { %s10987_s16 = scalar_lea.vmem %s96_s19, 16  ;;  %s10991_s5 = scalar_lea.vmem %s96_s19, 32 }
  0x70   :  { %p10988_p9 = scmp.ne.s32.totalorder %s96_s19, %s10987_s16  ;;  %p10992_p10 = scmp.lt.s32.totalorder %s96_s19, %s96_s19 }
  0x71   :  { %p10993_p11 = scmp.lt.s32.totalorder %s10991_s5, %s10987_s16 }
  0x73   :  { %p10994_p12 = por %p10993_p11, %p10992_p10 }
  0x75   :  { %p10995_p13 = pnand %p10994_p12, %p10988_p9 }
  0x77   :  { %10998 = shalt.err (!%p10995_p13)
}
  0x78   :  { %98 = dma.hbm_to_vmem [thread:$0]  %s13884_s8, 16, %s96_s19, [#allocation12]  }
  0x79   :  { %11021 = dma.done.wait [#allocation3], 15360  }
  0x7a   :  { %11022 = vsyncadd [#allocation3], 4294951936 }
  0x7b   :  { %11023 = dma.done.wait [#allocation6], 2144  }
  0x7c   :  { %11024 = vsyncadd [#allocation6], 4294965152 }
  0x7d   :  { %11025 = dma.done.wait [#allocation9], 51216  }
  0x7e   :  { %11026 = vsyncadd [#allocation9], 4294916080 }
  0x7f   :  { %11027 = dma.done.wait [#allocation12], 80  }
  0x80   :  { %11028 = vsyncadd [#allocation12], 4294967216  ;;  %v11044_v0 = vmov 0.0   ;;  %vm215_vm0 = vcmask 1043456   ;;  %vm11045_vm1 = vmmov 1   ;;  %v179_v2 = vld [vmem:[#allocation2 + $0xc8] sm:$0xff] }
  0x81   :  { %298 = vmatprep.mubr.f32.mxu0 %v11044_v0  ;;  %322 = vmatprep.mubr.f32.mxu1 %v11044_v0  ;;  %vm11194_vm2 = vmpackc.low %vm215_vm0, %vm11045_vm1  ;;  %v185_v3 = vld [vmem:[#allocation2 + $0xf8] sm:$0xff]  ;;  %v178_v4 = vld [vmem:[#allocation2 + $0xc0] sm:$0xff]  ;;  %vm158_vm3 = vcmask 1046528   ;;  %vm202_vm4 = vcmask 228352   ;;  %vm870_vm5 = vcmask 1045504   ;;  %vm1279_vm6 = vcmask 1044480  }
  0x82   :  { %v9608_v5 = vpack.c.bf16 %v185_v3, %v179_v2  ;;  %v184_v6 = vld [vmem:[#allocation2 + $0xf0] sm:$0xff]  ;;  %v191_v7 = vld [vmem:[#allocation2 + $0x128] sm:$0xff]  ;;  %v197_v8 = vld [vmem:[#allocation2 + $0x158] sm:$0xf]  ;;  %vm2578_vm7 = vcmask 1040384   ;;  %vm2585_vm8 = vcmask 1041408  }
  0x83   :  { %v9610_v9 = vpack.c.bf16 %v184_v6, %v178_v4  ;;  %v9612_v10 = vpack.c.bf16 %v197_v8, %v191_v7  ;;  %v190_v11 = vld [vmem:[#allocation2 + $0x120] sm:$0xff]  ;;  %v196_v12 = vld [vmem:[#allocation2 + $0x150] sm:$0xf]  ;;  %v11206_v14 = vld [vmem:[%s13876_s0 + $0x8] sm:$0xff]  ;;  %vm2592_vm9 = vcmask 1042432   ;;  %s11047_s29 = smov 64  }
  0x84   :  { %v11201_v13 = vld [vmem:[%s13876_s0] sm:$0xff]  ;;  %9609 = vmatprep.subr.bf16.mxu0 %v9608_v5  ;;  %v183_v15 = vld [vmem:[#allocation2 + $0xe8] sm:$0xff]  ;;  %v189_v16 = vld [vmem:[#allocation2 + $0x118] sm:$0xff]  ;;  %9854 = vmatprep.subr.bf16.mxu1 %v9608_v5  ;;  %v9615_v17 = vpack.c.bf16 %v196_v12, %v190_v11  ;;  %v160_v19 = vrot.slane %v11206_v14, 1  ;;  %vm3108_vm10 = vcmask 261120   ;;  %vm5004_vm11 = vcmask 523264  }
  0x85   :  { %9611 = vmatpush1.bf16.msra.mxu0 %v9610_v9  ;;  %v159_v18 = vrot.slane %v11201_v13, 1  ;;  %9856 = vmatpush1.bf16.msra.mxu1 %v9610_v9  ;;  %v9628_v20 = vpack.c.bf16 %v189_v16, %v183_v15  ;;  %v182_v21 = vld [vmem:[#allocation2 + $0xe0] sm:$0xff]  ;;  %v188_v22 = vld [vmem:[#allocation2 + $0x110] sm:$0xff]  ;;  %v195_v24 = vld [vmem:[#allocation2 + $0x148] sm:$0xff]  ;;  %vm8419_vm12 = vcmask 74752  }
  0x86   :  { %9614 = vmatprep.subr.msk.bf16.mxu0 %vm11194_vm2, %v9612_v10  ;;  %v11215_v23 = vld [vmem:[%s13876_s0 + $0x10] sm:$0xff]  ;;  %9855 = vmatprep.subr.msk.bf16.mxu1 %vm11194_vm2, %v9612_v10  ;;  %v201_v25 = vld [vmem:[#allocation2 + $0x178] sm:$0xf]  ;;  %v9630_v27 = vpack.c.bf16 %v188_v22, %v182_v21  ;;  %v11228_v29 = vld [vmem:[%s13876_s0 + $0x28] sm:$0xff] }
  0x87   :  { %v11222_v26 = vsel %vm158_vm3, %v159_v18, %v160_v19  ;;  %v162_v28 = vrot.slane %v11215_v23, 1  ;;  %v11235_v30 = vld [vmem:[%s13876_s0 + $0x18] sm:$0xf]  ;;  %v9632_v31 = vpack.c.bf16 %v201_v25, %v195_v24  ;;  %v194_v32 = vld [vmem:[#allocation2 + $0x140] sm:$0xff]  ;;  %v200_v33 = vld [vmem:[#allocation2 + $0x170] sm:$0xf] }
  0x88   :  { %v131_v34 = vld [vmem:[#allocation2 + $0x8] sm:$0xff]  ;;  %v137_v35 = vld [vmem:[#allocation2 + $0x38] sm:$0xff]  ;;  %v11240_v36 = vld [vmem:[%s13876_s0 + $0x30] sm:$0xff]  ;;  %v171_v37 = vrot.slane %v11228_v29, 1  ;;  %v164_v41 = vrot.slane %v11235_v30, 1  ;;  %v9635_v42 = vpack.c.bf16 %v200_v33, %v194_v32 }
  0x89   :  { %9617 = vmatpush1.bf16.msk.msra.mxu0 %vm11194_vm2, %v9615_v17  ;;  %9857 = vmatpush1.bf16.msk.msra.mxu1 %vm11194_vm2, %v9615_v17  ;;  %v173_v38 = vrot.slane %v11240_v36, 1  ;;  %v11249_v39 = vld [vmem:[%s13876_s0 + $0x38] sm:$0xf]  ;;  %v11253_v40 = vsel %vm158_vm3, %v160_v19, %v162_v28  ;;  %v11261_v43 = vld [vmem:[%s13876_s0 + $0x20] sm:$0xff]  ;;  %v9638_v44 = vpack.c.bf16 %v137_v35, %v131_v34  ;;  %v187_v48 = vld [vmem:[#allocation2 + $0x108] sm:$0xff] }
  0x8a   :  { %9629 = vmatprep.subr.bf16.mxu0 %v9628_v20  ;;  %v175_v46 = vrot.slane %v11249_v39, 1  ;;  %v181_v47 = vld [vmem:[#allocation2 + $0xd8] sm:$0xff]  ;;  %v180_v50 = vld [vmem:[#allocation2 + $0xd0] sm:$0xff]  ;;  %v186_v51 = vld [vmem:[#allocation2 + $0x100] sm:$0xff]  ;;  %v11274_v52 = vsel %vm158_vm3, %v162_v28, %v164_v41  ;;  %v170_v53 = vrot.slane %v11261_v43, 1 }
  0x8b   :  { %v11264_v45 = vsel %vm158_vm3, %v171_v37, %v173_v38  ;;  %v9618_v49 = vpack.c.bf16 %v187_v48, %v181_v47  ;;  %v9620_v54 = vpack.c.bf16 %v186_v51, %v180_v50  ;;  %v193_v55 = vld [vmem:[#allocation2 + $0x138] sm:$0xff]  ;;  %v199_v56 = vld [vmem:[#allocation2 + $0x168] sm:$0xf]  ;;  %v192_v57 = vld [vmem:[#allocation2 + $0x130] sm:$0xff] }
  0x8c   :  { %8457 = vmatmul.mubr.msk.f32.vlgmr.msra.gmra.mrb[0].mxu0 %vm202_vm4, %v11222_v26  ;;  %8461 = vmatmul.mubr.msk.f32.vlgmr.msra.gmra.mrb[0].mxu1 %vm202_vm4, %v11264_v45  ;;  %v9622_v58 = vpack.c.bf16 %v199_v56, %v193_v55  ;;  %v198_v59 = vld [vmem:[#allocation2 + $0x160] sm:$0xf]  ;;  %v11280_v60 = vsel %vm158_vm3, %v173_v38, %v175_v46  ;;  %v133_v62 = vld [vmem:[#allocation2 + $0x18] sm:$0xff]  ;;  %v139_v63 = vld [vmem:[#allocation2 + $0x48] sm:$0xff]  ;;  %v172_v2 = vsel %vm158_vm3, %v170_v53, %v171_v37 }
  0x8d   :  { %9631 = vmatpush1.bf16.msra.mxu0 %v9630_v27  ;;  %304 = vmatprep.mubr.f32.mxu0 %v11044_v0  ;;  %v9625_v61 = vpack.c.bf16 %v198_v59, %v192_v57  ;;  %v130_v3 = vld [vmem:[#allocation2] sm:$0xff]  ;;  %v136_v4 = vld [vmem:[#allocation2 + $0x30] sm:$0xff]  ;;  %v9648_v5 = vpack.c.bf16 %v139_v63, %v133_v62  ;;  %v145_v8 = vld [vmem:[#allocation2 + $0x78] sm:$0xff] }
  0x8e   :  { %9634 = vmatprep.subr.msk.bf16.mxu0 %vm11194_vm2, %v9632_v31  ;;  %328 = vmatprep.mubr.f32.mxu1 %v11044_v0  ;;  %v132_v6 = vld [vmem:[#allocation2 + $0x10] sm:$0xff]  ;;  %v138_v7 = vld [vmem:[#allocation2 + $0x40] sm:$0xff]  ;;  %v151_v9 = vld [vmem:[#allocation2 + $0xa8] sm:$0xf]  ;;  %v9640_v18 = vpack.c.bf16 %v136_v4, %v130_v3 }
  0x8f   :  { %9619 = vmatprep.subr.bf16.mxu1 %v9618_v49  ;;  %v143_v10 = vld [vmem:[#allocation2 + $0x68] sm:$0xff]  ;;  %v149_v11 = vld [vmem:[#allocation2 + $0x98] sm:$0xf]  ;;  %v9650_v12 = vpack.c.bf16 %v138_v7, %v132_v6  ;;  %v9652_v15 = vpack.c.bf16 %v151_v9, %v145_v8  ;;  %v144_v16 = vld [vmem:[#allocation2 + $0x70] sm:$0xff]  ;;  %v872_v6 = vrot.slane %v11206_v14, 2 }
  0x90   :  { %8458 = vmatmul.mubr.msk.f32.gmra.mrb[2].mxu0 %vm202_vm4, %v11253_v40  ;;  %9621 = vmatpush1.bf16.msra.mxu1 %v9620_v54  ;;  %v150_v17 = vld [vmem:[#allocation2 + $0xa0] sm:$0xf]  ;;  %v889_v19 = vld [vmem:[#allocation2 + $0x198] sm:$0xff]  ;;  %v9642_v20 = vpack.c.bf16 %v149_v11, %v143_v10  ;;  %v148_v22 = vld [vmem:[#allocation2 + $0x90] sm:$0xf] }
  0x91   :  { %310 = vmatprep.mubr.f32.mxu0 %v11044_v0  ;;  %9637 = vmatpush1.bf16.msk.msra.mxu0 %vm11194_vm2, %v9635_v42  ;;  %v142_v21 = vld [vmem:[#allocation2 + $0x60] sm:$0xff]  ;;  %v895_v24 = vld [vmem:[#allocation2 + $0x1c8] sm:$0xff]  ;;  %v141_v27 = vld [vmem:[#allocation2 + $0x58] sm:$0xff]  ;;  %v9655_v28 = vpack.c.bf16 %v150_v17, %v144_v16 }
  0x92   :  { %9639 = vmatprep.subr.bf16.mxu0 %v9638_v44  ;;  %8462 = vmatmul.mubr.msk.f32.gmra.mrb[2].mxu1 %vm202_vm4, %v11280_v60  ;;  %v135_v25 = vld [vmem:[#allocation2 + $0x28] sm:$0xff]  ;;  %v9678_v31 = vpack.c.bf16 %v895_v24, %v889_v19  ;;  %v9645_v32 = vpack.c.bf16 %v148_v22, %v142_v21  ;;  %v140_v34 = vld [vmem:[#allocation2 + $0x50] sm:$0xff]  ;;  %v894_v37 = vld [vmem:[#allocation2 + $0x1c0] sm:$0xff]  ;;  %v874_v22 = vrot.slane %v11215_v23, 2 }
  0x93   :  { %9624 = vmatprep.subr.msk.bf16.mxu1 %vm11194_vm2, %v9622_v58  ;;  %399 = vmatprep.mubr.f32.mxu1 %v11044_v0  ;;  %v9658_v33 = vpack.c.bf16 %v141_v27, %v135_v25  ;;  %v888_v35 = vld [vmem:[#allocation2 + $0x190] sm:$0xff]  ;;  %v147_v38 = vld [vmem:[#allocation2 + $0x88] sm:$0xff]  ;;  %v901_v41 = vld [vmem:[#allocation2 + $0x1f8] sm:$0xff] }
  0x94   :  { %8459 = vmatmul.mubr.msk.f32.gmra.mrb[4].mxu0 %vm202_vm4, %v11274_v52  ;;  %9627 = vmatpush1.bf16.msk.msra.mxu1 %vm11194_vm2, %v9625_v61  ;;  %v907_v42 = vld [vmem:[#allocation2 + $0x228] sm:$0xf]  ;;  %v900_v44 = vld [vmem:[#allocation2 + $0x1f0] sm:$0xff]  ;;  %v906_v46 = vld [vmem:[#allocation2 + $0x220] sm:$0xf]  ;;  %v9680_v47 = vpack.c.bf16 %v894_v37, %v888_v35  ;;  %v879_v35 = vrot.slane %v11228_v29, 2 }
  0x95   :  { %316 = vmatprep.mubr.f32.mxu0 %v11044_v0  ;;  %9649 = vmatprep.subr.bf16.mxu1 %v9648_v5  ;;  %v1298_v48 = vld [vmem:[#allocation2 + $0x258] sm:$0xff]  ;;  %v146_v49 = vld [vmem:[#allocation2 + $0x80] sm:$0xff]  ;;  %v152_v50 = vld [vmem:[#allocation2 + $0xb0] sm:$0xf]  ;;  %v9682_v51 = vpack.c.bf16 %v907_v42, %v901_v41  ;;  %v9685_v56 = vpack.c.bf16 %v906_v46, %v900_v44  ;;  %v871_v5 = vrot.slane %v11201_v13, 2  ;;  %v883_v41 = vrot.slane %v11249_v39, 2 }
  0x96   :  { %v887_v53 = vld [vmem:[#allocation2 + $0x188] sm:$0xff]  ;;  %v893_v54 = vld [vmem:[#allocation2 + $0x1b8] sm:$0xff]  ;;  %v9665_v58 = vpack.c.bf16 %v152_v50, %v146_v49  ;;  %v892_v61 = vld [vmem:[#allocation2 + $0x1b0] sm:$0xff] }
  0x97   :  { %8465 = vmatmul.mubr.msk.f32.vlgmr.msra.gmra.mrb[4].mxu1 %vm202_vm4, %v11222_v26  ;;  %v9668_v59 = vpack.c.bf16 %v893_v54, %v887_v53  ;;  %v1297_v62 = vld [vmem:[#allocation2 + $0x250] sm:$0xff]  ;;  %v1303_v63 = vld [vmem:[#allocation2 + $0x280] sm:$0xff]  ;;  %v899_v3 = vld [vmem:[#allocation2 + $0x1e8] sm:$0xff]  ;;  %v11384_v19 = vsel %vm870_vm5, %v871_v5, %v872_v6  ;;  %v1281_v53 = vrot.slane %v11206_v14, 3 }
  0x98   :  { %8460 = vmatmul.mubr.msk.f32.gmra.mrb[6].mxu0 %vm202_vm4, %v172_v2  ;;  %405 = vmatprep.mubr.f32.mxu1 %v11044_v0  ;;  %v905_v4 = vld [vmem:[#allocation2 + $0x218] sm:$0xf]  ;;  %v1316_v7 = vld [vmem:[#allocation2 + $0x2e8] sm:$0xf]  ;;  %v1309_v8 = vld [vmem:[#allocation2 + $0x2b0] sm:$0xff]  ;;  %v9710_v10 = vpack.c.bf16 %v1303_v63, %v1297_v62  ;;  %v1283_v62 = vrot.slane %v11215_v23, 3 }
  0x99   :  { %500 = vmatprep.mubr.f32.mxu0 %v11044_v0  ;;  %9651 = vmatpush1.bf16.msra.mxu1 %v9650_v12  ;;  %v1315_v9 = vld [vmem:[#allocation2 + $0x2e0] sm:$0xf]  ;;  %v1706_v11 = vld [vmem:[#allocation2 + $0x318] sm:$0xff]  ;;  %v1712_v12 = vld [vmem:[#allocation2 + $0x348] sm:$0xff]  ;;  %v9672_v24 = vpack.c.bf16 %v905_v4, %v899_v3  ;;  %v1285_v4 = vrot.slane %v11235_v30, 3 }
  0x9a   :  { %9654 = vmatprep.subr.msk.bf16.mxu1 %vm11194_vm2, %v9652_v15  ;;  %v898_v15 = vld [vmem:[#allocation2 + $0x1e0] sm:$0xff]  ;;  %v904_v16 = vld [vmem:[#allocation2 + $0x210] sm:$0xf]  ;;  %v897_v21 = vld [vmem:[#allocation2 + $0x1d8] sm:$0xff]  ;;  %v9715_v25 = vpack.c.bf16 %v1315_v9, %v1309_v8  ;;  %v9738_v27 = vpack.c.bf16 %v1712_v12, %v1706_v11  ;;  %v1290_v9 = vrot.slane %v11240_v36, 3 }
  0x9b   :  { %8466 = vmatmul.mubr.msk.f32.gmra.mrb[6].mxu1 %vm202_vm4, %v11253_v40  ;;  %v1705_v42 = vld [vmem:[#allocation2 + $0x310] sm:$0xff]  ;;  %v1711_v44 = vld [vmem:[#allocation2 + $0x340] sm:$0xff]  ;;  %v1718_v46 = vld [vmem:[#allocation2 + $0x378] sm:$0xff] }
  0x9c   :  { %8473 = vmatmul.mubr.msk.f32.vlgmr.msra.gmra.mrb[8].mxu0 %vm202_vm4, %v11222_v26  ;;  %411 = vmatprep.mubr.f32.mxu1 %v11044_v0  ;;  %v134_v26 = vld [vmem:[#allocation2 + $0x20] sm:$0xff]  ;;  %v903_v49 = vld [vmem:[#allocation2 + $0x208] sm:$0xff]  ;;  %v909_v50 = vld [vmem:[#allocation2 + $0x238] sm:$0xf] }
  0x9d   :  { %9641 = vmatpush1.bf16.msra.mxu0 %v9640_v18  ;;  %506 = vmatprep.mubr.f32.mxu0 %v11044_v0  ;;  %v1717_v54 = vld [vmem:[#allocation2 + $0x370] sm:$0xff]  ;;  %v9692_v63 = vpack.c.bf16 %v909_v50, %v903_v49  ;;  %v10838_v11 = vld [vmem:[%s13876_s0 + $0x8] sm:$0xff] }
  0x9e   :  { %9644 = vmatprep.subr.msk.bf16.mxu0 %vm11194_vm2, %v9642_v20  ;;  %9657 = vmatpush1.bf16.msk.msra.mxu1 %vm11194_vm2, %v9655_v28  ;;  %v891_v20 = vld [vmem:[#allocation2 + $0x1a8] sm:$0xff]  ;;  %v9675_v28 = vpack.c.bf16 %v904_v16, %v898_v15  ;;  %v1689_v12 = vrot.slane %v10838_v11, 4  ;;  %v1295_v15 = vld [vmem:[#allocation2 + $0x240] sm:$0xff]  ;;  %v10843_v49 = vld [vmem:[%s13876_s0 + $0x30] sm:$0xff] }
  0x9f   :  { %9679 = vmatprep.subr.bf16.mxu1 %v9678_v31  ;;  %8467 = vmatmul.mubr.msk.f32.gmra.mrb[8].mxu1 %vm202_vm4, %v11274_v52  ;;  %v11396_v31 = vsel %vm870_vm5, %v872_v6, %v874_v22  ;;  %v1287_v6 = vrot.slane %v11261_v43, 3  ;;  %v1308_v16 = vld [vmem:[#allocation2 + $0x2a8] sm:$0xff]  ;;  %v1698_v50 = vrot.slane %v10843_v49, 4 }
  0xa0   :  { %8474 = vmatmul.mubr.msk.f32.gmra.mrb[10].mxu0 %vm202_vm4, %v11253_v40  ;;  %417 = vmatprep.mubr.f32.mxu1 %v11044_v0  ;;  %v153_v40 = vld [vmem:[#allocation2 + $0xb8] sm:$0xf]  ;;  %v1720_v11 = vld [vmem:[#allocation2 + $0x388] sm:$0xff] }
  0xa1   :  { %512 = vmatprep.mubr.f32.mxu0 %v11044_v0  ;;  %9647 = vmatpush1.bf16.msk.msra.mxu0 %vm11194_vm2, %v9645_v32  ;;  %v9662_v55 = vpack.c.bf16 %v153_v40, %v147_v38  ;;  %v876_v32 = vrot.slane %v11235_v30, 2  ;;  %v881_v38 = vrot.slane %v11240_v36, 2  ;;  %v11482_v30 = vsel %vm1279_vm6, %v1283_v62, %v1285_v4  ;;  %v1715_v4 = vld [vmem:[#allocation2 + $0x360] sm:$0xff] }
  0xa2   :  { %9659 = vmatprep.subr.bf16.mxu0 %v9658_v33  ;;  %v9688_v33 = vpack.c.bf16 %v897_v21, %v891_v20  ;;  %v10839_v21 = vld [vmem:[%s13876_s0 + $0x10] sm:$0xff] }
  0xa3   :  { %8468 = vmatmul.mubr.msk.f32.gmra.mrb[10].mxu1 %vm202_vm4, %v172_v2  ;;  %v11433_v40 = vsel %vm870_vm5, %v879_v35, %v881_v38 }
  0xa4   :  { %8475 = vmatmul.mubr.msk.f32.gmra.mrb[12].mxu0 %vm202_vm4, %v11274_v52  ;;  %423 = vmatprep.mubr.f32.mxu1 %v11044_v0  ;;  %v9660_v52 = vpack.c.bf16 %v140_v34, %v134_v26  ;;  %v11412_v26 = vsel %vm870_vm5, %v874_v22, %v876_v32  ;;  %v878_v34 = vrot.slane %v11261_v43, 2  ;;  %v1691_v22 = vrot.slane %v10839_v21, 4  ;;  %v1306_v32 = vld [vmem:[#allocation2 + $0x298] sm:$0xff] }
  0xa5   :  { %518 = vmatprep.mubr.f32.mxu0 %v11044_v0 }
  0xa6   :  { %v11423_v37 = vsel %vm870_vm5, %v878_v34, %v879_v35  ;;  %v11537_v34 = vsel %vm215_vm0, %v1689_v12, %v1691_v22  ;;  %v10840_v35 = vld [vmem:[%s13876_s0 + $0x18] sm:$0xf] }
  0xa7   :  { %8469 = vmatmul.mubr.msk.f32.gmra.mrb[12].mxu1 %vm202_vm4, %v11264_v45 }
  0xa8   :  { %8476 = vmatmul.mubr.msk.f32.gmra.mrb[14].mxu0 %vm202_vm4, %v172_v2  ;;  %429 = vmatprep.mubr.f32.mxu1 %v11044_v0  ;;  %v1310_v2 = vld [vmem:[#allocation2 + $0x2b8] sm:$0xff] }
  0xa9   :  { %524 = vmatprep.mubr.f32.mxu0 %v11044_v0  ;;  %v9712_v17 = vpack.c.bf16 %v1316_v7, %v1310_v2  ;;  %v1288_v7 = vrot.slane %v11228_v29, 3 }
  0xab   :  { %8470 = vmatmul.mubr.msk.f32.gmra.mrb[14].mxu1 %vm202_vm4, %v11280_v60  ;;  %v11493_v8 = vsel %vm1279_vm6, %v1287_v6, %v1288_v7 }
  0xac   :  { %8477 = vmatmul.mubr.msk.f32.gmra.mrb[16].mxu0 %vm202_vm4, %v11264_v45  ;;  %732 = vmatprep.mubr.f32.mxu1 %v11044_v0  ;;  %v1304_v45 = vld [vmem:[#allocation2 + $0x288] sm:$0xff] }
  0xad   :  { %530 = vmatprep.mubr.f32.mxu0 %v11044_v0  ;;  %v9708_v57 = vpack.c.bf16 %v1304_v45, %v1298_v48  ;;  %v890_v48 = vld [vmem:[#allocation2 + $0x1a0] sm:$0xff]  ;;  %v896_v45 = vld [vmem:[#allocation2 + $0x1d0] sm:$0xff] }
  0xaf   :  { %8489 = vmatmul.mubr.msk.f32.vlgmr.msra.gmra.mrb[4].mxu1 %vm202_vm4, %v11201_v13 }
  0xb0   :  { %8478 = vmatmul.mubr.msk.f32.gmra.mrb[18].mxu0 %vm202_vm4, %v11280_v60  ;;  %738 = vmatprep.mubr.f32.mxu1 %v11044_v0  ;;  %v886_v60 = vld [vmem:[#allocation2 + $0x180] sm:$0xff] }
  0xb1   :  { %631 = vmatprep.mubr.f32.mxu0 %v11044_v0  ;;  %9681 = vmatpush1.bf16.msra.mxu1 %v9680_v47  ;;  %v9670_v18 = vpack.c.bf16 %v892_v61, %v886_v60  ;;  %v1724_v47 = vld [vmem:[#allocation2 + $0x3a8] sm:$0xf] }
  0xb2   :  { %9684 = vmatprep.subr.msk.bf16.mxu1 %vm11194_vm2, %v9682_v51  ;;  %v11443_v51 = vsel %vm870_vm5, %v881_v38, %v883_v41  ;;  %v1296_v60 = vld [vmem:[#allocation2 + $0x248] sm:$0xff]  ;;  %v1693_v38 = vrot.slane %v10840_v35, 4 }
  0xb3   :  { %8490 = vmatmul.mubr.msk.f32.gmra.mrb[6].mxu1 %vm202_vm4, %v11206_v14 }
  0xb4   :  { %8481 = vmatmul.mubr.msk.f32.vlgmr.msra.gmra.mrb[0].mxu0 %vm202_vm4, %v11201_v13  ;;  %744 = vmatprep.mubr.f32.mxu1 %v11044_v0 }
  0xb5   :  { %9661 = vmatpush1.bf16.msra.mxu0 %v9660_v52  ;;  %637 = vmatprep.mubr.f32.mxu0 %v11044_v0  ;;  %v1280_v52 = vrot.slane %v11201_v13, 3 }
  0xb6   :  { %9664 = vmatprep.subr.msk.bf16.mxu0 %vm11194_vm2, %v9662_v55  ;;  %9687 = vmatpush1.bf16.msk.msra.mxu1 %vm11194_vm2, %v9685_v56  ;;  %v1723_v55 = vld [vmem:[#allocation2 + $0x3a0] sm:$0xf]  ;;  %v9740_v56 = vpack.c.bf16 %v1711_v44, %v1705_v42  ;;  %v11551_v44 = vsel %vm215_vm0, %v1691_v22, %v1693_v38 }
  0xb7   :  { %9709 = vmatprep.subr.bf16.mxu1 %v9708_v57  ;;  %8491 = vmatmul.mubr.msk.f32.gmra.mrb[8].mxu1 %vm202_vm4, %v11215_v23  ;;  %v902_v57 = vld [vmem:[#allocation2 + $0x200] sm:$0xff]  ;;  %v11454_v61 = vsel %vm1279_vm6, %v1280_v52, %v1281_v53  ;;  %v9745_v2 = vpack.c.bf16 %v1723_v55, %v1717_v54  ;;  %v10844_v52 = vld [vmem:[%s13876_s0 + $0x38] sm:$0xf]  ;;  %v1305_v55 = vld [vmem:[#allocation2 + $0x290] sm:$0xff] }
  0xb8   :  { %8482 = vmatmul.mubr.msk.f32.gmra.mrb[2].mxu0 %vm202_vm4, %v11206_v14  ;;  %750 = vmatprep.mubr.f32.mxu1 %v11044_v0  ;;  %v1299_v54 = vld [vmem:[#allocation2 + $0x260] sm:$0xff] }
  0xb9   :  { %643 = vmatprep.mubr.f32.mxu0 %v11044_v0  ;;  %9667 = vmatpush1.bf16.msk.msra.mxu0 %vm11194_vm2, %v9665_v58  ;;  %v908_v58 = vld [vmem:[#allocation2 + $0x230] sm:$0xf] }
  0xba   :  { %9669 = vmatprep.subr.bf16.mxu0 %v9668_v59  ;;  %v9742_v59 = vpack.c.bf16 %v1724_v47, %v1718_v46  ;;  %v9695_v3 = vpack.c.bf16 %v908_v58, %v902_v57  ;;  %v10842_v47 = vld [vmem:[%s13876_s0 + $0x28] sm:$0xff]  ;;  %v1318_v57 = vld [vmem:[#allocation2 + $0x2f8] sm:$0xf]  ;;  %v1317_v58 = vld [vmem:[#allocation2 + $0x2f0] sm:$0xf] }
  0xbb   :  { %8492 = vmatmul.mubr.msk.f32.gmra.mrb[10].mxu1 %vm202_vm4, %v11261_v43 }
  0xbc   :  { %8483 = vmatmul.mubr.msk.f32.gmra.mrb[4].mxu0 %vm202_vm4, %v11215_v23  ;;  %756 = vmatprep.mubr.f32.mxu1 %v11044_v0 }
  0xbd   :  { %649 = vmatprep.mubr.f32.mxu0 %v11044_v0 }
  0xbf   :  { %8493 = vmatmul.mubr.msk.f32.gmra.mrb[12].mxu1 %vm202_vm4, %v11228_v29 }
  0xc0   :  { %8484 = vmatmul.mubr.msk.f32.gmra.mrb[6].mxu0 %vm202_vm4, %v11261_v43  ;;  %762 = vmatprep.mubr.f32.mxu1 %v11044_v0 }
  0xc1   :  { %655 = vmatprep.mubr.f32.mxu0 %v11044_v0 }
  0xc3   :  { %8494 = vmatmul.mubr.msk.f32.gmra.mrb[14].mxu1 %vm202_vm4, %v11240_v36 }
  0xc4   :  { %8485 = vmatmul.mubr.msk.f32.gmra.mrb[20].mxu0 %vm202_vm4, %v11228_v29  ;;  %1105 = vmatprep.mubr.f32.mxu1 %v11044_v0 }
  0xc5   :  { %661 = vmatprep.mubr.f32.mxu0 %v11044_v0 }
  0xc7   :  { %8513 = vmatmul.mubr.msk.f32.vlgmr.msra.gmra.mrb[4].mxu1 %vm202_vm4, %v11384_v19 }
  0xc8   :  { %8486 = vmatmul.mubr.msk.f32.gmra.mrb[22].mxu0 %vm202_vm4, %v11240_v36  ;;  %1111 = vmatprep.mubr.f32.mxu1 %v11044_v0 }
  0xc9   :  { %833 = vmatprep.mubr.f32.mxu0 %v11044_v0  ;;  %9711 = vmatpush1.bf16.msra.mxu1 %v9710_v10 }
  0xca   :  { %9714 = vmatprep.subr.msk.bf16.mxu1 %vm11194_vm2, %v9712_v17  ;;  %v1314_v17 = vld [vmem:[#allocation2 + $0x2d8] sm:$0xf] }
  0xcb   :  { %8514 = vmatmul.mubr.msk.f32.gmra.mrb[6].mxu1 %vm202_vm4, %v11396_v31 }
  0xcc   :  { %8497 = vmatmul.mubr.msk.f32.vlgmr.msra.gmra.mrb[8].mxu0 %vm202_vm4, %v11201_v13  ;;  %1117 = vmatprep.mubr.f32.mxu1 %v11044_v0  ;;  %v9690_v13 = vpack.c.bf16 %v896_v45, %v890_v48  ;;  %v1696_v48 = vrot.slane %v10842_v47, 4 }
  0xcd   :  { %9671 = vmatpush1.bf16.msra.mxu0 %v9670_v18  ;;  %839 = vmatprep.mubr.f32.mxu0 %v11044_v0 }
  0xce   :  { %9674 = vmatprep.subr.msk.bf16.mxu0 %vm11194_vm2, %v9672_v24  ;;  %9717 = vmatpush1.bf16.msk.msra.mxu1 %vm11194_vm2, %v9715_v25  ;;  %v1307_v24 = vld [vmem:[#allocation2 + $0x2a0] sm:$0xff]  ;;  %v1313_v25 = vld [vmem:[#allocation2 + $0x2d0] sm:$0xf] }
  0xcf   :  { %9739 = vmatprep.subr.bf16.mxu1 %v9738_v27  ;;  %8515 = vmatmul.mubr.msk.f32.gmra.mrb[8].mxu1 %vm202_vm4, %v11412_v26  ;;  %v9705_v41 = vpack.c.bf16 %v1313_v25, %v1307_v24  ;;  %v11697_v25 = vld [vmem:[#allocation5] sm:$0x3f] }
  0xd0   :  { %8498 = vmatmul.mubr.msk.f32.gmra.mrb[10].mxu0 %vm202_vm4, %v11206_v14  ;;  %1123 = vmatprep.mubr.f32.mxu1 %v11044_v0  ;;  %v1302_v14 = vld [vmem:[#allocation2 + $0x278] sm:$0xff] }
  0xd1   :  { %845 = vmatprep.mubr.f32.mxu0 %v11044_v0  ;;  %9677 = vmatpush1.bf16.msk.msra.mxu0 %vm11194_vm2, %v9675_v28  ;;  %v9698_v5 = vpack.c.bf16 %v1302_v14, %v1296_v60  ;;  %v1300_v28 = vld [vmem:[#allocation2 + $0x268] sm:$0xff]  ;;  %v1710_v60 = vld [vmem:[#allocation2 + $0x338] sm:$0xff] }
  0xd2   :  { %9689 = vmatprep.subr.bf16.mxu0 %v9688_v33  ;;  %v9702_v33 = vpack.c.bf16 %v1314_v17, %v1308_v16  ;;  %v9718_v42 = vpack.c.bf16 %v1306_v32, %v1300_v28 }
  0xd3   :  { %8516 = vmatmul.mubr.msk.f32.gmra.mrb[10].mxu1 %vm202_vm4, %v11423_v37 }
  0xd4   :  { %8499 = vmatmul.mubr.msk.f32.gmra.mrb[12].mxu0 %vm202_vm4, %v11215_v23  ;;  %1129 = vmatprep.mubr.f32.mxu1 %v11044_v0  ;;  %v11466_v23 = vsel %vm1279_vm6, %v1281_v53, %v1283_v62  ;;  %v1700_v53 = vrot.slane %v10844_v52, 4 }
  0xd5   :  { %851 = vmatprep.mubr.f32.mxu0 %v11044_v0 }
  0xd7   :  { %8517 = vmatmul.mubr.msk.f32.gmra.mrb[12].mxu1 %vm202_vm4, %v11433_v40 }
  0xd8   :  { %8500 = vmatmul.mubr.msk.f32.gmra.mrb[14].mxu0 %vm202_vm4, %v11261_v43  ;;  %1135 = vmatprep.mubr.f32.mxu1 %v11044_v0  ;;  %v1292_v43 = vrot.slane %v11249_v39, 3  ;;  %v1301_v39 = vld [vmem:[#allocation2 + $0x270] sm:$0xff] }
  0xd9   :  { %857 = vmatprep.mubr.f32.mxu0 %v11044_v0  ;;  %v9700_v27 = vpack.c.bf16 %v1301_v39, %v1295_v15  ;;  %v1719_v39 = vld [vmem:[#allocation2 + $0x380] sm:$0xff] }
  0xda   :  { %v11519_v18 = vsel %vm1279_vm6, %v1290_v9, %v1292_v43 }
  0xdb   :  { %8518 = vmatmul.mubr.msk.f32.gmra.mrb[14].mxu1 %vm202_vm4, %v11443_v51 }
  0xdc   :  { %8501 = vmatmul.mubr.msk.f32.gmra.mrb[16].mxu0 %vm202_vm4, %v11228_v29  ;;  %1514 = vmatprep.mubr.f32.mxu1 %v11044_v0  ;;  %v11503_v29 = vsel %vm1279_vm6, %v1288_v7, %v1290_v9  ;;  %v1708_v7 = vld [vmem:[#allocation2 + $0x328] sm:$0xff]  ;;  %v1714_v9 = vld [vmem:[#allocation2 + $0x358] sm:$0xff] }
  0xdd   :  { %863 = vmatprep.mubr.f32.mxu0 %v11044_v0 }
  0xdf   :  { %8537 = vmatmul.mubr.msk.f32.vlgmr.msra.gmra.mrb[4].mxu1 %vm202_vm4, %v11454_v61 }
  0xe0   :  { %8502 = vmatmul.mubr.msk.f32.gmra.mrb[18].mxu0 %vm202_vm4, %v11240_v36  ;;  %1520 = vmatprep.mubr.f32.mxu1 %v11044_v0  ;;  %v10837_v36 = vld [vmem:[%s13876_s0] sm:$0xff] }
  0xe1   :  { %1004 = vmatprep.mubr.f32.mxu0 %v11044_v0  ;;  %9741 = vmatpush1.bf16.msra.mxu1 %v9740_v56  ;;  %v1688_v10 = vrot.slane %v10837_v36, 4  ;;  %v1312_v56 = vld [vmem:[#allocation2 + $0x2c8] sm:$0xff] }
  0xe2   :  { %9744 = vmatprep.subr.msk.bf16.mxu1 %vm11194_vm2, %v9742_v59  ;;  %v9720_v59 = vpack.c.bf16 %v1305_v55, %v1299_v54 }
  0xe3   :  { %8538 = vmatmul.mubr.msk.f32.gmra.mrb[6].mxu1 %vm202_vm4, %v11466_v23  ;;  %v11525_v20 = vsel %vm215_vm0, %v1688_v10, %v1689_v12  ;;  %v9748_v10 = vpack.c.bf16 %v1714_v9, %v1708_v7  ;;  %v1726_v12 = vld [vmem:[#allocation2 + $0x3b8] sm:$0xf] }
  0xe4   :  { %8505 = vmatmul.mubr.msk.f32.vlgmr.msra.gmra.mrb[0].mxu0 %vm202_vm4, %v11384_v19  ;;  %1526 = vmatprep.mubr.f32.mxu1 %v11044_v0  ;;  %v9752_v15 = vpack.c.bf16 %v1726_v12, %v1720_v11 }
  0xe5   :  { %9691 = vmatpush1.bf16.msra.mxu0 %v9690_v13  ;;  %1010 = vmatprep.mubr.f32.mxu0 %v11044_v0  ;;  %v1704_v13 = vld [vmem:[#allocation2 + $0x308] sm:$0xff] }
  0xe6   :  { %9694 = vmatprep.subr.msk.bf16.mxu0 %vm11194_vm2, %v9692_v63  ;;  %9747 = vmatpush1.bf16.msk.msra.mxu1 %vm11194_vm2, %v9745_v2  ;;  %v9728_v62 = vpack.c.bf16 %v1710_v60, %v1704_v13  ;;  %v1709_v63 = vld [vmem:[#allocation2 + $0x330] sm:$0xff]  ;;  %v1716_v2 = vld [vmem:[#allocation2 + $0x368] sm:$0xff] }
  0xe7   :  { %8539 = vmatmul.mubr.msk.f32.gmra.mrb[8].mxu1 %vm202_vm4, %v11482_v30 }
  0xe8   :  { %8506 = vmatmul.mubr.msk.f32.gmra.mrb[2].mxu0 %vm202_vm4, %v11396_v31  ;;  %1532 = vmatprep.mubr.f32.mxu1 %v11044_v0 }
  0xe9   :  { %1016 = vmatprep.mubr.f32.mxu0 %v11044_v0  ;;  %9697 = vmatpush1.bf16.msk.msra.mxu0 %vm11194_vm2, %v9695_v3  ;;  %v1722_v3 = vld [vmem:[#allocation2 + $0x398] sm:$0xf] }
  0xea   :  { %9699 = vmatprep.subr.bf16.mxu0 %v9698_v5  ;;  %v1721_v5 = vld [vmem:[#allocation2 + $0x390] sm:$0xf]  ;;  %v9732_v43 = vpack.c.bf16 %v1722_v3, %v1716_v2 }
  0xeb   :  { %8540 = vmatmul.mubr.msk.f32.gmra.mrb[10].mxu1 %vm202_vm4, %v11493_v8  ;;  %v9735_v36 = vpack.c.bf16 %v1721_v5, %v1715_v4 }
  0xec   :  { %8507 = vmatmul.mubr.msk.f32.gmra.mrb[4].mxu0 %vm202_vm4, %v11412_v26  ;;  %1538 = vmatprep.mubr.f32.mxu1 %v11044_v0 }
  0xed   :  { %1022 = vmatprep.mubr.f32.mxu0 %v11044_v0 }
  0xef   :  { %8541 = vmatmul.mubr.msk.f32.gmra.mrb[12].mxu1 %vm202_vm4, %v11503_v29 }
  0xf0   :  { %8508 = vmatmul.mubr.msk.f32.gmra.mrb[6].mxu0 %vm202_vm4, %v11423_v37  ;;  %1544 = vmatprep.mubr.f32.mxu1 %v11044_v0 }
  0xf1   :  { %1028 = vmatprep.mubr.f32.mxu0 %v11044_v0 }
  0xf3   :  { %8542 = vmatmul.mubr.msk.f32.gmra.mrb[14].mxu1 %vm202_vm4, %v11519_v18 }
  0xf4   :  { %8509 = vmatmul.mubr.msk.f32.gmra.mrb[20].mxu0 %vm202_vm4, %v11433_v40  ;;  %1922 = vmatprep.mubr.f32.mxu1 %v11044_v0 }
  0xf5   :  { %1034 = vmatprep.mubr.f32.mxu0 %v11044_v0 }
  0xf7   :  { %8561 = vmatmul.mubr.msk.f32.vlgmr.msra.gmra.mrb[4].mxu1 %vm202_vm4, %v11525_v20 }
  0xf8   :  { %8510 = vmatmul.mubr.msk.f32.gmra.mrb[22].mxu0 %vm202_vm4, %v11443_v51  ;;  %1928 = vmatprep.mubr.f32.mxu1 %v11044_v0 }
  0xf9   :  { %1206 = vmatprep.mubr.f32.mxu0 %v11044_v0 }
  0xfb   :  { %8562 = vmatmul.mubr.msk.f32.gmra.mrb[6].mxu1 %vm202_vm4, %v11537_v34 }
  0xfc   :  { %8521 = vmatmul.mubr.msk.f32.vlgmr.msra.gmra.mrb[8].mxu0 %vm202_vm4, %v11384_v19  ;;  %1934 = vmatprep.mubr.f32.mxu1 %v11044_v0  ;;  %v10841_v19 = vld [vmem:[%s13876_s0 + $0x20] sm:$0xff]  ;;  %s11046_s0 = smov 96  }
  0xfd   :  { %9701 = vmatpush1.bf16.msra.mxu0 %v9700_v27  ;;  %1212 = vmatprep.mubr.f32.mxu0 %v11044_v0  ;;  %v1695_v46 = vrot.slane %v10841_v19, 4 }
  0xfe   :  { %9704 = vmatprep.subr.msk.bf16.mxu0 %vm11194_vm2, %v9702_v33 }
  0xff   :  { %8563 = vmatmul.mubr.msk.f32.gmra.mrb[8].mxu1 %vm202_vm4, %v11551_v44  ;;  %v11568_v45 = vsel %vm215_vm0, %v1695_v46, %v1696_v48 }
 0x100   :  { %8522 = vmatmul.mubr.msk.f32.gmra.mrb[10].mxu0 %vm202_vm4, %v11396_v31  ;;  %1940 = vmatprep.mubr.f32.mxu1 %v11044_v0  ;;  %v11580_v31 = vsel %vm215_vm0, %v1696_v48, %v1698_v50 }
 0x101   :  { %1218 = vmatprep.mubr.f32.mxu0 %v11044_v0  ;;  %9707 = vmatpush1.bf16.msk.msra.mxu0 %vm11194_vm2, %v9705_v41 }
 0x102   :  { %9719 = vmatprep.subr.bf16.mxu0 %v9718_v42 }
 0x103   :  { %8564 = vmatmul.mubr.msk.f32.gmra.mrb[10].mxu1 %vm202_vm4, %v11568_v45 }
 0x104   :  { %8523 = vmatmul.mubr.msk.f32.gmra.mrb[12].mxu0 %vm202_vm4, %v11412_v26  ;;  %1946 = vmatprep.mubr.f32.mxu1 %v11044_v0  ;;  %v11592_v26 = vsel %vm215_vm0, %v1698_v50, %v1700_v53 }
 0x105   :  { %1224 = vmatprep.mubr.f32.mxu0 %v11044_v0 }
 0x107   :  { %8565 = vmatmul.mubr.msk.f32.gmra.mrb[12].mxu1 %vm202_vm4, %v11580_v31 }
 0x108   :  { %8524 = vmatmul.mubr.msk.f32.gmra.mrb[14].mxu0 %vm202_vm4, %v11423_v37  ;;  %1952 = vmatprep.mubr.f32.mxu1 %v11044_v0  ;;  %v1311_v37 = vld [vmem:[#allocation2 + $0x2c0] sm:$0xff] }
 0x109   :  { %1230 = vmatprep.mubr.f32.mxu0 %v11044_v0  ;;  %v9725_v14 = vpack.c.bf16 %v1317_v58, %v1311_v37 }
 0x10b   :  { %8566 = vmatmul.mubr.msk.f32.gmra.mrb[14].mxu1 %vm202_vm4, %v11592_v26 }
 0x10c   :  { %8525 = vmatmul.mubr.msk.f32.gmra.mrb[16].mxu0 %vm202_vm4, %v11433_v40  ;;  %v9722_v40 = vpack.c.bf16 %v1318_v57, %v1312_v56 }
 0x10d   :  { %1236 = vmatprep.mubr.f32.mxu0 %v11044_v0 }
 0x110   :  { %8526 = vmatmul.mubr.msk.f32.gmra.mrb[18].mxu0 %vm202_vm4, %v11443_v51  ;;  %v1703_v51 = vld [vmem:[#allocation2 + $0x300] sm:$0xff] }
 0x111   :  { %1413 = vmatprep.mubr.f32.mxu0 %v11044_v0  ;;  %v9730_v6 = vpack.c.bf16 %v1709_v63, %v1703_v51 }
 0x114   :  { %8529 = vmatmul.mubr.msk.f32.vlgmr.msra.gmra.mrb[0].mxu0 %vm202_vm4, %v11454_v61 }
 0x115   :  { %9721 = vmatpush1.bf16.msra.mxu0 %v9720_v59  ;;  %1419 = vmatprep.mubr.f32.mxu0 %v11044_v0 }
 0x116   :  { %9724 = vmatprep.subr.msk.bf16.mxu0 %vm11194_vm2, %v9722_v40 }
 0x118   :  { %8530 = vmatmul.mubr.msk.f32.gmra.mrb[2].mxu0 %vm202_vm4, %v11466_v23 }
 0x119   :  { %1425 = vmatprep.mubr.f32.mxu0 %v11044_v0  ;;  %9727 = vmatpush1.bf16.msk.msra.mxu0 %vm11194_vm2, %v9725_v14 }
 0x11a   :  { %9729 = vmatprep.subr.bf16.mxu0 %v9728_v62 }
 0x11c   :  { %8531 = vmatmul.mubr.msk.f32.gmra.mrb[4].mxu0 %vm202_vm4, %v11482_v30 }
 0x11d   :  { %1431 = vmatprep.mubr.f32.mxu0 %v11044_v0 }
 0x120   :  { %8532 = vmatmul.mubr.msk.f32.gmra.mrb[6].mxu0 %vm202_vm4, %v11493_v8 }
 0x121   :  { %1437 = vmatprep.mubr.f32.mxu0 %v11044_v0 }
 0x124   :  { %8533 = vmatmul.mubr.msk.f32.gmra.mrb[20].mxu0 %vm202_vm4, %v11503_v29 }
 0x125   :  { %1443 = vmatprep.mubr.f32.mxu0 %v11044_v0 }
 0x128   :  { %8534 = vmatmul.mubr.msk.f32.gmra.mrb[22].mxu0 %vm202_vm4, %v11519_v18 }
 0x129   :  { %1615 = vmatprep.mubr.f32.mxu0 %v11044_v0 }
 0x12c   :  { %8545 = vmatmul.mubr.msk.f32.vlgmr.msra.gmra.mrb[8].mxu0 %vm202_vm4, %v11454_v61  ;;  %v1707_v61 = vld [vmem:[#allocation2 + $0x320] sm:$0xff] }
 0x12d   :  { %9731 = vmatpush1.bf16.msra.mxu0 %v9730_v6  ;;  %1621 = vmatprep.mubr.f32.mxu0 %v11044_v0 }
 0x12e   :  { %9734 = vmatprep.subr.msk.bf16.mxu0 %vm11194_vm2, %v9732_v43 }
 0x130   :  { %8546 = vmatmul.mubr.msk.f32.gmra.mrb[10].mxu0 %vm202_vm4, %v11466_v23  ;;  %v1713_v23 = vld [vmem:[#allocation2 + $0x350] sm:$0xff] }
 0x131   :  { %1627 = vmatprep.mubr.f32.mxu0 %v11044_v0  ;;  %9737 = vmatpush1.bf16.msk.msra.mxu0 %vm11194_vm2, %v9735_v36 }
 0x132   :  { %9749 = vmatprep.subr.bf16.mxu0 %v9748_v10 }
 0x134   :  { %8547 = vmatmul.mubr.msk.f32.gmra.mrb[12].mxu0 %vm202_vm4, %v11482_v30  ;;  %v9750_v30 = vpack.c.bf16 %v1713_v23, %v1707_v61 }
 0x135   :  { %1633 = vmatprep.mubr.f32.mxu0 %v11044_v0 }
 0x138   :  { %8548 = vmatmul.mubr.msk.f32.gmra.mrb[14].mxu0 %vm202_vm4, %v11493_v8  ;;  %v1725_v8 = vld [vmem:[#allocation2 + $0x3b0] sm:$0xf] }
 0x139   :  { %1639 = vmatprep.mubr.f32.mxu0 %v11044_v0 }
 0x13c   :  { %8549 = vmatmul.mubr.msk.f32.gmra.mrb[16].mxu0 %vm202_vm4, %v11503_v29  ;;  %v9755_v29 = vpack.c.bf16 %v1725_v8, %v1719_v39 }
 0x13d   :  { %1645 = vmatprep.mubr.f32.mxu0 %v11044_v0 }
 0x140   :  { %8550 = vmatmul.mubr.msk.f32.gmra.mrb[18].mxu0 %vm202_vm4, %v11519_v18 }
 0x141   :  { %1821 = vmatprep.mubr.f32.mxu0 %v11044_v0 }
 0x144   :  { %8553 = vmatmul.mubr.msk.f32.vlgmr.msra.gmra.mrb[0].mxu0 %vm202_vm4, %v11525_v20 }
 0x145   :  { %9751 = vmatpush1.bf16.msra.mxu0 %v9750_v30  ;;  %1827 = vmatprep.mubr.f32.mxu0 %v11044_v0 }
 0x146   :  { %9754 = vmatprep.subr.msk.bf16.mxu0 %vm11194_vm2, %v9752_v15 }
 0x148   :  { %8554 = vmatmul.mubr.msk.f32.gmra.mrb[2].mxu0 %vm202_vm4, %v11537_v34 }
 0x149   :  { %1833 = vmatprep.mubr.f32.mxu0 %v11044_v0  ;;  %9757 = vmatpush1.bf16.msk.msra.mxu0 %vm11194_vm2, %v9755_v29 }
 0x14c   :  { %8555 = vmatmul.mubr.msk.f32.gmra.mrb[4].mxu0 %vm202_vm4, %v11551_v44 }
 0x14d   :  { %1839 = vmatprep.mubr.f32.mxu0 %v11044_v0 }
 0x150   :  { %8556 = vmatmul.mubr.msk.f32.gmra.mrb[6].mxu0 %vm202_vm4, %v11568_v45 }
 0x151   :  { %1845 = vmatprep.mubr.f32.mxu0 %v11044_v0 }
 0x154   :  { %8557 = vmatmul.mubr.msk.f32.gmra.mrb[20].mxu0 %vm202_vm4, %v11580_v31 }
 0x155   :  { %1851 = vmatprep.mubr.f32.mxu0 %v11044_v0 }
 0x158   :  { %8558 = vmatmul.mubr.msk.f32.gmra.mrb[22].mxu0 %vm202_vm4, %v11592_v26 }
 0x159   :  { %2023 = vmatprep.mubr.f32.mxu0 %v11044_v0 }
 0x15c   :  { %8569 = vmatmul.mubr.msk.f32.vlgmr.msra.gmra.mrb[8].mxu0 %vm202_vm4, %v11525_v20  ;;  %v2098_v20 = vlaneseq }
 0x15d   :  { %2029 = vmatprep.mubr.f32.mxu0 %v11044_v0 }
 0x15e   :  { %v11693_v21 = vshrl.u32 %v2098_v20, 7 }
 0x15f   :  { %v11674_v1 = vpop.f32.mrb[0].mxu1 }
 0x160   :  { %8570 = vmatmul.mubr.msk.f32.gmra.mrb[10].mxu0 %vm202_vm4, %v11537_v34  ;;  %v11676_v16 = vpop.f32.mrb[1].mxu1  ;;  %13938 = vst [vmem:[#allocation20_spill] sm:$0xff] %v11693_v21  ;;  %v13886_v22 = vsub.s32 2, %v11693_v21  ;;  %v13887_v24 = vsub.s32 3, %v11693_v21 }
 0x161   :  { %2035 = vmatprep.mubr.f32.mxu0 %v11044_v0 }
 0x162   :  { %v11702_v27 = vrot.slane %v11697_v25, %v13886_v22 }
 0x164   :  { %8571 = vmatmul.mubr.msk.f32.gmra.mrb[12].mxu0 %vm202_vm4, %v11551_v44 }
 0x165   :  { %2041 = vmatprep.mubr.f32.mxu0 %v11044_v0  ;;  %v11681_v17 = vpop.f32.mrb[2].mxu1 }
 0x166   :  { %v11685_v18 = vpop.f32.mrb[3].mxu1 }
 0x168   :  { %8572 = vmatmul.mubr.msk.f32.gmra.mrb[14].mxu0 %vm202_vm4, %v11568_v45 }
 0x169   :  { %2047 = vmatprep.mubr.f32.mxu0 %v11044_v0 }
 0x16c   :  { %8573 = vmatmul.mubr.msk.f32.gmra.mrb[16].mxu0 %vm202_vm4, %v11580_v31 }
 0x16d   :  { %2053 = vmatprep.mubr.f32.mxu0 %v11044_v0  ;;  %v11707_v0 = vrot.slane %v11697_v25, %v13887_v24 }
 0x170   :  { %8574 = vmatmul.mubr.msk.f32.gmra.mrb[18].mxu0 %vm202_vm4, %v11592_v26 }
 0x1ca   :  { %v1924_v28 = vpop.f32.mrb[4].mxu1 }
 0x1cb   :  { %v2130_v32 = vadd.f32 %v11702_v27, %v1924_v28  ;;  %v1926_v33 = vpop.f32.mrb[5].mxu1 }
 0x1cc   :  { %v2131_v34 = vadd.f32 %v11707_v0, %v1926_v33 }
 0x1cd   :  { %v2166_v35 = vmax.f32 %v2130_v32, 0.0 }
 0x1ce   :  { %v2167_v38 = vmax.f32 %v2131_v34, 0.0  ;;  %v1930_v41 = vpop.f32.mrb[6].mxu1 }
 0x1cf   :  { %v2136_v42 = vadd.f32 %v11702_v27, %v1930_v41  ;;  %v1932_v44 = vpop.f32.mrb[7].mxu1  ;;  %v11713_v46 = vrot.slane %v2166_v35, 1 }
 0x1d0   :  { %v2137_v19 = vadd.f32 %v11707_v0, %v1932_v44  ;;  %v11715_v48 = vrot.slane %v2167_v38, 1 }
 0x1d1   :  { %v2172_v47 = vmax.f32 %v2136_v42, 0.0 }
 0x1d2   :  { %v2173_v45 = vmax.f32 %v2137_v19, 0.0  ;;  %v1936_v49 = vpop.f32.mrb[8].mxu1 }
 0x1d3   :  { %v2243_v50 = vrot.slane %v2172_v47, 1  ;;  %v2142_v31 = vadd.f32 %v11702_v27, %v1936_v49  ;;  %v1938_v52 = vpop.f32.mrb[9].mxu1 }
 0x1d4   :  { %v2246_v53 = vrot.slane %v2173_v45, 1  ;;  %v2143_v26 = vadd.f32 %v11707_v0, %v1938_v52 }
 0x1d5   :  { %v2244_v54 = vsel %vm158_vm3, %v11713_v46, %v2243_v50  ;;  %v2178_v55 = vmax.f32 %v2142_v31, 0.0 }
 0x1d6   :  { %v2352_v56 = vmax.f32 %v2166_v35, %v2244_v54  ;;  %v2247_v57 = vsel %vm158_vm3, %v11715_v48, %v2246_v53  ;;  %v2179_v37 = vmax.f32 %v2143_v26, 0.0  ;;  %v1942_v58 = vpop.f32.mrb[10].mxu1 }
 0x1d7   :  { %v11723_v59 = vmax.f32 %v2167_v38, %v2247_v57  ;;  %v2258_v13 = vrot.slane %v2178_v55, 1  ;;  %v2148_v60 = vadd.f32 %v11702_v27, %v1942_v58  ;;  %v1944_v40 = vpop.f32.mrb[11].mxu1 }
 0x1d8   :  { %v2394_v14 = vrot.slane %v2352_v56, 1  ;;  %v2260_v62 = vrot.slane %v2179_v37, 1  ;;  %v2149_v51 = vadd.f32 %v11707_v0, %v1944_v40  ;;  %v2406_v63 = vrot.slane %v2352_v56, 2 }
 0x1d9   :  { %v2259_v2 = vsel %vm158_vm3, %v2243_v50, %v2258_v13  ;;  %v2184_v3 = vmax.f32 %v2148_v60, 0.0  ;;  %v2395_v4 = vrot.slane %v11723_v59, 1  ;;  %v2407_v11 = vrot.slane %v11723_v59, 2 }
 0x1da   :  { %v11729_v5 = vmax.f32 %v2172_v47, %v2259_v2  ;;  %v2261_v6 = vsel %vm158_vm3, %v2246_v53, %v2260_v62  ;;  %v2185_v7 = vmax.f32 %v2149_v51, 0.0  ;;  %v1948_v9 = vpop.f32.mrb[12].mxu1  ;;  %v2581_v23 = vsel %vm2578_vm7, %v2352_v56, %v2394_v14 }
 0x1db   :  { %v11732_v43 = vmax.f32 %v2173_v45, %v2261_v6  ;;  %v2270_v36 = vrot.slane %v2184_v3, 1  ;;  %v2154_v10 = vadd.f32 %v11702_v27, %v1948_v9  ;;  %v1950_v61 = vpop.f32.mrb[13].mxu1  ;;  %v2418_v15 = vrot.slane %v2352_v56, 3 }
 0x1dc   :  { %v2272_v12 = vrot.slane %v2185_v7, 1  ;;  %v2155_v30 = vadd.f32 %v11707_v0, %v1950_v61  ;;  %v2436_v29 = vrot.slane %v11729_v5, 4  ;;  %v2448_v20 = vrot.slane %v11729_v5, 5 }
 0x1dd   :  { %v2271_v39 = vsel %vm158_vm3, %v2258_v13, %v2270_v36  ;;  %v2190_v8 = vmax.f32 %v2154_v10, 0.0  ;;  %v2588_v35 = vsel %vm2585_vm8, %v2581_v23, %v2406_v63  ;;  %v2460_v19 = vrot.slane %v11729_v5, 6 }
 0x1de   :  { %v2364_v28 = vmax.f32 %v2178_v55, %v2271_v39  ;;  %v2273_v32 = vsel %vm158_vm3, %v2260_v62, %v2272_v12  ;;  %v2191_v33 = vmax.f32 %v2155_v30, 0.0  ;;  %v1954_v34 = vpop.f32.mrb[14].mxu1  ;;  %v2472_v50 = vrot.slane %v11729_v5, 7 }
 0x1df   :  { %v2365_v38 = vmax.f32 %v2179_v37, %v2273_v32  ;;  %v2282_v41 = vrot.slane %v2190_v8, 1  ;;  %v2160_v42 = vadd.f32 %v11702_v27, %v1954_v34  ;;  %v1956_v44 = vpop.f32.mrb[15].mxu1  ;;  %v2595_v26 = vsel %vm2592_vm9, %v2588_v35, %v2418_v15 }
 0x1e0   :  { %v2490_v47 = vrot.slane %v2364_v28, 1  ;;  %v2284_v45 = vrot.slane %v2191_v33, 1  ;;  %v2161_v49 = vadd.f32 %v11707_v0, %v1956_v44  ;;  %v2502_v31 = vrot.slane %v2364_v28, 2 }
 0x1e1   :  { %v2283_v52 = vsel %vm158_vm3, %v2270_v36, %v2282_v41  ;;  %v2196_v53 = vmax.f32 %v2160_v42, 0.0  ;;  %v2491_v54 = vrot.slane %v2365_v38, 1  ;;  %v2514_v58 = vrot.slane %v2364_v28, 3 }
 0x1e2   :  { %v2370_v55 = vmax.f32 %v2184_v3, %v2283_v52  ;;  %v2285_v56 = vsel %vm158_vm3, %v2272_v12, %v2284_v45  ;;  %v2197_v27 = vmax.f32 %v2161_v49, 0.0  ;;  %v2625_v13 = vsel %vm2578_vm7, %v2364_v28, %v2490_v47 }
 0x1e3   :  { %v2371_v57 = vmax.f32 %v2185_v7, %v2285_v56  ;;  %v2294_v37 = vrot.slane %v2196_v53, 1  ;;  %v2503_v60 = vrot.slane %v2365_v38, 2  ;;  %v2631_v2 = vsel %vm2585_vm8, %v2625_v13, %v2502_v31 }
 0x1e4   :  { %v2296_v0 = vrot.slane %v2197_v27, 1  ;;  %v2532_v40 = vrot.slane %v2370_v55, 4  ;;  %v2544_v14 = vrot.slane %v2370_v55, 5  ;;  %v2556_v63 = vrot.slane %v2370_v55, 6 }
 0x1e5   :  { %v2295_v62 = vsel %vm158_vm3, %v2282_v41, %v2294_v37  ;;  %v2346_v51 = vsel %vm158_vm3, %v2294_v37, %v11713_v46  ;;  %v2568_v10 = vrot.slane %v2370_v55, 7  ;;  %v2637_v61 = vsel %vm2592_vm9, %v2631_v2, %v2514_v58 }
 0x1e6   :  { %v2376_v3 = vmax.f32 %v2190_v8, %v2295_v62  ;;  %v11755_v5 = vmax.f32 %v2196_v53, %v2346_v51  ;;  %v2297_v6 = vsel %vm158_vm3, %v2284_v45, %v2296_v0  ;;  %v2347_v7 = vsel %vm158_vm3, %v2296_v0, %v11715_v48 }
 0x1e7   :  { %v2377_v9 = vmax.f32 %v2191_v33, %v2297_v6  ;;  %v11760_v36 = vmax.f32 %v2197_v27, %v2347_v7  ;;  %v2643_v46 = vsel %vm215_vm0, %v2637_v61, %v2532_v40  ;;  %v2515_v12 = vrot.slane %v2365_v38, 3 }
 0x1e8   :  { %v2673_v23 = vrot.slane %v2376_v3, 1  ;;  %v2533_v30 = vrot.slane %v2371_v57, 4  ;;  %v2685_v15 = vrot.slane %v2376_v3, 2  ;;  %v2715_v39 = vrot.slane %v11755_v5, 4 }
 0x1e9   :  { %v2674_v8 = vrot.slane %v2377_v9, 1  ;;  %v2649_v28 = vsel %vm1279_vm6, %v2643_v46, %v2544_v14  ;;  %v2686_v32 = vrot.slane %v2377_v9, 2  ;;  %v2545_v33 = vrot.slane %v2371_v57, 5 }
 0x1ea   :  { %v2655_v48 = vsel %vm870_vm5, %v2649_v28, %v2556_v63  ;;  %v2557_v34 = vrot.slane %v2371_v57, 6  ;;  %v2569_v41 = vrot.slane %v2371_v57, 7  ;;  %v2626_v42 = vsel %vm2578_vm7, %v2365_v38, %v2491_v54 }
 0x1eb   :  { %v11768_v35 = vsel %vm158_vm3, %v2655_v48, %v2568_v10  ;;  %v2601_v44 = vsel %vm215_vm0, %v2595_v26, %v2436_v29  ;;  %v2632_v47 = vsel %vm2585_vm8, %v2626_v42, %v2503_v60  ;;  %v2419_v49 = vrot.slane %v11723_v59, 3 }
 0x1ec   :  { %v2607_v45 = vsel %vm1279_vm6, %v2601_v44, %v2448_v20  ;;  %v2437_v31 = vrot.slane %v11732_v43, 4  ;;  %v2638_v52 = vsel %vm2592_vm9, %v2632_v47, %v2515_v12  ;;  %v2449_v55 = vrot.slane %v11732_v43, 5 }
 0x1ed   :  { %v2613_v53 = vsel %vm870_vm5, %v2607_v45, %v2460_v19  ;;  %v2461_v56 = vrot.slane %v11732_v43, 6  ;;  %v2644_v38 = vsel %vm215_vm0, %v2638_v52, %v2533_v30  ;;  %v2582_v20 = vsel %vm2578_vm7, %v11723_v59, %v2395_v4 }
 0x1ee   :  { %v11782_v29 = vsel %vm158_vm3, %v2613_v53, %v2472_v50  ;;  %v2697_v26 = vrot.slane %v2376_v3, 3  ;;  %v2650_v54 = vsel %vm1279_vm6, %v2644_v38, %v2545_v33  ;;  %v2473_v27 = vrot.slane %v11732_v43, 7 }
 0x1ef   :  { %v2589_v19 = vsel %vm2585_vm8, %v2582_v20, %v2407_v11  ;;  %v2727_v57 = vrot.slane %v11755_v5, 5  ;;  %v2656_v37 = vsel %vm870_vm5, %v2650_v54, %v2557_v34  ;;  %v2739_v58 = vrot.slane %v11755_v5, 6 }
 0x1f0   :  { %v2596_v50 = vsel %vm2592_vm9, %v2589_v19, %v2419_v49  ;;  %v2763_v13 = vsel %vm2578_vm7, %v2376_v3, %v2673_v23  ;;  %v11799_v4 = vsel %vm158_vm3, %v2656_v37, %v2569_v41  ;;  %v2698_v59 = vrot.slane %v2377_v9, 3 }
 0x1f1   :  { %v2602_v60 = vsel %vm215_vm0, %v2596_v50, %v2437_v31  ;;  %v2769_v43 = vsel %vm2585_vm8, %v2763_v13, %v2685_v15  ;;  %v2716_v11 = vrot.slane %v11760_v36, 4  ;;  %v2751_v40 = vrot.slane %v11755_v5, 7 }
 0x1f2   :  { %v2608_v0 = vsel %vm1279_vm6, %v2602_v60, %v2449_v55  ;;  %v2775_v14 = vsel %vm2592_vm9, %v2769_v43, %v2697_v26  ;;  %v2728_v63 = vrot.slane %v11760_v36, 5  ;;  %v2764_v2 = vsel %vm2578_vm7, %v2377_v9, %v2674_v8 }
 0x1f3   :  { %v2614_v62 = vsel %vm870_vm5, %v2608_v0, %v2461_v56  ;;  %v2781_v51 = vsel %vm215_vm0, %v2775_v14, %v2715_v39  ;;  %v2740_v7 = vrot.slane %v11760_v36, 6  ;;  %v2770_v10 = vsel %vm2585_vm8, %v2764_v2, %v2686_v32 }
 0x1f4   :  { %v11812_v3 = vsel %vm158_vm3, %v2614_v62, %v2473_v27  ;;  %v2787_v6 = vsel %vm1279_vm6, %v2781_v51, %v2727_v57  ;;  %v2752_v61 = vrot.slane %v11760_v36, 7  ;;  %v2776_v23 = vsel %vm2592_vm9, %v2770_v10, %v2698_v59 }
 0x1f5   :  { %v2793_v5 = vsel %vm870_vm5, %v2787_v6, %v2739_v58  ;;  %v2782_v9 = vsel %vm215_vm0, %v2776_v23, %v2716_v11  ;;  %v13889_v39 = vsub.s32 0, %v11693_v21  ;;  %v13888_v8 = vsub.s32 1, %v11693_v21 }
 0x1f6   :  { %v11821_v46 = vsel %vm158_vm3, %v2793_v5, %v2751_v40  ;;  %v2788_v12 = vsel %vm1279_vm6, %v2782_v9, %v2728_v63  ;;  %v2116_v62 = vsub.s32 4, %v11693_v21  ;;  %v2120_v2 = vsub.s32 5, %v11693_v21 }
 0x1f7   :  { %v2794_v30 = vsel %vm870_vm5, %v2788_v12, %v2740_v7  ;;  %v11834_v36 = vrot.slane %v11697_v25, %v13889_v39  ;;  %v11839_v28 = vrot.slane %v11697_v25, %v13888_v8 }
 0x1f8   :  { %v11827_v15 = vsel %vm158_vm3, %v2794_v30, %v2752_v61 }
 0x217   :  { %v1823_v32 = vpop.f32.mrb[0].mxu0 }
 0x218   :  { %v2128_v48 = vadd.f32 %v11834_v36, %v1823_v32  ;;  %v1825_v33 = vpop.f32.mrb[1].mxu0 }
 0x219   :  { %v2129_v34 = vadd.f32 %v11839_v28, %v1825_v33 }
 0x21a   :  { %v2164_v42 = vmax.f32 %v2128_v48, 0.0 }
 0x21b   :  { %v1829_v41 = vpop.f32.mrb[2].mxu0  ;;  %v2165_v45 = vmax.f32 %v2129_v34, 0.0 }
 0x21c   :  { %v2134_v44 = vadd.f32 %v11834_v36, %v1829_v41  ;;  %v1831_v47 = vpop.f32.mrb[3].mxu0  ;;  %v11845_v55 = vrot.slane %v2164_v42, 1  ;;  %v11869_v41 = vrot.slane %v11697_v25, %v2116_v62 }
 0x21d   :  { %v2135_v49 = vadd.f32 %v11839_v28, %v1831_v47  ;;  %v11848_v26 = vrot.slane %v2165_v45, 1 }
 0x21e   :  { %v2170_v31 = vmax.f32 %v2134_v44, 0.0 }
 0x21f   :  { %v2171_v52 = vmax.f32 %v2135_v49, 0.0  ;;  %v1835_v53 = vpop.f32.mrb[4].mxu0 }
 0x220   :  { %v2237_v56 = vrot.slane %v2170_v31, 1  ;;  %v2140_v38 = vadd.f32 %v11834_v36, %v1835_v53  ;;  %v1837_v20 = vpop.f32.mrb[5].mxu0 }
 0x221   :  { %v2240_v54 = vrot.slane %v2171_v52, 1  ;;  %v2141_v27 = vadd.f32 %v11839_v28, %v1837_v20 }
 0x222   :  { %v2238_v19 = vsel %vm158_vm3, %v11845_v55, %v2237_v56  ;;  %v2176_v57 = vmax.f32 %v2140_v38, 0.0 }
 0x223   :  { %v2350_v37 = vmax.f32 %v2164_v42, %v2238_v19  ;;  %v2241_v50 = vsel %vm158_vm3, %v11848_v26, %v2240_v54  ;;  %v2177_v58 = vmax.f32 %v2141_v27, 0.0  ;;  %v1841_v13 = vpop.f32.mrb[6].mxu0 }
 0x224   :  { %v11855_v60 = vmax.f32 %v2165_v45, %v2241_v50  ;;  %v2254_v43 = vrot.slane %v2176_v57, 1  ;;  %v2146_v59 = vadd.f32 %v11834_v36, %v1841_v13  ;;  %v1843_v11 = vpop.f32.mrb[7].mxu0 }
 0x225   :  { %v2392_v0 = vrot.slane %v2350_v37, 1  ;;  %v2256_v40 = vrot.slane %v2177_v58, 1  ;;  %v2147_v14 = vadd.f32 %v11839_v28, %v1843_v11  ;;  %v2404_v61 = vrot.slane %v2350_v37, 2 }
 0x226   :  { %v2255_v51 = vsel %vm158_vm3, %v2237_v56, %v2254_v43  ;;  %v2182_v63 = vmax.f32 %v2146_v59, 0.0  ;;  %v2416_v34 = vrot.slane %v2350_v37, 3 }
 0x227   :  { %v2356_v6 = vmax.f32 %v2170_v31, %v2255_v51  ;;  %v2257_v7 = vsel %vm158_vm3, %v2240_v54, %v2256_v40  ;;  %v2183_v10 = vmax.f32 %v2147_v14, 0.0  ;;  %v1847_v5 = vpop.f32.mrb[20].mxu0  ;;  %v2579_v32 = vsel %vm2578_vm7, %v2350_v37, %v2392_v0 }
 0x228   :  { %v11863_v23 = vmax.f32 %v2171_v52, %v2257_v7  ;;  %v2266_v9 = vrot.slane %v2182_v63, 1  ;;  %v9862_v12 = vadd.f32 %v1847_v5, %v11674_v1  ;;  %v1849_v30 = vpop.f32.mrb[21].mxu0  ;;  %v2586_v53 = vsel %vm2585_vm8, %v2579_v32, %v2404_v61 }
 0x229   :  { %v2268_v48 = vrot.slane %v2183_v10, 1  ;;  %v9863_v33 = vadd.f32 %v1849_v30, %v11676_v16  ;;  %v2434_v47 = vrot.slane %v2356_v6, 4  ;;  %v2446_v45 = vrot.slane %v2356_v6, 5 }
 0x22a   :  { %v2267_v42 = vsel %vm158_vm3, %v2254_v43, %v2266_v9  ;;  %v2152_v44 = vadd.f32 %v9862_v12, %v11834_v36  ;;  %v2593_v54 = vsel %vm2592_vm9, %v2586_v53, %v2416_v34  ;;  %v2393_v37 = vrot.slane %v11855_v60, 1 }
 0x22b   :  { %v11873_v49 = vmax.f32 %v2176_v57, %v2267_v42  ;;  %v2269_v1 = vsel %vm158_vm3, %v2256_v40, %v2268_v48  ;;  %v2153_v31 = vadd.f32 %v9863_v33, %v11839_v28  ;;  %v1853_v52 = vpop.f32.mrb[22].mxu0  ;;  %v11884_v57 = vrot.slane %v11697_v25, %v2120_v2 }
 0x22c   :  { %v11878_v16 = vmax.f32 %v2177_v58, %v2269_v1  ;;  %v2188_v56 = vmax.f32 %v2152_v44, 0.0  ;;  %v9864_v38 = vadd.f32 %v1853_v52, %v11681_v17  ;;  %v1855_v20 = vpop.f32.mrb[23].mxu0  ;;  %v2458_v43 = vrot.slane %v2356_v6, 6 }
 0x22d   :  { %v2189_v27 = vmax.f32 %v2153_v31, 0.0  ;;  %v9865_v19 = vadd.f32 %v1855_v20, %v11685_v18  ;;  %v2470_v11 = vrot.slane %v2356_v6, 7  ;;  %v2599_v17 = vsel %vm215_vm0, %v2593_v54, %v2434_v47 }
 0x22e   :  { %v2278_v50 = vrot.slane %v2188_v56, 1  ;;  %v2158_v13 = vadd.f32 %v9864_v38, %v11834_v36  ;;  %v2605_v18 = vsel %vm1279_vm6, %v2599_v17, %v2446_v45  ;;  %v2500_v12 = vrot.slane %v11873_v49, 2 }
 0x22f   :  { %v2280_v58 = vrot.slane %v2189_v27, 1  ;;  %v2159_v59 = vadd.f32 %v9865_v19, %v11839_v28  ;;  %v2025_v0 = vpop.f32.mrb[8].mxu0  ;;  %v2611_v7 = vsel %vm870_vm5, %v2605_v18, %v2458_v43  ;;  %v2405_v28 = vrot.slane %v11855_v60, 2 }
 0x230   :  { %v2279_v40 = vsel %vm158_vm3, %v2266_v9, %v2278_v50  ;;  %v2194_v14 = vmax.f32 %v2158_v13, 0.0  ;;  %v2132_v25 = vadd.f32 %v11869_v41, %v2025_v0  ;;  %v2027_v62 = vpop.f32.mrb[9].mxu0  ;;  %v11901_v61 = vsel %vm158_vm3, %v2611_v7, %v2470_v11 }
 0x231   :  { %v11893_v51 = vmax.f32 %v2182_v63, %v2279_v40  ;;  %v2281_v36 = vsel %vm158_vm3, %v2268_v48, %v2280_v58  ;;  %v2195_v2 = vmax.f32 %v2159_v59, 0.0  ;;  %v2488_v9 = vrot.slane %v11873_v49, 1  ;;  %2806 = vrot.lane.b32.xlu1 %v11901_v61, %s11046_s0 }
 0x232   :  { %v11898_v6 = vmax.f32 %v2183_v10, %v2281_v36  ;;  %v2290_v5 = vrot.slane %v2194_v14, 1  ;;  %v2133_v63 = vadd.f32 %v11884_v57, %v2027_v62  ;;  %v2168_v33 = vmax.f32 %v2132_v25, 0.0 }
 0x233   :  { %v2292_v30 = vrot.slane %v2195_v2, 1  ;;  %v2031_v32 = vpop.f32.mrb[10].mxu0  ;;  %v2501_v20 = vrot.slane %v11878_v16, 2  ;;  %v2512_v19 = vrot.slane %v11873_v49, 3  ;;  %v2530_v43 = vrot.slane %v11893_v51, 4 }
 0x234   :  { %v2291_v48 = vsel %vm158_vm3, %v2278_v50, %v2290_v5  ;;  %v2344_v10 = vsel %vm158_vm3, %v2290_v5, %v11845_v55  ;;  %v2138_v34 = vadd.f32 %v11869_v41, %v2031_v32  ;;  %v2033_v42 = vpop.f32.mrb[11].mxu0  ;;  %v2169_v53 = vmax.f32 %v2133_v63, 0.0 }
 0x235   :  { %v11912_v44 = vmax.f32 %v2188_v56, %v2291_v48  ;;  %v11914_v47 = vmax.f32 %v2194_v14, %v2344_v10  ;;  %v2293_v45 = vsel %vm158_vm3, %v2280_v58, %v2292_v30  ;;  %v2345_v1 = vsel %vm158_vm3, %v2292_v30, %v11848_v26 }
 0x236   :  { %v11919_v31 = vmax.f32 %v2189_v27, %v2293_v45  ;;  %v11921_v52 = vmax.f32 %v2195_v2, %v2345_v1  ;;  %v2174_v38 = vmax.f32 %v2138_v34, 0.0  ;;  %v2489_v55 = vrot.slane %v11878_v16, 1 }
 0x237   :  { %v2139_v56 = vadd.f32 %v11884_v57, %v2033_v42  ;;  %v2037_v54 = vpop.f32.mrb[12].mxu0  ;;  %v11927_v50 = vrot.slane %v2168_v33, 1  ;;  %v2542_v11 = vrot.slane %v11893_v51, 5  ;;  %v2623_v17 = vsel %vm2578_vm7, %v11873_v49, %v2488_v9 }
 0x238   :  { %v2249_v13 = vrot.slane %v2174_v38, 1  ;;  %v2144_v26 = vadd.f32 %v11869_v41, %v2037_v54  ;;  %v2039_v27 = vpop.f32.mrb[13].mxu0  ;;  %v11935_v0 = vrot.slane %v2169_v53, 1  ;;  %v2629_v18 = vsel %vm2585_vm8, %v2623_v17, %v2500_v12 }
 0x239   :  { %v2175_v58 = vmax.f32 %v2139_v56, 0.0  ;;  %v2145_v59 = vadd.f32 %v11884_v57, %v2039_v27  ;;  %v2635_v2 = vsel %vm2592_vm9, %v2629_v18, %v2512_v19  ;;  %v2671_v5 = vrot.slane %v11912_v44, 1 }
 0x23a   :  { %v2250_v40 = vsel %vm158_vm3, %v11927_v50, %v2249_v13  ;;  %v2180_v14 = vmax.f32 %v2144_v26, 0.0  ;;  %v2641_v49 = vsel %vm215_vm0, %v2635_v2, %v2530_v43  ;;  %v2554_v12 = vrot.slane %v11893_v51, 6 }
 0x23b   :  { %v11940_v25 = vmax.f32 %v2168_v33, %v2250_v40  ;;  %v2252_v62 = vrot.slane %v2175_v58, 1  ;;  %v2181_v36 = vmax.f32 %v2145_v59, 0.0  ;;  %v2043_v7 = vpop.f32.mrb[14].mxu0  ;;  %v2566_v10 = vrot.slane %v11893_v51, 7 }
 0x23c   :  { %v2262_v30 = vrot.slane %v2180_v14, 1  ;;  %v2150_v9 = vadd.f32 %v11869_v41, %v2043_v7  ;;  %v2045_v63 = vpop.f32.mrb[15].mxu0  ;;  %v2647_v42 = vsel %vm1279_vm6, %v2641_v49, %v2542_v11  ;;  %v2672_v27 = vrot.slane %v11919_v31, 1 }
 0x23d   :  { %v2253_v32 = vsel %vm158_vm3, %v11935_v0, %v2252_v62  ;;  %v2264_v48 = vrot.slane %v2181_v36, 1  ;;  %v2653_v54 = vsel %vm870_vm5, %v2647_v42, %v2554_v12  ;;  %v2151_v19 = vadd.f32 %v11884_v57, %v2045_v63 }
 0x23e   :  { %v11950_v33 = vmax.f32 %v2169_v53, %v2253_v32  ;;  %v2263_v34 = vsel %vm158_vm3, %v2249_v13, %v2262_v30  ;;  %v2186_v45 = vmax.f32 %v2150_v9, 0.0  ;;  %v11963_v51 = vsel %vm158_vm3, %v2653_v54, %v2566_v10 }
 0x23f   :  { %v11954_v1 = vmax.f32 %v2174_v38, %v2263_v34  ;;  %v2265_v56 = vsel %vm158_vm3, %v2252_v62, %v2264_v48  ;;  %v2049_v26 = vpop.f32.mrb[16].mxu0  ;;  %v2513_v53 = vrot.slane %v11878_v16, 3  ;;  %2808 = vrot.lane.b32.xlu1 %v11963_v51, %s11046_s0  ;;  %v2187_v59 = vmax.f32 %v2151_v19, 0.0 }
 0x240   :  { %v11960_v43 = vmax.f32 %v2175_v58, %v2265_v56  ;;  %v2051_v13 = vpop.f32.mrb[17].mxu0  ;;  %v2274_v38 = vrot.slane %v2186_v45, 1  ;;  %v2531_v11 = vrot.slane %v11898_v6, 4  ;;  %v2543_v17 = vrot.slane %v11898_v6, 5 }
 0x241   :  { %v2555_v40 = vrot.slane %v11898_v6, 6  ;;  %v2624_v58 = vsel %vm2578_vm7, %v11878_v16, %v2489_v55  ;;  %v2156_v18 = vadd.f32 %v11869_v41, %v2049_v26  ;;  %v2157_v62 = vadd.f32 %v11884_v57, %v2051_v13 }
 0x242   :  { %v2275_v2 = vsel %vm158_vm3, %v2262_v30, %v2274_v38  ;;  %v2276_v7 = vrot.slane %v2187_v59, 1  ;;  %v2567_v49 = vrot.slane %v11898_v6, 7  ;;  %v2630_v9 = vsel %vm2585_vm8, %v2624_v58, %v2501_v20 }
 0x243   :  { %v2055_v63 = vpop.f32.mrb[18].mxu0  ;;  %v2366_v32 = vmax.f32 %v2180_v14, %v2275_v2  ;;  %v2636_v12 = vsel %vm2592_vm9, %v2630_v9, %v2513_v53  ;;  %v2192_v10 = vmax.f32 %v2156_v18, 0.0  ;;  %v2193_v34 = vmax.f32 %v2157_v62, 0.0 }
 0x244   :  { %v2057_v42 = vpop.f32.mrb[19].mxu0  ;;  %v2277_v16 = vsel %vm158_vm3, %v2264_v48, %v2276_v7  ;;  %v2642_v55 = vsel %vm215_vm0, %v2636_v12, %v2531_v11  ;;  %v2162_v56 = vadd.f32 %v11869_v41, %v2055_v63  ;;  %v2396_v58 = vrot.slane %v11940_v25, 1 }
 0x245   :  { %v2163_v30 = vadd.f32 %v11884_v57, %v2057_v42  ;;  %v2492_v54 = vrot.slane %v2366_v32, 1  ;;  %v2504_v19 = vrot.slane %v2366_v32, 2  ;;  %v2367_v6 = vmax.f32 %v2181_v36, %v2277_v16 }
 0x246   :  { %v2648_v20 = vsel %vm1279_vm6, %v2642_v55, %v2543_v17  ;;  %v2286_v26 = vrot.slane %v2192_v10, 1  ;;  %v2288_v53 = vrot.slane %v2193_v34, 1  ;;  %v2198_v13 = vmax.f32 %v2162_v56, 0.0 }
 0x247   :  { %v2654_v14 = vsel %vm870_vm5, %v2648_v20, %v2555_v40  ;;  %v2199_v11 = vmax.f32 %v2163_v30, 0.0  ;;  %v2516_v18 = vrot.slane %v2366_v32, 3  ;;  %v2627_v17 = vsel %vm2578_vm7, %v2366_v32, %v2492_v54 }
 0x248   :  { %v11987_v48 = vsel %vm158_vm3, %v2654_v14, %v2567_v49  ;;  %v2287_v41 = vsel %vm158_vm3, %v2274_v38, %v2286_v26  ;;  %v2289_v57 = vsel %vm158_vm3, %v2276_v7, %v2288_v53  ;;  %v2298_v36 = vrot.slane %v2198_v13, 1 }
 0x249   :  { %2823 = vrot.lane.b32.xlu1 %v11987_v48, %s11046_s0  ;;  %v2372_v40 = vmax.f32 %v2186_v45, %v2287_v41  ;;  %v2373_v62 = vmax.f32 %v2187_v59, %v2289_v57  ;;  %v2300_v2 = vrot.slane %v2199_v11, 1  ;;  %v2633_v9 = vsel %vm2585_vm8, %v2627_v17, %v2504_v19 }
 0x24a   :  { %v2493_v63 = vrot.slane %v2367_v6, 1  ;;  %v2299_v49 = vsel %vm158_vm3, %v2286_v26, %v2298_v36  ;;  %v2348_v12 = vsel %vm158_vm3, %v2298_v36, %v11927_v50  ;;  %v2639_v42 = vsel %vm2592_vm9, %v2633_v9, %v2516_v18 }
 0x24b   :  { %v11999_v16 = vmax.f32 %v2192_v10, %v2299_v49  ;;  %v12001_v38 = vmax.f32 %v2198_v13, %v2348_v12  ;;  %v2301_v7 = vsel %vm158_vm3, %v2288_v53, %v2300_v2  ;;  %v2349_v45 = vsel %vm158_vm3, %v2300_v2, %v11935_v0 }
 0x24c   :  { %v2379_v59 = vmax.f32 %v2193_v34, %v2301_v7  ;;  %v12008_v32 = vmax.f32 %v2199_v11, %v2349_v45  ;;  %v2534_v55 = vrot.slane %v2372_v40, 4  ;;  %v2546_v56 = vrot.slane %v2372_v40, 5 }
 0x24d   :  { %2838 = vrot.lane.b32.xlu1 %v11768_v35, %s11046_s0  ;;  %v2408_v50 = vrot.slane %v11940_v25, 2  ;;  %v2397_v10 = vrot.slane %v11950_v33, 1  ;;  %v2409_v30 = vrot.slane %v11950_v33, 2  ;;  %v2505_v54 = vrot.slane %v2367_v6, 2 }
 0x24e   :  { %v2676_v19 = vrot.slane %v2379_v59, 1  ;;  %v2558_v20 = vrot.slane %v2372_v40, 6  ;;  %v2683_v14 = vrot.slane %v11912_v44, 2  ;;  %v2695_v0 = vrot.slane %v11912_v44, 3 }
 0x24f   :  { %v2688_v26 = vrot.slane %v2379_v59, 2  ;;  %v2570_v53 = vrot.slane %v2372_v40, 7  ;;  %v2645_v34 = vsel %vm215_vm0, %v2639_v42, %v2534_v55  ;;  %v2535_v13 = vrot.slane %v2373_v62, 4 }
 0x250   :  { %v2651_v11 = vsel %vm1279_vm6, %v2645_v34, %v2546_v56  ;;  %v2517_v18 = vrot.slane %v2367_v6, 3  ;;  %v2547_v41 = vrot.slane %v2373_v62, 5  ;;  %v2628_v57 = vsel %vm2578_vm7, %v2367_v6, %v2493_v63 }
 0x251   :  { %2853 = vrot.lane.b32.xlu1 %v11799_v4, %s11046_s0  ;;  %v2718_v36 = vrot.slane %v12008_v32, 4  ;;  %v2657_v17 = vsel %vm870_vm5, %v2651_v11, %v2558_v20  ;;  %v2559_v2 = vrot.slane %v2373_v62, 6  ;;  %v2634_v9 = vsel %vm2585_vm8, %v2628_v57, %v2505_v54 }
 0x252   :  { %v12024_v40 = vsel %vm158_vm3, %v2657_v17, %v2570_v53  ;;  %v2571_v49 = vrot.slane %v2373_v62, 7  ;;  %v2640_v12 = vsel %vm2592_vm9, %v2634_v9, %v2517_v18  ;;  %v2713_v42 = vrot.slane %v11914_v47, 4 }
 0x253   :  { %v2646_v7 = vsel %vm215_vm0, %v2640_v12, %v2535_v13  ;;  %v2725_v45 = vrot.slane %v11914_v47, 5  ;;  %v2737_v6 = vrot.slane %v11914_v47, 6  ;;  %v2761_v63 = vsel %vm2578_vm7, %v11912_v44, %v2671_v5 }
 0x254   :  { %v2652_v62 = vsel %vm1279_vm6, %v2646_v7, %v2547_v41  ;;  %v2749_v55 = vrot.slane %v11914_v47, 7  ;;  %v2767_v56 = vsel %vm2585_vm8, %v2761_v63, %v2683_v14  ;;  %v2700_v54 = vrot.slane %v2379_v59, 3 }
 0x255   :  { %2868 = vrot.lane.b32.xlu1 %v12024_v40, %s11046_s0  ;;  %v2658_v20 = vsel %vm870_vm5, %v2652_v62, %v2559_v2  ;;  %v2773_v53 = vsel %vm2592_vm9, %v2767_v56, %v2695_v0  ;;  %v2730_v34 = vrot.slane %v12008_v32, 5  ;;  %v2766_v13 = vsel %vm2578_vm7, %v2379_v59, %v2676_v19 }
 0x256   :  { %v12045_v44 = vsel %vm158_vm3, %v2658_v20, %v2571_v49  ;;  %v2779_v5 = vsel %vm215_vm0, %v2773_v53, %v2713_v42  ;;  %v2742_v11 = vrot.slane %v12008_v32, 6  ;;  %v2772_v47 = vsel %vm2585_vm8, %v2766_v13, %v2688_v26 }
 0x257   :  { %2883 = vrot.lane.b32.xlu0 %v12045_v44, %s11046_s0  ;;  %v2785_v14 = vsel %vm1279_vm6, %v2779_v5, %v2725_v45  ;;  %v2778_v0 = vsel %vm2592_vm9, %v2772_v47, %v2700_v54  ;;  %v2417_v18 = vrot.slane %v11855_v60, 3  ;;  %v2435_v59 = vrot.slane %v11863_v23, 4 }
 0x258   :  { %v2791_v19 = vsel %vm870_vm5, %v2785_v14, %v2737_v6  ;;  %v2784_v41 = vsel %vm215_vm0, %v2778_v0, %v2718_v36  ;;  %v2447_v57 = vrot.slane %v11863_v23, 5  ;;  %v2580_v26 = vsel %vm2578_vm7, %v11855_v60, %v2393_v37 }
 0x259   :  { %v12064_v17 = vsel %vm158_vm3, %v2791_v19, %v2749_v55  ;;  %v2754_v2 = vrot.slane %v12008_v32, 7  ;;  %v2790_v9 = vsel %vm1279_vm6, %v2784_v41, %v2730_v34  ;;  %v2587_v49 = vsel %vm2585_vm8, %v2580_v26, %v2405_v28 }
 0x25a   :  { %v2675_v36 = vrot.slane %v11999_v16, 1  ;;  %2810 = vrot.lane.b32.xlu1 %v12064_v17, %s11046_s0  ;;  %v2796_v12 = vsel %vm870_vm5, %v2790_v9, %v2742_v11  ;;  %v2459_v37 = vrot.slane %v11863_v23, 6  ;;  %v2594_v42 = vsel %vm2592_vm9, %v2587_v49, %v2417_v18 }
 0x25b   :  { %v12078_v7 = vsel %vm158_vm3, %v2796_v12, %v2754_v2  ;;  %v2471_v32 = vrot.slane %v11863_v23, 7  ;;  %v2600_v60 = vsel %vm215_vm0, %v2594_v42, %v2435_v59  ;;  %v2438_v28 = vrot.slane %v11954_v1, 4 }
 0x25c   :  { %2885 = vrot.lane.b32.xlu0 %v12078_v7, %s11046_s0  ;;  %v2606_v45 = vsel %vm1279_vm6, %v2600_v60, %v2447_v57  ;;  %v2420_v6 = vrot.slane %v11940_v25, 3  ;;  %v2450_v63 = vrot.slane %v11954_v1, 5  ;;  %v2583_v62 = vsel %vm2578_vm7, %v11940_v25, %v2396_v58 }
 0x25d   :  { %v2612_v23 = vsel %vm870_vm5, %v2606_v45, %v2459_v37  ;;  %v2590_v55 = vsel %vm2585_vm8, %v2583_v62, %v2408_v50  ;;  %v2421_v56 = vrot.slane %v11950_v33, 3  ;;  %v2439_v54 = vrot.slane %v11960_v43, 4 }
 0x25e   :  { %v12099_v20 = vsel %vm158_vm3, %v2612_v23, %v2471_v32  ;;  %v2597_v53 = vsel %vm2592_vm9, %v2590_v55, %v2420_v6  ;;  %v2451_v34 = vrot.slane %v11960_v43, 5  ;;  %v2584_v58 = vsel %vm2578_vm7, %v11950_v33, %v2397_v10 }
 0x25f   :  { %v2462_v25 = vrot.slane %v11954_v1, 6  ;;  %v2603_v50 = vsel %vm215_vm0, %v2597_v53, %v2438_v28  ;;  %v2591_v13 = vsel %vm2585_vm8, %v2584_v58, %v2409_v30  ;;  %v2684_v5 = vrot.slane %v11919_v31, 2  ;;  %v3104_v58 = vld [vmem:[#allocation7 + $0x20] sm:$0xff] }
 0x260   :  { %v2687_v11 = vrot.slane %v11999_v16, 2  ;;  %2821 = vrot.lane.b32.xlu0 %v12099_v20, %s11046_s0  ;;  %v2474_v47 = vrot.slane %v11954_v1, 7  ;;  %v2609_v14 = vsel %vm1279_vm6, %v2603_v50, %v2450_v63  ;;  %v2598_v10 = vsel %vm2592_vm9, %v2591_v13, %v2421_v56 }
 0x261   :  { %v2615_v0 = vsel %vm870_vm5, %v2609_v14, %v2462_v25  ;;  %v2463_v18 = vrot.slane %v11960_v43, 6  ;;  %v2475_v33 = vrot.slane %v11960_v43, 7  ;;  %v2604_v30 = vsel %vm215_vm0, %v2598_v10, %v2439_v54  ;;  %v3105_v25 = vld [vmem:[#allocation7 + $0x28] sm:$0xff] }
 0x262   :  { %v12124_v59 = vsel %vm158_vm3, %v2615_v0, %v2474_v47  ;;  %v2610_v19 = vsel %vm1279_vm6, %v2604_v30, %v2451_v34  ;;  %v2696_v41 = vrot.slane %v11919_v31, 3  ;;  %v2762_v1 = vsel %vm2578_vm7, %v11919_v31, %v2672_v27  ;;  %v3107_v47 = vld [vmem:[#allocation7 + $0x38] sm:$0xff]  ;;  %v3019_v0 = vld [vmem:[#allocation7] sm:$0xff] }
 0x263   :  { %v2616_v57 = vsel %vm870_vm5, %v2610_v19, %v2463_v18  ;;  %v2714_v26 = vrot.slane %v11921_v52, 4  ;;  %v2726_v43 = vrot.slane %v11921_v52, 5  ;;  %v2768_v2 = vsel %vm2585_vm8, %v2762_v1, %v2684_v5  ;;  %v3020_v18 = vld [vmem:[#allocation7 + $0x8] sm:$0xff] }
 0x264   :  { %2836 = vrot.lane.b32.xlu0 %v11782_v29, %s11046_s0  ;;  %v12139_v9 = vsel %vm158_vm3, %v2616_v57, %v2475_v33  ;;  %v2774_v49 = vsel %vm2592_vm9, %v2768_v2, %v2696_v41  ;;  %v2699_v12 = vrot.slane %v11999_v16, 3  ;;  %v2765_v31 = vsel %vm2578_vm7, %v11999_v16, %v2675_v36 }
 0x265   :  { %v2717_v27 = vrot.slane %v12001_v38, 4  ;;  %v2738_v37 = vrot.slane %v11921_v52, 6  ;;  %v2780_v42 = vsel %vm215_vm0, %v2774_v49, %v2714_v26  ;;  %v2771_v32 = vsel %vm2585_vm8, %v2765_v31, %v2687_v11  ;;  %v3106_v11 = vld [vmem:[#allocation7 + $0x30] sm:$0xff] }
 0x266   :  { %v2750_v60 = vrot.slane %v11921_v52, 7  ;;  %v2786_v28 = vsel %vm1279_vm6, %v2780_v42, %v2726_v43  ;;  %v2729_v45 = vrot.slane %v12001_v38, 5  ;;  %v2777_v6 = vsel %vm2592_vm9, %v2771_v32, %v2699_v12 }
 0x267   :  { %v2792_v63 = vsel %vm870_vm5, %v2786_v28, %v2738_v37  ;;  %v2741_v16 = vrot.slane %v12001_v38, 6  ;;  %v2783_v36 = vsel %vm215_vm0, %v2777_v6, %v2717_v27  ;;  %v2753_v52 = vrot.slane %v12001_v38, 7 }
 0x268   :  { %2851 = vrot.lane.b32.xlu0 %v11812_v3, %s11046_s0  ;;  %v12159_v62 = vsel %vm158_vm3, %v2792_v63, %v2750_v60  ;;  %v2789_v23 = vsel %vm1279_vm6, %v2783_v36, %v2729_v45  ;;  %v9758_v50 = vpack.c.bf16 %v3105_v25, %v3104_v58  ;;  %v9762_v14 = vpack.c.bf16 %v3107_v47, %v3106_v11 }
 0x269   :  { %v2795_v55 = vsel %vm870_vm5, %v2789_v23, %v2741_v16  ;;  %v12176_v30 = vpack.c.bf16 %v3020_v18, %v3019_v0  ;;  %v3021_v0 = vld [vmem:[#allocation7 + $0x10] sm:$0xff]  ;;  %v3022_v18 = vld [vmem:[#allocation7 + $0x18] sm:$0xff] }
 0x26a   :  { %v12165_v56 = vsel %vm158_vm3, %v2795_v55, %v2753_v52  ;;  %9858 = vmatprep.subr.bf16.mxu1 %v9758_v50  ;;  %9759 = vmatprep.subr.bf16.mxu0 %v9758_v50 }
 0x26b   :  { %9860 = vmatpush3.bf16.msra.mxu1 %v9758_v50  ;;  %9761 = vmatpush3.bf16.msra.mxu0 %v9758_v50 }
 0x26c   :  { %2866 = vrot.lane.b32.xlu0 %v12124_v59, %s11046_s0  ;;  %9859 = vmatprep.subr.bf16.mxu1 %v9762_v14 }
 0x26d   :  { %9763 = vmatprep.subr.bf16.mxu0 %v9762_v14 }
 0x26f   :  { %9861 = vmatpush3.bf16.msra.mxu1 %v9762_v14  ;;  %9765 = vmatpush3.bf16.msra.mxu0 %v9762_v14 }
 0x270   :  { %2881 = vrot.lane.b32.xlu0 %v12139_v9, %s11046_s0  ;;  %9767 = vmatprep.subr.bf16.mxu1 %v12176_v30 }
 0x274   :  { %2825 = vrot.lane.b32.xlu0 %v12159_v62, %s11046_s0 }
 0x2a3   :  { %v2807_v54 = vpop.permute.xlu1 %2806 }
 0x2a4   :  { %v12188_v57 = vmax.f32 %v11901_v61, %v2807_v54 }
 0x2a6   :  { %v12213_v31 = vrot.slane %v12188_v57, 4 }
 0x2b1   :  { %v2809_v53 = vpop.permute.xlu1 %2808 }
 0x2b2   :  { %v12179_v19 = vmax.f32 %v11963_v51, %v2809_v53 }
 0x2b4   :  { %v2896_v26 = vrot.slane %v12179_v19, 4 }
 0x2bb   :  { %v2824_v34 = vpop.permute.xlu1 %2823 }
 0x2bc   :  { %v12218_v27 = vmax.f32 %v11987_v48, %v2824_v34 }
 0x2be   :  { %v2906_v60 = vrot.slane %v12218_v27, 4 }
 0x2bf   :  { %v2839_v38 = vpop.permute.xlu1 %2838 }
 0x2c0   :  { %v12233_v48 = vmax.f32 %v11768_v35, %v2839_v38 }
 0x2c2   :  { %v2916_v63 = vrot.slane %v12233_v48, 4 }
 0x2c3   :  { %v2854_v13 = vpop.permute.xlu1 %2853 }
 0x2c4   :  { %v12248_v35 = vmax.f32 %v11799_v4, %v2854_v13 }
 0x2c6   :  { %v2926_v4 = vrot.slane %v12248_v35, 4 }
 0x2c7   :  { %v2869_v5 = vpop.permute.xlu1 %2868 }
 0x2c8   :  { %v12265_v23 = vmax.f32 %v12024_v40, %v2869_v5 }
 0x2c9   :  { %v2884_v10 = vpop.permute.xlu0 %2883 }
 0x2ca   :  { %v12174_v33 = vmax.f32 %v12045_v44, %v2884_v10  ;;  %v2936_v40 = vrot.slane %v12265_v23, 4 }
 0x2cc   :  { %v2811_v41 = vpop.permute.xlu1 %2810  ;;  %3010 = vrot.lane.b32.xlu1 %v12174_v33, %s11047_s29  ;;  %v2946_v2 = vrot.slane %v12174_v33, 4 }
 0x2cd   :  { %v12185_v1 = vmax.f32 %v12064_v17, %v2811_v41 }
 0x2ce   :  { %v2886_v44 = vpop.permute.xlu0 %2885 }
 0x2cf   :  { %v2954_v51 = vrot.slane %v12185_v1, 4  ;;  %v12193_v43 = vmax.f32 %v12078_v7, %v2886_v44 }
 0x2d0   :  { %2840 = vrot.lane.b32.xlu1 %v11821_v46, %s11046_s0 }
 0x2d1   :  { %v12201_v17 = vsel %vm215_vm0, %v2896_v26, %v2954_v51  ;;  %v3007_v61 = vrot.slane %v12193_v43, 4  ;;  %3012 = vrot.lane.b32.xlu0 %v12193_v43, %s11047_s29  ;;  %v9770_v43 = vpack.c.bf16 %v3022_v18, %v3021_v0 }
 0x2d2   :  { %v2822_v49 = vpop.permute.xlu0 %2821 }
 0x2d3   :  { %v12207_v12 = vsel %vm215_vm0, %v2946_v2, %v3007_v61  ;;  %v12210_v7 = vmax.f32 %v12099_v20, %v2822_v49  ;;  %v2897_v20 = vsel %vm215_vm0, %v12213_v31, %v2896_v26 }
 0x2d4   :  { %2855 = vrot.lane.b32.xlu1 %v11827_v15, %s11046_s0  ;;  %v13916_v47 = vrot.slane %v12207_v12, 4 }
 0x2d5   :  { %2898 = vrot.lane.b32.xlu0 %v12213_v31, %s11047_s29  ;;  %v12223_v42 = vrot.slane %v12210_v7, 4 }
 0x2d6   :  { %v2837_v37 = vpop.permute.xlu0 %2836 }
 0x2d7   :  { %v12228_v32 = vmax.f32 %v11782_v29, %v2837_v37  ;;  %v2907_v6 = vsel %vm215_vm0, %v12223_v42, %v2906_v60 }
 0x2d8   :  { %2900 = vrot.lane.b32.xlu1 %v2897_v20, %s11047_s29 }
 0x2d9   :  { %2870 = vrot.lane.b32.xlu0 %v12165_v56, %s11046_s0  ;;  %v12238_v45 = vrot.slane %v12228_v32, 4 }
 0x2da   :  { %v2852_v28 = vpop.permute.xlu0 %2851 }
 0x2db   :  { %v12243_v29 = vmax.f32 %v11812_v3, %v2852_v28  ;;  %v2917_v3 = vsel %vm215_vm0, %v12238_v45, %v2916_v63  ;;  %v3812_v28 = vld [vmem:[#allocation7 + $0x48] sm:$0xff] }
 0x2dc   :  { %2910 = vrot.lane.b32.xlu1 %v2907_v6, %s11047_s29 }
 0x2dd   :  { %2908 = vrot.lane.b32.xlu0 %v12223_v42, %s11047_s29  ;;  %v12253_v36 = vrot.slane %v12243_v29, 4 }
 0x2de   :  { %v2867_v16 = vpop.permute.xlu0 %2866 }
 0x2df   :  { %v12260_v52 = vmax.f32 %v12124_v59, %v2867_v16  ;;  %v2927_v59 = vsel %vm215_vm0, %v12253_v36, %v2926_v4 }
 0x2e0   :  { %2920 = vrot.lane.b32.xlu1 %v2917_v3, %s11047_s29 }
 0x2e1   :  { %2918 = vrot.lane.b32.xlu0 %v12238_v45, %s11047_s29  ;;  %v12270_v54 = vrot.slane %v12260_v52, 4 }
 0x2e2   :  { %v2882_v55 = vpop.permute.xlu0 %2881 }
 0x2e3   :  { %v12277_v53 = vmax.f32 %v12139_v9, %v2882_v55  ;;  %v2937_v58 = vsel %vm215_vm0, %v12270_v54, %v2936_v40 }
 0x2e4   :  { %2930 = vrot.lane.b32.xlu1 %v2927_v59, %s11047_s29 }
 0x2e5   :  { %2928 = vrot.lane.b32.xlu0 %v12253_v36, %s11047_s29  ;;  %v12284_v38 = vrot.slane %v12277_v53, 4 }
 0x2e6   :  { %v2826_v34 = vpop.permute.xlu0 %2825 }
 0x2e7   :  { %v12291_v25 = vmax.f32 %v12159_v62, %v2826_v34  ;;  %v2947_v13 = vsel %vm215_vm0, %v12284_v38, %v2946_v2  ;;  %v3813_v34 = vld [vmem:[#allocation7 + $0x50] sm:$0xff] }
 0x2e8   :  { %2940 = vrot.lane.b32.xlu1 %v2937_v58, %s11047_s29  ;;  %v3814_v58 = vld [vmem:[#allocation7 + $0x58] sm:$0xff] }
 0x2e9   :  { %v2963_v9 = vrot.slane %v12291_v25, 4  ;;  %2938 = vrot.lane.b32.xlu0 %v12270_v54, %s11047_s29 }
 0x2eb   :  { %v12300_v50 = vsel %vm215_vm0, %v2906_v60, %v2963_v9  ;;  %v3811_v60 = vld [vmem:[#allocation7 + $0x40] sm:$0xff] }
 0x2ec   :  { %2950 = vrot.lane.b32.xlu1 %v2947_v13, %s11047_s29  ;;  %v9774_v59 = vpack.c.bf16 %v3812_v28, %v3811_v60 }
 0x2ed   :  { %2948 = vrot.lane.b32.xlu0 %v12284_v38, %s11047_s29 }
 0x2f0   :  { %2959 = vrot.lane.b32.xlu1 %v12185_v1, %s11047_s29 }
 0x2f1   :  { %2957 = vrot.lane.b32.xlu0 %v12179_v19, %s11047_s29 }
 0x2f4   :  { %2968 = vrot.lane.b32.xlu1 %v12291_v25, %s11047_s29 }
 0x2f5   :  { %2966 = vrot.lane.b32.xlu0 %v12218_v27, %s11047_s29 }
 0x2f9   :  { %2983 = vrot.lane.b32.xlu0 %v12233_v48, %s11047_s29 }
 0x2fd   :  { %2992 = vrot.lane.b32.xlu0 %v12248_v35, %s11047_s29 }
 0x301   :  { %3001 = vrot.lane.b32.xlu0 %v12265_v23, %s11047_s29 }
 0x33e   :  { %v3011_v62 = vpop.permute.xlu1 %3010 }
 0x33f   :  { %v12322_v5 = vsel %vm215_vm0, %v3007_v61, %v3011_v62 }
 0x340   :  { %v3095_v11 = vrot.slane %v12322_v5, 4 }
 0x342   :  { %v2841_v14 = vpop.permute.xlu1 %2840  ;;  %v3096_v10 = vsel %vm215_vm0, %v13916_v47, %v3095_v11 }
 0x343   :  { %v12330_v41 = vmax.f32 %v11821_v46, %v2841_v14  ;;  %9416 = vmatprep.mubr.msk.f32.mxu1 %vm3108_vm10, %v3096_v10  ;;  %v12333_v44 = vpop.permute.xlu0 %3012 }
 0x344   :  { %v3097_v26 = vrot.slane %v12333_v44, 4 }
 0x345   :  { %2985 = vrot.lane.b32.xlu1 %v12330_v41, %s11047_s29 }
 0x346   :  { %v2856_v2 = vpop.permute.xlu1 %2855  ;;  %v3098_v61 = vsel %vm215_vm0, %v3095_v11, %v3097_v26  ;;  %v3102_v49 = vsel %vm215_vm0, %v3097_v26, %v12213_v31 }
 0x347   :  { %v12342_v37 = vmax.f32 %v11827_v15, %v2856_v2  ;;  %9417 = vmatmul.mubr.msk.f32.vlgmr.msra.gmra.mrb[16].mxu1 %vm3108_vm10, %v3098_v61  ;;  %v2899_v46 = vpop.permute.xlu0 %2898  ;;  %v4237_v2 = vld [vmem:[#allocation7 + $0x68] sm:$0xff] }
 0x348   :  { %v12347_v20 = vsel %vm215_vm0, %v12179_v19, %v2899_v46  ;;  %9419 = vmatprep.mubr.msk.f32.mxu1 %vm3108_vm10, %v3102_v49  ;;  %9769 = vmatpush3.bf16.msra.mxu1 %v12176_v30 }
 0x349   :  { %2994 = vrot.lane.b32.xlu1 %v12342_v37, %s11047_s29  ;;  %v3035_v6 = vrot.slane %v12347_v20, 4  ;;  %9771 = vmatprep.subr.bf16.mxu1 %v9770_v43  ;;  %v13913_v15 = vrot.slane %v12347_v20, 1  ;;  %v13890_v13 = vrot.slane %v12347_v20, 5 }
 0x34a   :  { %v12355_v16 = vpop.permute.xlu1 %2900 }
 0x34b   :  { %v3036_v3 = vrot.slane %v12355_v16, 4  ;;  %v13908_v19 = vrot.slane %v12355_v16, 1  ;;  %v2871_v55 = vpop.permute.xlu0 %2870  ;;  %v3100_v30 = vsel %vm215_vm0, %v12213_v31, %v3035_v6  ;;  %v13893_v62 = vrot.slane %v12355_v16, 5 }
 0x34c   :  { %v12364_v11 = vmax.f32 %v12165_v56, %v2871_v55  ;;  %9420 = vmatmul.mubr.msk.f32.gmra.mrb[18].mxu1 %vm3108_vm10, %v3100_v30  ;;  %v9778_v56 = vpack.c.bf16 %v3814_v58, %v3813_v34 }
 0x34d   :  { %v3037_v14 = vsel %vm215_vm0, %v3035_v6, %v3036_v3  ;;  %v3038_v10 = vsel %vm215_vm0, %v3036_v3, %v12223_v42  ;;  %9773 = vmatpush3.bf16.msra.mxu1 %v9770_v43  ;;  %9430 = vmatprep.mubr.msk.f32.mxu1 %vm3108_vm10, %v12188_v57  ;;  %v12382_v0 = vsel %vm158_vm3, %v13913_v15, %v13908_v19  ;;  %v4236_v43 = vld [vmem:[#allocation7 + $0x60] sm:$0xff] }
 0x34e   :  { %v12372_v31 = vpop.permute.xlu1 %2910  ;;  %9368 = vmatprep.mubr.msk.f32.mxu0 %vm3108_vm10, %v3037_v14  ;;  %3003 = vrot.lane.b32.xlu1 %v12364_v11, %s11047_s29  ;;  %v12396_v61 = vsel %vm2592_vm9, %v13890_v13, %v13893_v62  ;;  %v12407_v3 = vpack.c.bf16 %v4237_v2, %v4236_v43 }
 0x34f   :  { %9369 = vmatmul.mubr.msk.f32.vlgmr.msra.gmra.mrb[24].mxu0 %vm3108_vm10, %v3038_v10  ;;  %v2909_v18 = vpop.permute.xlu0 %2908  ;;  %9775 = vmatprep.subr.bf16.mxu1 %v9774_v59  ;;  %v3041_v49 = vrot.slane %v12372_v31, 4  ;;  %v13902_v55 = vrot.slane %v12372_v31, 1 }
 0x350   :  { %v12387_v26 = vsel %vm215_vm0, %v12218_v27, %v2909_v18  ;;  %9431 = vmatmul.mubr.msk.f32.vlgmr.msra.gmra.mrb[20].mxu1 %vm3108_vm10, %v12347_v20 }
 0x351   :  { %v3039_v46 = vrot.slane %v12387_v26, 4  ;;  %9433 = vmatprep.mubr.msk.f32.mxu1 %vm3108_vm10, %v12355_v16  ;;  %9777 = vmatpush3.bf16.msra.mxu1 %v9774_v59  ;;  %v13903_v27 = vrot.slane %v12387_v26, 1  ;;  %v13892_v14 = vrot.slane %v12387_v26, 5 }
 0x352   :  { %v12403_v60 = vpop.permute.xlu1 %2920  ;;  %9779 = vmatprep.subr.bf16.mxu1 %v9778_v56 }
 0x353   :  { %v2919_v28 = vpop.permute.xlu0 %2918  ;;  %v3040_v6 = vsel %vm215_vm0, %v12223_v42, %v3039_v46  ;;  %v3042_v59 = vsel %vm215_vm0, %v3039_v46, %v3041_v49  ;;  %v3043_v42 = vsel %vm215_vm0, %v3041_v49, %v12238_v45  ;;  %v13894_v10 = vrot.slane %v12403_v60, 1 }
 0x354   :  { %v12412_v30 = vsel %vm215_vm0, %v12233_v48, %v2919_v28  ;;  %9371 = vmatprep.mubr.msk.f32.mxu0 %vm3108_vm10, %v3040_v6  ;;  %9434 = vmatmul.mubr.msk.f32.gmra.mrb[22].mxu1 %vm3108_vm10, %v12210_v7  ;;  %v12435_v43 = vsel %vm158_vm3, %v13903_v27, %v13902_v55  ;;  %v3046_v2 = vrot.slane %v12403_v60, 4  ;;  %v13891_v28 = vrot.slane %v12372_v31, 5 }
 0x355   :  { %v3044_v34 = vrot.slane %v12412_v30, 4  ;;  %v13897_v58 = vrot.slane %v12412_v30, 1  ;;  %9372 = vmatmul.mubr.msk.f32.gmra.mrb[26].mxu0 %vm3108_vm10, %v3042_v59  ;;  %9436 = vmatprep.mubr.msk.f32.mxu1 %vm3108_vm10, %v12387_v26  ;;  %v13898_v39 = vrot.slane %v12403_v60, 5 }
 0x356   :  { %v12427_v18 = vpop.permute.xlu1 %2930  ;;  %9374 = vmatprep.mubr.msk.f32.mxu0 %vm3108_vm10, %v3043_v42  ;;  %9781 = vmatpush3.bf16.msra.mxu1 %v9778_v56  ;;  %v12471_v8 = vsel %vm2592_vm9, %v13892_v14, %v13891_v28 }
 0x357   :  { %v2929_v46 = vpop.permute.xlu0 %2928  ;;  %v3045_v49 = vsel %vm215_vm0, %v12238_v45, %v3044_v34  ;;  %9783 = vmatprep.subr.bf16.mxu1 %v12407_v3  ;;  %v12453_v6 = vsel %vm158_vm3, %v13897_v58, %v13894_v10  ;;  %v3047_v42 = vsel %vm215_vm0, %v3044_v34, %v3046_v2  ;;  %v13895_v22 = vrot.slane %v12427_v18, 1 }
 0x358   :  { %v12444_v56 = vsel %vm215_vm0, %v12248_v35, %v2929_v46  ;;  %9437 = vmatmul.mubr.msk.f32.gmra.mrb[24].mxu1 %vm3108_vm10, %v12372_v31  ;;  %v13899_v46 = vrot.slane %v12412_v30, 5  ;;  %v3051_v28 = vrot.slane %v12427_v18, 4 }
 0x359   :  { %v3049_v45 = vrot.slane %v12444_v56, 4  ;;  %v13896_v59 = vrot.slane %v12444_v56, 1  ;;  %9375 = vmatmul.mubr.msk.f32.gmra.mrb[28].mxu0 %vm3108_vm10, %v3045_v49  ;;  %9439 = vmatprep.mubr.msk.f32.mxu1 %vm3108_vm10, %v12228_v32 }
 0x35a   :  { %v12463_v24 = vpop.permute.xlu1 %2940  ;;  %9377 = vmatprep.mubr.msk.f32.mxu0 %vm3108_vm10, %v3047_v42  ;;  %v3048_v42 = vsel %vm215_vm0, %v3046_v2, %v12253_v36  ;;  %v13905_v2 = vrot.slane %v12444_v56, 5 }
 0x35b   :  { %v2939_v49 = vpop.permute.xlu0 %2938  ;;  %v12487_v13 = vsel %vm158_vm3, %v13896_v59, %v13895_v22  ;;  %v13900_v62 = vrot.slane %v12463_v24, 1  ;;  %v13904_v22 = vrot.slane %v12427_v18, 5  ;;  %v13909_v27 = vrot.slane %v12463_v24, 5 }
 0x35c   :  { %v12476_v34 = vsel %vm215_vm0, %v12265_v23, %v2939_v49  ;;  %9440 = vmatmul.mubr.msk.f32.gmra.mrb[26].mxu1 %vm3108_vm10, %v12412_v30  ;;  %v3050_v49 = vsel %vm215_vm0, %v12253_v36, %v3049_v45 }
 0x35d   :  { %v13901_v14 = vrot.slane %v12476_v34, 1  ;;  %9378 = vmatmul.mubr.msk.f32.gmra.mrb[30].mxu0 %vm3108_vm10, %v3048_v42  ;;  %9442 = vmatprep.mubr.msk.f32.mxu1 %vm3108_vm10, %v12403_v60  ;;  %v12506_v42 = vsel %vm2592_vm9, %v13899_v46, %v13898_v39  ;;  %v3054_v36 = vrot.slane %v12476_v34, 4 }
 0x35e   :  { %v12498_v10 = vpop.permute.xlu1 %2950  ;;  %9380 = vmatprep.mubr.msk.f32.mxu0 %vm3108_vm10, %v3050_v49  ;;  %v3052_v49 = vsel %vm215_vm0, %v3049_v45, %v3051_v28 }
 0x35f   :  { %v2949_v59 = vpop.permute.xlu0 %2948  ;;  %v12522_v39 = vsel %vm158_vm3, %v13901_v14, %v13900_v62  ;;  %v13906_v45 = vrot.slane %v12498_v10, 1  ;;  %v12538_v62 = vsel %vm2592_vm9, %v13905_v2, %v13904_v22  ;;  %v3056_v14 = vrot.slane %v12463_v24, 4 }
 0x360   :  { %v12512_v58 = vsel %vm215_vm0, %v12174_v33, %v2949_v59  ;;  %9443 = vmatmul.mubr.msk.f32.gmra.mrb[28].mxu1 %vm3108_vm10, %v12243_v29  ;;  %v3053_v33 = vsel %vm215_vm0, %v3051_v28, %v12270_v54  ;;  %v13910_v59 = vrot.slane %v12476_v34, 5  ;;  %v3055_v22 = vsel %vm215_vm0, %v12270_v54, %v3054_v36 }
 0x361   :  { %v13907_v46 = vrot.slane %v12512_v58, 1  ;;  %9381 = vmatmul.mubr.msk.f32.gmra.mrb[32].mxu0 %vm3108_vm10, %v3052_v49  ;;  %9445 = vmatprep.mubr.msk.f32.mxu1 %vm3108_vm10, %v12444_v56  ;;  %v2980_v49 = vrot.slane %v12330_v41, 4  ;;  %v3059_v2 = vrot.slane %v12512_v58, 4  ;;  %v13915_v54 = vrot.slane %v12512_v58, 5 }
 0x362   :  { %9383 = vmatprep.mubr.msk.f32.mxu0 %vm3108_vm10, %v3053_v33  ;;  %v12542_v55 = vpop.permute.xlu1 %2959 }
 0x363   :  { %v2958_v28 = vpop.permute.xlu0 %2957  ;;  %v12559_v41 = vsel %vm158_vm3, %v13907_v46, %v13906_v45  ;;  %v12575_v45 = vsel %vm2592_vm9, %v13910_v59, %v13909_v27  ;;  %v3060_v27 = vsel %vm215_vm0, %v12284_v38, %v3059_v2  ;;  %v13917_v59 = vrot.slane %v12542_v55, 5 }
 0x364   :  { %v12548_v33 = vsel %vm215_vm0, %v2954_v51, %v2958_v28  ;;  %9446 = vmatmul.mubr.msk.f32.gmra.mrb[30].mxu1 %vm3108_vm10, %v12427_v18  ;;  %v3057_v51 = vsel %vm215_vm0, %v3054_v36, %v3056_v14  ;;  %v13911_v28 = vrot.slane %v12542_v55, 1  ;;  %v13914_v36 = vrot.slane %v12498_v10, 5 }
 0x365   :  { %v13912_v1 = vrot.slane %v12548_v33, 1  ;;  %9384 = vmatmul.mubr.msk.f32.gmra.mrb[34].mxu0 %vm3108_vm10, %v3055_v22  ;;  %9448 = vmatprep.mubr.msk.f32.mxu1 %vm3108_vm10, %v12260_v52  ;;  %v12580_v22 = vsel %vm215_vm0, %v2916_v63, %v2980_v49  ;;  %v13919_v19 = vrot.slane %v12548_v33, 5  ;;  %v3061_v63 = vrot.slane %v12498_v10, 4 }
 0x366   :  { %9386 = vmatprep.mubr.msk.f32.mxu0 %vm3108_vm10, %v3057_v51  ;;  %v3058_v51 = vsel %vm215_vm0, %v3056_v14, %v12284_v38  ;;  %v12608_v14 = vsel %vm2592_vm9, %v13915_v54, %v13914_v36  ;;  %v3065_v15 = vrot.slane %v12548_v33, 4 }
 0x367   :  { %v2967_v46 = vpop.permute.xlu0 %2966  ;;  %v12593_v48 = vsel %vm158_vm3, %v13912_v1, %v13911_v28  ;;  %v13920_v1 = vrot.slane %v12580_v22, 1  ;;  %v12624_v36 = vsel %vm2592_vm9, %v13919_v19, %v13917_v59  ;;  %v3067_v59 = vrot.slane %v12542_v55, 4 }
 0x368   :  { %9449 = vmatmul.mubr.msk.f32.gmra.mrb[32].mxu1 %vm3108_vm10, %v12476_v34 }
 0x369   :  { %9387 = vmatmul.mubr.msk.f32.gmra.mrb[36].mxu0 %vm3108_vm10, %v3058_v51  ;;  %9451 = vmatprep.mubr.msk.f32.mxu1 %vm3108_vm10, %v12463_v24  ;;  %v3063_v51 = vrot.slane %v12201_v17, 4 }
 0x36a   :  { %9389 = vmatprep.mubr.msk.f32.mxu0 %vm3108_vm10, %v3060_v27  ;;  %v3062_v27 = vsel %vm215_vm0, %v3059_v2, %v3061_v63  ;;  %v13918_v2 = vrot.slane %v12580_v22, 5 }
 0x36b   :  { %v2984_v28 = vpop.permute.xlu0 %2983  ;;  %v3066_v25 = vsel %vm215_vm0, %v3063_v51, %v3065_v15 }
 0x36c   :  { %v12614_v38 = vsel %vm215_vm0, %v2980_v49, %v2984_v28  ;;  %9452 = vmatmul.mubr.msk.f32.gmra.mrb[34].mxu1 %vm3108_vm10, %v12277_v53  ;;  %v3064_v49 = vsel %vm215_vm0, %v3061_v63, %v3063_v51  ;;  %v12636_v28 = vsel %vm215_vm0, %v2963_v9, %v2967_v46  ;;  %v3068_v46 = vsel %vm215_vm0, %v3065_v15, %v3067_v59 }
 0x36d   :  { %v3785_v54 = vrot.slane %v12614_v38, 1  ;;  %v4208_v47 = vrot.slane %v12614_v38, 5  ;;  %9390 = vmatmul.mubr.msk.f32.gmra.mrb[38].mxu0 %vm3108_vm10, %v3062_v27  ;;  %9454 = vmatprep.mubr.msk.f32.mxu1 %vm3108_vm10, %v12512_v58  ;;  %v3071_v9 = vrot.slane %v12636_v28, 4 }
 0x36e   :  { %9392 = vmatprep.mubr.msk.f32.mxu0 %vm3108_vm10, %v3064_v49  ;;  %v12658_v49 = vpop.permute.xlu1 %2968 }
 0x36f   :  { %v12643_v27 = vsel %vm158_vm3, %v13920_v1, %v3785_v54  ;;  %v12648_v63 = vsel %vm2592_vm9, %v13918_v2, %v4208_v47  ;;  %v3069_v2 = vrot.slane %v12300_v50, 4  ;;  %v3073_v19 = vrot.slane %v12658_v49, 4 }
 0x370   :  { %13939 = vst [vmem:[#allocation21_spill] sm:$0xff] %v12648_v63  ;;  %9455 = vmatmul.mubr.msk.f32.gmra.mrb[36].mxu1 %vm3108_vm10, %v12498_v10 }
 0x371   :  { %9393 = vmatmul.mubr.msk.f32.gmra.mrb[40].mxu0 %vm3108_vm10, %v3066_v25  ;;  %9457 = vmatprep.mubr.msk.f32.mxu1 %vm3108_vm10, %v12201_v17  ;;  %v3070_v51 = vsel %vm215_vm0, %v3067_v59, %v3069_v2  ;;  %v3072_v15 = vsel %vm215_vm0, %v3069_v2, %v3071_v9  ;;  %v3075_v25 = vrot.slane %v12580_v22, 4  ;;  %v3074_v59 = vsel %vm215_vm0, %v3071_v9, %v3073_v19 }
 0x372   :  { %9395 = vmatprep.mubr.msk.f32.mxu0 %vm3108_vm10, %v3068_v46  ;;  %v3077_v46 = vrot.slane %v12614_v38, 4  ;;  %v2989_v9 = vrot.slane %v12342_v37, 4 }
 0x374   :  { %9458 = vmatmul.mubr.msk.f32.gmra.mrb[38].mxu1 %vm3108_vm10, %v12548_v33  ;;  %v3078_v2 = vsel %vm215_vm0, %v3075_v25, %v3077_v46 }
 0x375   :  { %9396 = vmatmul.mubr.msk.f32.gmra.mrb[42].mxu0 %vm3108_vm10, %v3070_v51  ;;  %9460 = vmatprep.mubr.msk.f32.mxu1 %vm3108_vm10, %v12542_v55  ;;  %v3076_v51 = vsel %vm215_vm0, %v3073_v19, %v3075_v25  ;;  %v12693_v19 = vsel %vm215_vm0, %v2926_v4, %v2989_v9  ;;  %v2998_v25 = vrot.slane %v12364_v11, 4 }
 0x376   :  { %9398 = vmatprep.mubr.msk.f32.mxu0 %vm3108_vm10, %v3072_v15  ;;  %v2993_v15 = vpop.permute.xlu0 %2992 }
 0x377   :  { %v12725_v21 = vsel %vm215_vm0, %v2936_v40, %v2998_v25 }
 0x378   :  { %9461 = vmatmul.mubr.msk.f32.gmra.mrb[40].mxu1 %vm3108_vm10, %v12300_v50  ;;  %v3087_v23 = vrot.slane %v12725_v21, 4 }
 0x379   :  { %9399 = vmatmul.mubr.msk.f32.gmra.mrb[44].mxu0 %vm3108_vm10, %v3074_v59  ;;  %9463 = vmatprep.mubr.msk.f32.mxu1 %vm3108_vm10, %v12636_v28  ;;  %v12696_v59 = vsel %vm215_vm0, %v2989_v9, %v2993_v15 }
 0x37a   :  { %9401 = vmatprep.mubr.msk.f32.mxu0 %vm3108_vm10, %v3076_v51  ;;  %v3083_v1 = vrot.slane %v12696_v59, 4  ;;  %v3002_v4 = vpop.permute.xlu0 %3001 }
 0x37c   :  { %9464 = vmatmul.mubr.msk.f32.gmra.mrb[42].mxu1 %vm3108_vm10, %v12658_v49 }
 0x37d   :  { %9402 = vmatmul.mubr.msk.f32.gmra.mrb[46].mxu0 %vm3108_vm10, %v3078_v2  ;;  %9466 = vmatprep.mubr.msk.f32.mxu1 %vm3108_vm10, %v12580_v22  ;;  %v3081_v2 = vrot.slane %v12693_v19, 4 }
 0x380   :  { %9467 = vmatmul.mubr.msk.f32.gmra.mrb[44].mxu1 %vm3108_vm10, %v12614_v38 }
 0x3b7   :  { %v12699_v51 = vpop.permute.xlu1 %2985 }
 0x3b8   :  { %v3079_v38 = vrot.slane %v12699_v51, 4  ;;  %v13923_v37 = vrot.slane %v12699_v51, 1  ;;  %9469 = vmatprep.mubr.msk.f32.mxu1 %vm3108_vm10, %v12699_v51  ;;  %v13940_v63 = vrot.slane %v12699_v51, 5 }
 0x3b9   :  { %9470 = vmatmul.mubr.msk.f32.gmra.mrb[46].mxu1 %vm3108_vm10, %v12693_v19 }
 0x3ba   :  { %9472 = vmatprep.mubr.msk.f32.mxu1 %vm3108_vm10, %v12696_v59  ;;  %v3080_v11 = vsel %vm215_vm0, %v3077_v46, %v3079_v38  ;;  %v3082_v9 = vsel %vm215_vm0, %v3079_v38, %v3081_v2  ;;  %v12717_v15 = vsel %vm158_vm3, %v3785_v54, %v13923_v37  ;;  %v12730_v46 = vsel %vm2592_vm9, %v4208_v47, %v13940_v63 }
 0x3bb   :  { %v12719_v35 = vpop.permute.xlu1 %2994  ;;  %9404 = vmatprep.mubr.msk.f32.mxu0 %vm3108_vm10, %v3080_v11  ;;  %v12733_v38 = vsel %vm215_vm0, %v2998_v25, %v3002_v4  ;;  %v3084_v37 = vsel %vm215_vm0, %v3081_v2, %v3083_v1  ;;  %v13941_v4 = vrot.slane %v12207_v12, 4 }
 0x3bc   :  { %v3085_v54 = vrot.slane %v12719_v35, 4  ;;  %9405 = vmatmul.mubr.msk.f32.gmra.mrb[48].mxu0 %vm3108_vm10, %v3082_v9  ;;  %v3089_v47 = vrot.slane %v12733_v38, 4  ;;  %v3736_v9 = vrot.slane %v12188_v57, 1 }
 0x3bd   :  { %9407 = vmatprep.mubr.msk.f32.mxu0 %vm3108_vm10, %v3084_v37  ;;  %9473 = vmatmul.mubr.msk.f32.gmra.mrb[48].mxu1 %vm3108_vm10, %v12719_v35 }
 0x3be   :  { %9475 = vmatprep.mubr.msk.f32.mxu1 %vm3108_vm10, %v12725_v21  ;;  %v3086_v40 = vsel %vm215_vm0, %v3083_v1, %v3085_v54  ;;  %v3088_v63 = vsel %vm215_vm0, %v3085_v54, %v3087_v23  ;;  %v3090_v1 = vsel %vm215_vm0, %v3087_v23, %v3089_v47  ;;  %v4238_v54 = vld [vmem:[#allocation7 + $0x70] sm:$0xff]  ;;  %v4239_v23 = vld [vmem:[#allocation7 + $0x78] sm:$0xff] }
 0x3c0   :  { %9408 = vmatmul.mubr.msk.f32.gmra.mrb[50].mxu0 %vm3108_vm10, %v3086_v40  ;;  %v12748_v25 = vpop.permute.xlu1 %3003  ;;  %v13942_v40 = vrot.slane %v12347_v20, 1 }
 0x3c1   :  { %9410 = vmatprep.mubr.msk.f32.mxu0 %vm3108_vm10, %v3088_v63  ;;  %9476 = vmatmul.mubr.msk.f32.gmra.mrb[50].mxu1 %vm3108_vm10, %v12733_v38  ;;  %v3091_v2 = vrot.slane %v12748_v25, 4  ;;  %v3741_v63 = vrot.slane %v12210_v7, 1 }
 0x3c2   :  { %9478 = vmatprep.mubr.msk.f32.mxu1 %vm3108_vm10, %v12748_v25 }
 0x3c3   :  { %v3092_v37 = vsel %vm215_vm0, %v3089_v47, %v3091_v2  ;;  %v3094_v11 = vsel %vm215_vm0, %v3091_v2, %v13941_v4  ;;  %v3738_v47 = vsel %vm158_vm3, %v3736_v9, %v13942_v40  ;;  %v9786_v2 = vpack.c.bf16 %v4239_v23, %v4238_v54 }
 0x3c4   :  { %9411 = vmatmul.mubr.msk.f32.gmra.mrb[52].mxu0 %vm3108_vm10, %v3090_v1  ;;  %v13943_v1 = vrot.slane %v12355_v16, 1  ;;  %v13944_v4 = vrot.slane %v12387_v26, 1  ;;  %v13945_v54 = vrot.slane %v12372_v31, 1 }
 0x3c5   :  { %9479 = vmatmul.mubr.msk.f32.gmra.mrb[16].mxu1 %vm3108_vm10, %v12207_v12  ;;  %9413 = vmatprep.mubr.msk.f32.mxu0 %vm3108_vm10, %v3092_v37 }
 0x3c6   :  { %9481 = vmatprep.mubr.msk.f32.mxu1 %vm3108_vm10, %v12322_v5  ;;  %v3742_v37 = vsel %vm158_vm3, %v13943_v1, %v3741_v63 }
 0x3c8   :  { %9414 = vmatmul.mubr.msk.f32.gmra.mrb[54].mxu0 %vm3108_vm10, %v3094_v11  ;;  %v3744_v11 = vsel %vm158_vm3, %v3741_v63, %v13944_v4  ;;  %v13949_v4 = vrot.slane %v12427_v18, 1 }
 0x3c9   :  { %9482 = vmatmul.mubr.msk.f32.gmra.mrb[52].mxu1 %vm3108_vm10, %v12333_v44 }
 0x3ca   :  { %9492 = vmatprep.mubr.msk.f32.mxu1 %vm3108_vm10, %v3738_v47  ;;  %v3753_v47 = vrot.slane %v12243_v29, 1 }
 0x3cd   :  { %9493 = vmatmul.mubr.msk.f32.vlgmr.msra.gmra.mrb[20].mxu1 %vm3108_vm10, %v12382_v0  ;;  %v3747_v0 = vrot.slane %v12228_v32, 1 }
 0x3ce   :  { %9495 = vmatprep.mubr.msk.f32.mxu1 %vm3108_vm10, %v3742_v37  ;;  %9785 = vmatpush3.bf16.msra.mxu1 %v12407_v3  ;;  %v13946_v3 = vrot.slane %v12412_v30, 1  ;;  %v3759_v37 = vrot.slane %v12260_v52, 1 }
 0x3cf   :  { %9787 = vmatprep.subr.bf16.mxu1 %v9786_v2  ;;  %v3748_v23 = vsel %vm158_vm3, %v13945_v54, %v3747_v0  ;;  %v3765_v54 = vrot.slane %v12277_v53, 1 }
 0x3d0   :  { %v3750_v40 = vsel %vm158_vm3, %v3747_v0, %v13946_v3  ;;  %v13952_v3 = vrot.slane %v12512_v58, 1 }
 0x3d1   :  { %9496 = vmatmul.mubr.msk.f32.gmra.mrb[22].mxu1 %vm3108_vm10, %v3744_v11  ;;  %v13950_v11 = vrot.slane %v12476_v34, 1 }
 0x3d2   :  { %9498 = vmatprep.mubr.msk.f32.mxu1 %vm3108_vm10, %v12435_v43  ;;  %9789 = vmatpush3.bf16.msra.mxu1 %v9786_v2  ;;  %v13947_v43 = vrot.slane %v12403_v60, 1  ;;  %v13948_v2 = vrot.slane %v12444_v56, 1 }
 0x3d3   :  { %v3762_v0 = vsel %vm158_vm3, %v3759_v37, %v13950_v11 }
 0x3d4   :  { %v3754_v63 = vsel %vm158_vm3, %v13947_v43, %v3753_v47  ;;  %v3756_v1 = vsel %vm158_vm3, %v3753_v47, %v13948_v2  ;;  %v3771_v47 = vrot.slane %v12201_v17, 1  ;;  %v13953_v43 = vrot.slane %v12498_v10, 1 }
 0x3d5   :  { %9499 = vmatmul.mubr.msk.f32.gmra.mrb[24].mxu1 %vm3108_vm10, %v3748_v23 }
 0x3d6   :  { %9501 = vmatprep.mubr.msk.f32.mxu1 %vm3108_vm10, %v3750_v40  ;;  %v3768_v40 = vsel %vm158_vm3, %v3765_v54, %v13952_v3  ;;  %v3793_v3 = vrot.slane %v12719_v35, 1 }
 0x3d9   :  { %9502 = vmatmul.mubr.msk.f32.gmra.mrb[26].mxu1 %vm3108_vm10, %v12453_v6  ;;  %v3760_v6 = vsel %vm158_vm3, %v13949_v4, %v3759_v37  ;;  %v3779_v37 = vrot.slane %v12636_v28, 1 }
 0x3da   :  { %9504 = vmatprep.mubr.msk.f32.mxu1 %vm3108_vm10, %v3754_v63  ;;  %v13954_v63 = vrot.slane %v12548_v33, 1 }
 0x3dc   :  { %v3774_v2 = vsel %vm158_vm3, %v3771_v47, %v13954_v63  ;;  %v3795_v63 = vrot.slane %v12725_v21, 1 }
 0x3dd   :  { %9505 = vmatmul.mubr.msk.f32.gmra.mrb[28].mxu1 %vm3108_vm10, %v3756_v1  ;;  %v3777_v1 = vrot.slane %v12300_v50, 1 }
 0x3de   :  { %9507 = vmatprep.mubr.msk.f32.mxu1 %vm3108_vm10, %v12487_v13  ;;  %v13951_v13 = vrot.slane %v12463_v24, 1 }
 0x3df   :  { %v3780_v11 = vsel %vm158_vm3, %v3777_v1, %v3779_v37 }
 0x3e0   :  { %v3766_v23 = vsel %vm158_vm3, %v13951_v13, %v3765_v54  ;;  %v13956_v54 = vrot.slane %v12580_v22, 1  ;;  %v3789_v13 = vrot.slane %v12693_v19, 1 }
 0x3e1   :  { %9508 = vmatmul.mubr.msk.f32.gmra.mrb[30].mxu1 %vm3108_vm10, %v3760_v6  ;;  %v3781_v6 = vrot.slane %v12658_v49, 1 }
 0x3e2   :  { %9510 = vmatprep.mubr.msk.f32.mxu1 %vm3108_vm10, %v3762_v0 }
 0x3e3   :  { %v3782_v0 = vsel %vm158_vm3, %v3779_v37, %v3781_v6  ;;  %v3801_v37 = vrot.slane %v12207_v12, 1 }
 0x3e5   :  { %9511 = vmatmul.mubr.msk.f32.gmra.mrb[32].mxu1 %vm3108_vm10, %v12522_v39  ;;  %v3772_v39 = vsel %vm158_vm3, %v13953_v43, %v3771_v47 }
 0x3e6   :  { %9513 = vmatprep.mubr.msk.f32.mxu1 %vm3108_vm10, %v3766_v23  ;;  %v3791_v23 = vrot.slane %v12696_v59, 1 }
 0x3e8   :  { %v3792_v43 = vsel %vm158_vm3, %v3789_v13, %v3791_v23 }
 0x3e9   :  { %9514 = vmatmul.mubr.msk.f32.gmra.mrb[34].mxu1 %vm3108_vm10, %v3768_v40  ;;  %v13957_v40 = vrot.slane %v12699_v51, 1 }
 0x3ea   :  { %9516 = vmatprep.mubr.msk.f32.mxu1 %vm3108_vm10, %v12559_v41  ;;  %v13955_v41 = vrot.slane %v12542_v55, 1 }
 0x3eb   :  { %v3790_v47 = vsel %vm158_vm3, %v13957_v40, %v3789_v13  ;;  %v4164_v13 = vrot.slane %v12210_v7, 5  ;;  %v13959_v40 = vrot.slane %v12387_v26, 5  ;;  %v13960_v7 = vrot.slane %v12372_v31, 5 }
 0x3ec   :  { %v3778_v4 = vsel %vm158_vm3, %v13955_v41, %v3777_v1  ;;  %v3803_v41 = vrot.slane %v12322_v5, 1 }
 0x3ed   :  { %9517 = vmatmul.mubr.msk.f32.gmra.mrb[54].mxu1 %vm3108_vm10, %v3772_v39  ;;  %v3797_v39 = vrot.slane %v12733_v38, 1 }
 0x3ee   :  { %9519 = vmatprep.mubr.msk.f32.mxu1 %vm3108_vm10, %v3774_v2  ;;  %v3796_v2 = vsel %vm158_vm3, %v3793_v3, %v3795_v63 }
 0x3ef   :  { %v3798_v1 = vsel %vm158_vm3, %v3795_v63, %v3797_v39 }
 0x3f1   :  { %9520 = vmatmul.mubr.msk.f32.gmra.mrb[38].mxu1 %vm3108_vm10, %v12593_v48  ;;  %v3784_v48 = vsel %vm158_vm3, %v3781_v6, %v13956_v54  ;;  %v3805_v6 = vrot.slane %v12333_v44, 1 }
 0x3f2   :  { %9522 = vmatprep.mubr.msk.f32.mxu1 %vm3108_vm10, %v3778_v4 }
 0x3f3   :  { %v3806_v54 = vsel %vm158_vm3, %v3803_v41, %v3805_v6 }
 0x3f5   :  { %9523 = vmatmul.mubr.msk.f32.gmra.mrb[40].mxu1 %vm3108_vm10, %v3780_v11 }
 0x3f6   :  { %9525 = vmatprep.mubr.msk.f32.mxu1 %vm3108_vm10, %v3782_v0  ;;  %v3804_v0 = vsel %vm158_vm3, %v3801_v37, %v3803_v41 }
 0x3f9   :  { %9526 = vmatmul.mubr.msk.f32.gmra.mrb[42].mxu1 %vm3108_vm10, %v3784_v48  ;;  %v3809_v48 = vsel %vm158_vm3, %v3805_v6, %v3736_v9  ;;  %v4170_v9 = vrot.slane %v12228_v32, 5  ;;  %v4176_v32 = vrot.slane %v12243_v29, 5  ;;  %v4182_v29 = vrot.slane %v12260_v52, 5 }
 0x3fa   :  { %9528 = vmatprep.mubr.msk.f32.mxu1 %vm3108_vm10, %v12643_v27  ;;  %v3794_v27 = vsel %vm158_vm3, %v3791_v23, %v3793_v3  ;;  %v13958_v23 = vrot.slane %v12355_v16, 5  ;;  %v13961_v16 = vrot.slane %v12412_v30, 5  ;;  %v4188_v52 = vrot.slane %v12277_v53, 5 }
 0x3fc   :  { %v4165_v3 = vsel %vm2592_vm9, %v13958_v23, %v4164_v13 }
 0x3fd   :  { %9529 = vmatmul.mubr.msk.f32.gmra.mrb[44].mxu1 %vm3108_vm10, %v12717_v15  ;;  %v3799_v15 = vrot.slane %v12748_v25, 1 }
 0x3fe   :  { %9531 = vmatprep.mubr.msk.f32.mxu1 %vm3108_vm10, %v3790_v47  ;;  %v4167_v47 = vsel %vm2592_vm9, %v4164_v13, %v13959_v40 }
 0x3ff   :  { %v3800_v4 = vsel %vm158_vm3, %v3797_v39, %v3799_v15  ;;  %v3802_v11 = vsel %vm158_vm3, %v3799_v15, %v3801_v37 }
 0x401   :  { %9532 = vmatmul.mubr.msk.f32.gmra.mrb[46].mxu1 %vm3108_vm10, %v3792_v43  ;;  %v4173_v43 = vsel %vm2592_vm9, %v4170_v9, %v13961_v16 }
 0x402   :  { %9534 = vmatprep.mubr.msk.f32.mxu1 %vm3108_vm10, %v3794_v27  ;;  %v13963_v27 = vrot.slane %v12444_v56, 5  ;;  %v13965_v56 = vrot.slane %v12476_v34, 5  ;;  %v13967_v34 = vrot.slane %v12512_v58, 5  ;;  %v13969_v58 = vrot.slane %v12548_v33, 5 }
 0x404   :  { %v4179_v30 = vsel %vm2592_vm9, %v4176_v32, %v13963_v27 }
 0x405   :  { %9535 = vmatmul.mubr.msk.f32.gmra.mrb[48].mxu1 %vm3108_vm10, %v3796_v2  ;;  %v4185_v2 = vsel %vm2592_vm9, %v4182_v29, %v13965_v56 }
 0x406   :  { %9537 = vmatprep.mubr.msk.f32.mxu1 %vm3108_vm10, %v3798_v1 }
 0x409   :  { %9538 = vmatmul.mubr.msk.f32.gmra.mrb[50].mxu1 %vm3108_vm10, %v3800_v4  ;;  %v4191_v4 = vsel %vm2592_vm9, %v4188_v52, %v13967_v34 }
 0x40a   :  { %9540 = vmatprep.mubr.msk.f32.mxu1 %vm3108_vm10, %v3802_v11 }
 0x40d   :  { %9541 = vmatmul.mubr.msk.f32.gmra.mrb[16].mxu1 %vm3108_vm10, %v3804_v0 }
 0x40e   :  { %9543 = vmatprep.mubr.msk.f32.mxu1 %vm3108_vm10, %v3806_v54 }
 0x411   :  { %9544 = vmatmul.mubr.msk.f32.gmra.mrb[56].mxu1 %vm3108_vm10, %v3809_v48 }
 0x412   :  { %9554 = vmatprep.mubr.msk.f32.mxu1 %vm3108_vm10, %v12396_v61  ;;  %v4171_v61 = vsel %vm2592_vm9, %v13960_v7, %v4170_v9  ;;  %v4214_v7 = vrot.slane %v12696_v59, 5 }
 0x415   :  { %9555 = vmatmul.mubr.msk.f32.vlgmr.msra.gmra.mrb[20].mxu1 %vm3108_vm10, %v4165_v3  ;;  %v4204_v3 = vrot.slane %v12658_v49, 5 }
 0x416   :  { %9557 = vmatprep.mubr.msk.f32.mxu1 %vm3108_vm10, %v4167_v47 }
 0x419   :  { %9558 = vmatmul.mubr.msk.f32.gmra.mrb[22].mxu1 %vm3108_vm10, %v12471_v8  ;;  %v13962_v8 = vrot.slane %v12403_v60, 5  ;;  %v13964_v60 = vrot.slane %v12427_v18, 5 }
 0x41a   :  { %9560 = vmatprep.mubr.msk.f32.mxu1 %vm3108_vm10, %v4171_v61  ;;  %v13972_v61 = vld [vmem:[#allocation21_spill] sm:$0xff] }
 0x41b   :  { %v4177_v31 = vsel %vm2592_vm9, %v13962_v8, %v4176_v32  ;;  %v4216_v32 = vrot.slane %v12719_v35, 5 }
 0x41d   :  { %9561 = vmatmul.mubr.msk.f32.gmra.mrb[24].mxu1 %vm3108_vm10, %v4173_v43  ;;  %v4212_v43 = vrot.slane %v12693_v19, 5  ;;  %v4218_v19 = vrot.slane %v12725_v21, 5  ;;  %v4226_v21 = vrot.slane %v12322_v5, 5 }
 0x41e   :  { %9563 = vmatprep.mubr.msk.f32.mxu1 %vm3108_vm10, %v12506_v42  ;;  %v4183_v42 = vsel %vm2592_vm9, %v13964_v60, %v4182_v29 }
 0x41f   :  { %v9421_v26 = vpop.f32.mrb[18].mxu1  ;;  %v4215_v59 = vsel %vm2592_vm9, %v4212_v43, %v4214_v7  ;;  %v4219_v29 = vsel %vm2592_vm9, %v4216_v32, %v4218_v19 }
 0x420   :  { %v3416_v39 = vpop.f32.mrb[19].mxu1  ;;  %v13973_v26 = vrot.slane %v12699_v51, 5  ;;  %v4222_v51 = vrot.slane %v12748_v25, 5  ;;  %v4224_v25 = vrot.slane %v12207_v12, 5 }
 0x421   :  { %9564 = vmatmul.mubr.msk.f32.gmra.mrb[26].mxu1 %vm3108_vm10, %v4177_v31 }
 0x422   :  { %v12930_v63 = vpop.f32.mrb[24].mxu0  ;;  %9566 = vmatprep.mubr.msk.f32.mxu1 %vm3108_vm10, %v4179_v30  ;;  %v4213_v8 = vsel %vm2592_vm9, %v13973_v26, %v4212_v43  ;;  %v4217_v30 = vsel %vm2592_vm9, %v4214_v7, %v4216_v32  ;;  %v4227_v5 = vsel %vm2592_vm9, %v4224_v25, %v4226_v21  ;;  %v10236_v7 = vld [vmem:[#allocation10 + $0x8] ss:$16 sps:$4 sm:$0xff]   ;;  %v10241_v43 = vld [vmem:[#allocation10 + $0x24] ss:$16 sps:$4 sm:$0xff]  }
 0x423   :  { %v12933_v15 = vpop.f32.mrb[25].mxu0  ;;  %v10239_v32 = vld [vmem:[#allocation10 + $0x20] ss:$16 sps:$4 sm:$0xff]   ;;  %v10242_v26 = vld [vmem:[#allocation10 + $0x28] ss:$16 sps:$4 sm:$0xff]  }
 0x425   :  { %9567 = vmatmul.mubr.msk.f32.gmra.mrb[28].mxu1 %vm3108_vm10, %v12538_v62  ;;  %v13966_v62 = vrot.slane %v12463_v24, 5  ;;  %v13968_v24 = vrot.slane %v12498_v10, 5  ;;  %v4200_v10 = vrot.slane %v12300_v50, 5  ;;  %v13971_v50 = vrot.slane %v12580_v22, 5 }
 0x426   :  { %9569 = vmatprep.mubr.msk.f32.mxu1 %vm3108_vm10, %v4183_v42 }
 0x427   :  { %v4189_v18 = vsel %vm2592_vm9, %v13966_v62, %v4188_v52  ;;  %v4228_v52 = vrot.slane %v12333_v44, 5  ;;  %v4225_v62 = vsel %vm2592_vm9, %v4222_v51, %v4224_v25  ;;  %v13974_v44 = vrot.slane %v12347_v20, 5 }
 0x428   :  { %v12945_v1 = vpop.f32.mrb[26].mxu0 }
 0x429   :  { %9570 = vmatmul.mubr.msk.f32.gmra.mrb[30].mxu1 %vm3108_vm10, %v4185_v2  ;;  %v12948_v37 = vpop.f32.mrb[27].mxu0 }
 0x42a   :  { %9572 = vmatprep.mubr.msk.f32.mxu1 %vm3108_vm10, %v12575_v45  ;;  %v4194_v45 = vrot.slane %v12201_v17, 5  ;;  %v4202_v17 = vrot.slane %v12636_v28, 5 }
 0x42c   :  { %v12956_v41 = vpop.f32.mrb[28].mxu0  ;;  %v4195_v53 = vsel %vm2592_vm9, %v13968_v24, %v4194_v45  ;;  %v4197_v54 = vsel %vm2592_vm9, %v4194_v45, %v13969_v58  ;;  %v4203_v28 = vsel %vm2592_vm9, %v4200_v10, %v4202_v17  ;;  %v4229_v45 = vsel %vm2592_vm9, %v4226_v21, %v4228_v52  ;;  %v10260_v21 = vld [vmem:[#allocation10 + $0x88] ss:$16 sps:$4 sm:$0xff]  }
 0x42d   :  { %9573 = vmatmul.mubr.msk.f32.gmra.mrb[32].mxu1 %vm3108_vm10, %v4189_v18  ;;  %v12962_v6 = vpop.f32.mrb[29].mxu0 }
 0x42e   :  { %9575 = vmatprep.mubr.msk.f32.mxu1 %vm3108_vm10, %v4191_v4  ;;  %v4231_v4 = vrot.slane %v12188_v57, 5 }
 0x430   :  { %v12966_v11 = vpop.f32.mrb[30].mxu0  ;;  %v4234_v12 = vsel %vm2592_vm9, %v4228_v52, %v4231_v4  ;;  %v4232_v24 = vsel %vm2592_vm9, %v4231_v4, %v13974_v44 }
 0x431   :  { %9576 = vmatmul.mubr.msk.f32.gmra.mrb[34].mxu1 %vm3108_vm10, %v12608_v14  ;;  %v12973_v0 = vpop.f32.mrb[31].mxu0  ;;  %v13970_v14 = vrot.slane %v12542_v55, 5  ;;  %v4207_v55 = vsel %vm2592_vm9, %v4204_v3, %v13971_v50  ;;  %v10233_v50 = vld [vmem:[#allocation10] ss:$16 sps:$4 sm:$0xff]  }
 0x432   :  { %9578 = vmatprep.mubr.msk.f32.mxu1 %vm3108_vm10, %v4195_v53 }
 0x433   :  { %v4201_v23 = vsel %vm2592_vm9, %v13970_v14, %v4200_v10 }
 0x434   :  { %v12979_v48 = vpop.f32.mrb[32].mxu0 }
 0x435   :  { %9579 = vmatmul.mubr.msk.f32.gmra.mrb[58].mxu1 %vm3108_vm10, %v4197_v54  ;;  %v12983_v13 = vpop.f32.mrb[33].mxu0 }
 0x436   :  { %9581 = vmatprep.mubr.msk.f32.mxu1 %vm3108_vm10, %v12624_v36  ;;  %v4205_v36 = vsel %vm2592_vm9, %v4202_v17, %v4204_v3 }
 0x438   :  { %v12991_v33 = vpop.f32.mrb[34].mxu0 }
 0x439   :  { %9582 = vmatmul.mubr.msk.f32.gmra.mrb[38].mxu1 %vm3108_vm10, %v4201_v23  ;;  %v12996_v40 = vpop.f32.mrb[35].mxu0 }
 0x43a   :  { %9584 = vmatprep.mubr.msk.f32.mxu1 %vm3108_vm10, %v4203_v28 }
 0x43c   :  { %v13000_v47 = vpop.f32.mrb[36].mxu0 }
 0x43d   :  { %9585 = vmatmul.mubr.msk.f32.gmra.mrb[40].mxu1 %vm3108_vm10, %v4205_v36  ;;  %v13006_v9 = vpop.f32.mrb[37].mxu0 }
 0x43e   :  { %9587 = vmatprep.mubr.msk.f32.mxu1 %vm3108_vm10, %v4207_v55  ;;  %v10235_v55 = vld [vmem:[#allocation10 + $0x4] ss:$16 sps:$4 sm:$0xff]  }
 0x43f   :  { %7630 = vmatprep.subr.bf16.mxu0 %v10235_v55 }
 0x440   :  { %v13009_v49 = vpop.f32.mrb[38].mxu0  ;;  %7631 = vmatpush1.bf16.msra.mxu0 %v10233_v50 }
 0x441   :  { %9588 = vmatmul.mubr.msk.f32.gmra.mrb[42].mxu1 %vm3108_vm10, %v13972_v61  ;;  %v13014_v16 = vpop.f32.mrb[39].mxu0  ;;  %v10238_v61 = vld [vmem:[#allocation10 + $0xc] ss:$16 sps:$4 sm:$0xff]   ;;  %7632 = vmatprep.subr.bf16.mxu0 %v10241_v43 }
 0x442   :  { %9590 = vmatprep.mubr.msk.f32.mxu1 %vm3108_vm10, %v12730_v46  ;;  %v4220_v46 = vrot.slane %v12733_v38, 5  ;;  %7917 = vmatprep.subr.bf16.mxu1 %v10238_v61 }
 0x443   :  { %v9456_v22 = vpop.f32.mrb[36].mxu1  ;;  %7918 = vmatpush1.bf16.msra.mxu1 %v10236_v7 }
 0x444   :  { %v9394_v31 = vpop.f32.mrb[40].mxu0  ;;  %v3641_v39 = vpop.f32.mrb[37].mxu1  ;;  %v4221_v42 = vsel %vm2592_vm9, %v4218_v19, %v4220_v46  ;;  %v4223_v38 = vsel %vm2592_vm9, %v4220_v46, %v4222_v51  ;;  %v10244_v22 = vld [vmem:[#allocation10 + $0x2c] ss:$16 sps:$4 sm:$0xff]   ;;  %7633 = vmatpush1.bf16.msra.mxu0 %v10239_v32  ;;  %v10251_v46 = vld [vmem:[#allocation10 + $0x60] ss:$16 sps:$4 sm:$0xff]  }
 0x445   :  { %9591 = vmatmul.mubr.msk.f32.gmra.mrb[44].mxu1 %vm3108_vm10, %v4213_v8  ;;  %v3328_v27 = vpop.f32.mrb[41].mxu0  ;;  %v10247_v8 = vld [vmem:[#allocation10 + $0x44] ss:$16 sps:$4 sm:$0xff]   ;;  %7919 = vmatprep.subr.bf16.mxu1 %v10244_v22  ;;  %v10250_v31 = vld [vmem:[#allocation10 + $0x4c] ss:$16 sps:$4 sm:$0xff]  }
 0x446   :  { %9593 = vmatprep.mubr.msk.f32.mxu1 %vm3108_vm10, %v4215_v59  ;;  %v10245_v39 = vld [vmem:[#allocation10 + $0x40] ss:$16 sps:$4 sm:$0xff]   ;;  %7634 = vmatprep.subr.bf16.mxu0 %v10247_v8  ;;  %v10248_v59 = vld [vmem:[#allocation10 + $0x48] ss:$16 sps:$4 sm:$0xff]   ;;  %v10253_v27 = vld [vmem:[#allocation10 + $0x64] ss:$16 sps:$4 sm:$0xff]  }
 0x447   :  { %7920 = vmatpush1.bf16.msra.mxu1 %v10242_v26  ;;  %v10256_v19 = vld [vmem:[#allocation10 + $0x6c] ss:$16 sps:$4 sm:$0xff]   ;;  %v10259_v51 = vld [vmem:[#allocation10 + $0x84] ss:$16 sps:$4 sm:$0xff]  }
 0x448   :  { %v13029_v35 = vpop.f32.mrb[42].mxu0  ;;  %7921 = vmatprep.subr.bf16.mxu1 %v10250_v31  ;;  %7635 = vmatpush1.bf16.msra.mxu0 %v10245_v39 }
 0x449   :  { %9594 = vmatmul.mubr.msk.f32.gmra.mrb[46].mxu1 %vm3108_vm10, %v4217_v30  ;;  %v13034_v60 = vpop.f32.mrb[43].mxu0  ;;  %7636 = vmatprep.subr.bf16.mxu0 %v10253_v27  ;;  %v10254_v30 = vld [vmem:[#allocation10 + $0x68] ss:$16 sps:$4 sm:$0xff]  }
 0x44a   :  { %9596 = vmatprep.mubr.msk.f32.mxu1 %vm3108_vm10, %v4219_v29  ;;  %v10262_v29 = vld [vmem:[#allocation10 + $0x8c] ss:$16 sps:$4 sm:$0xff]  }
 0x44b   :  { %7922 = vmatpush1.bf16.msra.mxu1 %v10248_v59 }
 0x44c   :  { %v13038_v56 = vpop.f32.mrb[44].mxu0  ;;  %7923 = vmatprep.subr.bf16.mxu1 %v10256_v19  ;;  %7637 = vmatpush1.bf16.msra.mxu0 %v10251_v46 }
 0x44d   :  { %9597 = vmatmul.mubr.msk.f32.gmra.mrb[48].mxu1 %vm3108_vm10, %v4221_v42  ;;  %v13043_v2 = vpop.f32.mrb[45].mxu0  ;;  %v10257_v42 = vld [vmem:[#allocation10 + $0x80] ss:$16 sps:$4 sm:$0xff]   ;;  %7638 = vmatprep.subr.bf16.mxu0 %v10259_v51 }
 0x44e   :  { %9599 = vmatprep.mubr.msk.f32.mxu1 %vm3108_vm10, %v4223_v38 }
 0x44f   :  { %7924 = vmatpush1.bf16.msra.mxu1 %v10254_v30 }
 0x450   :  { %v13049_v18 = vpop.f32.mrb[46].mxu0  ;;  %7925 = vmatprep.subr.bf16.mxu1 %v10262_v29  ;;  %7639 = vmatpush1.bf16.msra.mxu0 %v10257_v42 }
 0x451   :  { %9600 = vmatmul.mubr.msk.f32.gmra.mrb[50].mxu1 %vm3108_vm10, %v4225_v62  ;;  %v13053_v34 = vpop.f32.mrb[47].mxu0  ;;  %v13081_v62 = vld [vmem:[#allocation8] ss:$0 sm:$0xff] }
 0x452   :  { %9602 = vmatprep.mubr.msk.f32.mxu1 %vm3108_vm10, %v4227_v5 }
 0x453   :  { %7926 = vmatpush1.bf16.msra.mxu1 %v10260_v21 }
 0x455   :  { %9603 = vmatmul.mubr.msk.f32.gmra.mrb[16].mxu1 %vm3108_vm10, %v4229_v45 }
 0x456   :  { %9605 = vmatprep.mubr.msk.f32.mxu1 %vm3108_vm10, %v4234_v12 }
 0x459   :  { %9606 = vmatmul.mubr.msk.f32.gmra.mrb[60].mxu1 %vm3108_vm10, %v4232_v24 }
 0x48f   :  { %v13065_v53 = vpop.f32.mrb[48].mxu0 }
 0x490   :  { %v13067_v58 = vpop.f32.mrb[49].mxu0 }
 0x493   :  { %v13069_v54 = vpop.f32.mrb[50].mxu0 }
 0x494   :  { %v13071_v57 = vpop.f32.mrb[51].mxu0 }
 0x497   :  { %v13073_v17 = vpop.f32.mrb[52].mxu0 }
 0x498   :  { %v13075_v10 = vpop.f32.mrb[53].mxu0 }
 0x49b   :  { %v13077_v14 = vpop.f32.mrb[54].mxu0 }
 0x49c   :  { %v13079_v23 = vpop.f32.mrb[55].mxu0  ;;  %v9483_v20 = vpop.f32.mrb[52].mxu1 }
 0x49d   :  { %v3729_v3 = vpop.f32.mrb[53].mxu1 }
 0x4c0   :  { %v9518_v28 = vpop.f32.mrb[54].mxu1 }
 0x4c1   :  { %v4034_v36 = vpop.f32.mrb[55].mxu1 }
 0x4e4   :  { %v9545_v38 = vpop.f32.mrb[56].mxu1 }
 0x4e5   :  { %v4122_v25 = vpop.f32.mrb[57].mxu1 }
 0x4e8   :  { %v9556_v52 = vpop.f32.mrb[20].mxu1 }
 0x4e9   :  { %v9866_v5 = vadd.f32 %v9556_v52, %v12930_v63  ;;  %v4379_v4 = vpop.f32.mrb[21].mxu1 }
 0x4ea   :  { %v9867_v45 = vadd.f32 %v4379_v4, %v12933_v15 }
 0x4eb   :  { %v4594_v12 = vadd.f32 %v9866_v5, %v13081_v62 }
 0x4ec   :  { %v4593_v44 = vadd.f32 %v9867_v45, %v13081_v62  ;;  %v9559_v24 = vpop.f32.mrb[22].mxu1 }
 0x4ed   :  { %v13087_v20 = vmax.f32 %v4594_v12, 0.0  ;;  %v9868_v3 = vadd.f32 %v9559_v24, %v12945_v1  ;;  %v4389_v28 = vpop.f32.mrb[23].mxu1 }
 0x4ee   :  { %v4625_v36 = vmax.f32 %v4593_v44, 0.0  ;;  %v9869_v50 = vadd.f32 %v4389_v28, %v12948_v37 }
 0x4ef   :  { %v4688_v55 = vrot.slane %v13087_v20, 1  ;;  %v4596_v63 = vadd.f32 %v9868_v3, %v13081_v62  ;;  %v4779_v26 = vrot.slane %v13087_v20, 4  ;;  %v4849_v31 = vrot.slane %v13087_v20, 5 }
 0x4f0   :  { %v4687_v7 = vrot.slane %v4625_v36, 1  ;;  %v4595_v15 = vadd.f32 %v9869_v50, %v13081_v62  ;;  %v9562_v61 = vpop.f32.mrb[24].mxu1 }
 0x4f1   :  { %v13094_v43 = vmax.f32 %v4596_v63, 0.0  ;;  %v9870_v22 = vadd.f32 %v9562_v61, %v12956_v41  ;;  %v4399_v32 = vpop.f32.mrb[25].mxu1 }
 0x4f2   :  { %v4689_v1 = vsel %vm158_vm3, %v4687_v7, %v4688_v55  ;;  %v4627_v8 = vmax.f32 %v4595_v15, 0.0  ;;  %v9871_v37 = vadd.f32 %v4399_v32, %v12962_v6 }
 0x4f3   :  { %v4757_v39 = vmax.f32 %v4625_v36, %v4689_v1  ;;  %v4782_v59 = vrot.slane %v13094_v43, 4  ;;  %v4852_v27 = vrot.slane %v13094_v43, 5  ;;  %v4598_v41 = vadd.f32 %v9870_v22, %v13081_v62 }
 0x4f4   :  { %v4690_v19 = vrot.slane %v4627_v8, 1  ;;  %v4780_v46 = vrot.slane %v4627_v8, 4  ;;  %v4850_v30 = vrot.slane %v4627_v8, 5  ;;  %v9565_v51 = vpop.f32.mrb[26].mxu1  ;;  %v4597_v29 = vadd.f32 %v9871_v37, %v13081_v62 }
 0x4f5   :  { %v9872_v42 = vadd.f32 %v9565_v51, %v12966_v11  ;;  %v4409_v21 = vpop.f32.mrb[27].mxu1  ;;  %v13119_v12 = vmax.f32 %v4598_v41, 0.0  ;;  %v4692_v36 = vrot.slane %v13094_v43, 1 }
 0x4f6   :  { %v13107_v6 = vsel %vm158_vm3, %v4688_v55, %v4690_v19  ;;  %v4781_v38 = vsel %vm215_vm0, %v4779_v26, %v4780_v46  ;;  %v13111_v25 = vsel %vm215_vm0, %v4780_v46, %v4782_v59  ;;  %v4851_v52 = vsel %vm2592_vm9, %v4849_v31, %v4850_v30 }
 0x4f7   :  { %v13117_v4 = vsel %vm2592_vm9, %v4850_v30, %v4852_v27  ;;  %v4919_v45 = vmax.f32 %v4781_v38, %v4851_v52  ;;  %v13123_v44 = vmax.f32 %v4597_v29, 0.0  ;;  %v4600_v24 = vadd.f32 %v9872_v42, %v13081_v62 }
 0x4f8   :  { %v9873_v3 = vadd.f32 %v4409_v21, %v12973_v0  ;;  %v9568_v28 = vpop.f32.mrb[28].mxu1  ;;  %v13928_v50 = vrot.slane %v13119_v12, 4  ;;  %v13927_v55 = vrot.slane %v13119_v12, 5  ;;  %v4695_v29 = vrot.slane %v13119_v12, 1 }
 0x4f9   :  { %v9874_v63 = vadd.f32 %v9568_v28, %v12979_v48  ;;  %v4419_v7 = vpop.f32.mrb[29].mxu1  ;;  %v4693_v15 = vrot.slane %v13123_v44, 1  ;;  %v4784_v61 = vrot.slane %v13123_v44, 4  ;;  %v4854_v22 = vrot.slane %v13123_v44, 5 }
 0x4fa   :  { %v13134_v32 = vmax.f32 %v4600_v24, 0.0  ;;  %v4599_v0 = vadd.f32 %v9873_v3, %v13081_v62  ;;  %v9875_v1 = vadd.f32 %v4419_v7, %v12983_v13  ;;  %v13139_v8 = vmax.f32 %v4757_v39, %v4919_v45 }
 0x4fb   :  { %v4602_v26 = vadd.f32 %v9874_v63, %v13081_v62  ;;  %v4694_v31 = vsel %vm158_vm3, %v4692_v36, %v4693_v15  ;;  %v4786_v41 = vsel %vm215_vm0, %v4784_v61, %v13928_v50  ;;  %v4856_v51 = vsel %vm2592_vm9, %v4854_v22, %v13927_v55  ;;  %v10275_v55 = vld [vmem:[#allocation10 + $0xe0] ss:$16 sps:$4 sm:$0xff]   ;;  %v10295_v50 = vld [vmem:[#allocation10 + $0x144] ss:$16 sps:$4 sm:$0xff]  }
 0x4fc   :  { %13975 = vst [vmem:[#allocation21_spill] sm:$0xff] %v13139_v8  ;;  %v4698_v37 = vrot.slane %v13134_v32, 1  ;;  %v9571_v48 = vpop.f32.mrb[30].mxu1  ;;  %v13145_v59 = vmax.f32 %v4599_v0, 0.0  ;;  %v4601_v19 = vadd.f32 %v9875_v1, %v13081_v62  ;;  %v4759_v39 = vmax.f32 %v13094_v43, %v4694_v31 }
 0x4fd   :  { %v13147_v27 = vmax.f32 %v4602_v26, 0.0  ;;  %v9876_v46 = vadd.f32 %v9571_v48, %v12991_v33  ;;  %v4429_v30 = vpop.f32.mrb[31].mxu1  ;;  %v4789_v42 = vrot.slane %v13134_v32, 4  ;;  %v4859_v21 = vrot.slane %v13134_v32, 5 }
 0x4fe   :  { %v9877_v13 = vadd.f32 %v4429_v30, %v12996_v40  ;;  %v4697_v33 = vrot.slane %v13145_v59, 1  ;;  %v4633_v38 = vmax.f32 %v4601_v19, 0.0  ;;  %v4921_v63 = vmax.f32 %v4786_v41, %v4856_v51 }
 0x4ff   :  { %v4792_v40 = vrot.slane %v13147_v27, 4  ;;  %v4862_v43 = vrot.slane %v13147_v27, 5  ;;  %v4604_v52 = vadd.f32 %v9876_v46, %v13081_v62  ;;  %v4702_v41 = vrot.slane %v13147_v27, 1 }
 0x500   :  { %v9574_v45 = vpop.f32.mrb[32].mxu1  ;;  %v4699_v24 = vsel %vm158_vm3, %v4697_v33, %v4698_v37  ;;  %v4603_v3 = vadd.f32 %v9877_v13, %v13081_v62  ;;  %v4700_v61 = vrot.slane %v4633_v38, 1  ;;  %v4790_v22 = vrot.slane %v4633_v38, 4 }
 0x501   :  { %v9878_v28 = vadd.f32 %v9574_v45, %v13000_v47  ;;  %v4439_v36 = vpop.f32.mrb[33].mxu1  ;;  %v4761_v7 = vmax.f32 %v13145_v59, %v4699_v24  ;;  %v4860_v0 = vrot.slane %v4633_v38, 5  ;;  %v13170_v26 = vmax.f32 %v4604_v52, 0.0 }
 0x502   :  { %v13172_v1 = vmax.f32 %v4603_v3, 0.0  ;;  %v9879_v31 = vadd.f32 %v4439_v36, %v13006_v9  ;;  %v13177_v19 = vsel %vm158_vm3, %v4698_v37, %v4700_v61  ;;  %v4791_v47 = vsel %vm215_vm0, %v4789_v42, %v4790_v22 }
 0x503   :  { %v4606_v48 = vadd.f32 %v9878_v28, %v13081_v62  ;;  %v13181_v46 = vsel %vm215_vm0, %v4790_v22, %v4792_v40  ;;  %v4861_v30 = vsel %vm2592_vm9, %v4859_v21, %v4860_v0  ;;  %v13188_v33 = vsel %vm2592_vm9, %v4860_v0, %v4862_v43  ;;  %v10298_v0 = vld [vmem:[#allocation10 + $0x14c] ss:$16 sps:$4 sm:$0xff]  }
 0x504   :  { %v9577_v13 = vpop.f32.mrb[34].mxu1  ;;  %v4923_v9 = vmax.f32 %v4791_v47, %v4861_v30  ;;  %v13924_v42 = vrot.slane %v13170_v26, 4  ;;  %v13926_v40 = vrot.slane %v13170_v26, 5  ;;  %v13925_v21 = vrot.slane %v13172_v1, 1 }
 0x505   :  { %v4449_v38 = vpop.f32.mrb[35].mxu1  ;;  %v4794_v52 = vrot.slane %v13172_v1, 4  ;;  %v4864_v45 = vrot.slane %v13172_v1, 5  ;;  %v13197_v24 = vmax.f32 %v4606_v48, 0.0  ;;  %v4605_v43 = vadd.f32 %v9879_v31, %v13081_v62 }
 0x506   :  { %v9880_v3 = vadd.f32 %v9577_v13, %v13009_v49  ;;  %v9881_v28 = vadd.f32 %v4449_v38, %v13014_v16  ;;  %v4704_v61 = vsel %vm158_vm3, %v4702_v41, %v13925_v21  ;;  %v13205_v22 = vmax.f32 %v4759_v39, %v4921_v63  ;;  %v10263_v63 = vld [vmem:[#allocation10 + $0xa0] ss:$16 sps:$4 sm:$0xff]   ;;  %v10265_v41 = vld [vmem:[#allocation10 + $0xa4] ss:$16 sps:$4 sm:$0xff]   ;;  %v10266_v38 = vld [vmem:[#allocation10 + $0xa8] ss:$16 sps:$4 sm:$0xff]  }
 0x507   :  { %v4708_v48 = vrot.slane %v13197_v24, 1  ;;  %v13210_v30 = vmax.f32 %v4605_v43, 0.0  ;;  %v4763_v13 = vmax.f32 %v13147_v27, %v4704_v61  ;;  %v4796_v39 = vsel %vm215_vm0, %v4794_v52, %v13924_v42  ;;  %7640 = vmatprep.subr.bf16.mxu0 %v10265_v41  ;;  %v10272_v42 = vld [vmem:[#allocation10 + $0xc8] ss:$16 sps:$4 sm:$0xff]  }
 0x508   :  { %v9580_v36 = vpop.f32.mrb[58].mxu1  ;;  %13976 = vst [vmem:[#allocation22_spill] sm:$0xff] %v13205_v22  ;;  %v4608_v49 = vadd.f32 %v9880_v3, %v13081_v62  ;;  %v4607_v16 = vadd.f32 %v9881_v28, %v13081_v62  ;;  %v4799_v51 = vrot.slane %v13197_v24, 4  ;;  %v4866_v3 = vsel %vm2592_vm9, %v4864_v45, %v13926_v40  ;;  %v10268_v28 = vld [vmem:[#allocation10 + $0xac] ss:$16 sps:$4 sm:$0xff]   ;;  %7641 = vmatpush1.bf16.msra.mxu0 %v10263_v63 }
 0x509   :  { %v4459_v31 = vpop.f32.mrb[59].mxu1  ;;  %v4707_v43 = vrot.slane %v13210_v30, 1  ;;  %v4925_v37 = vmax.f32 %v4796_v39, %v4866_v3  ;;  %v13224_v5 = vmax.f32 %v4761_v7, %v4923_v9  ;;  %v4869_v52 = vrot.slane %v13197_v24, 5  ;;  %7927 = vmatprep.subr.bf16.mxu1 %v10268_v28  ;;  %v10269_v45 = vld [vmem:[#allocation10 + $0xc0] ss:$16 sps:$4 sm:$0xff]  }
 0x50a   :  { %v4640_v31 = vmax.f32 %v4608_v49, 0.0  ;;  %v4639_v27 = vmax.f32 %v4607_v16, 0.0  ;;  %7928 = vmatpush1.bf16.msra.mxu1 %v10266_v38  ;;  %v10271_v39 = vld [vmem:[#allocation10 + $0xc4] ss:$16 sps:$4 sm:$0xff]  }
 0x50b   :  { %v13228_v11 = vsel %vm158_vm3, %v4707_v43, %v4708_v48  ;;  %v13235_v40 = vmax.f32 %v4763_v13, %v4925_v37  ;;  %7642 = vmatprep.subr.bf16.mxu0 %v10271_v39 }
 0x50c   :  { %v9583_v61 = vpop.f32.mrb[38].mxu1  ;;  %v4765_v49 = vmax.f32 %v13210_v30, %v13228_v11  ;;  %v4802_v16 = vrot.slane %v4640_v31, 4  ;;  %v4872_v7 = vrot.slane %v4640_v31, 5  ;;  %v4710_v9 = vrot.slane %v4639_v27, 1  ;;  %7643 = vmatpush1.bf16.msra.mxu0 %v10269_v45 }
 0x50d   :  { %v9882_v21 = vadd.f32 %v9583_v61, %v13029_v35  ;;  %v4467_v36 = vpop.f32.mrb[39].mxu1  ;;  %v4800_v41 = vrot.slane %v4639_v27, 4  ;;  %v4870_v3 = vrot.slane %v4639_v27, 5  ;;  %13977 = vst [vmem:[#allocation23_spill] sm:$0xff] %v13235_v40  ;;  %v10274_v35 = vld [vmem:[#allocation10 + $0xcc] ss:$16 sps:$4 sm:$0xff]   ;;  %v10178_v39 = vpack.i.bf16 %v13205_v22, %v13235_v40 }
 0x50e   :  { %v4711_v28 = vsel %vm158_vm3, %v4708_v48, %v4710_v9  ;;  %v9883_v63 = vadd.f32 %v4467_v36, %v13034_v60  ;;  %v4968_v11 = vrot.slane %v13139_v8, 2  ;;  %v4975_v31 = vrot.slane %v13224_v5, 2  ;;  %7929 = vmatprep.subr.bf16.mxu1 %v10274_v35  ;;  %v10277_v48 = vld [vmem:[#allocation10 + $0xe4] ss:$16 sps:$4 sm:$0xff]  }
 0x50f   :  { %v4610_v43 = vadd.f32 %v9882_v21, %v13081_v62  ;;  %v4766_v38 = vmax.f32 %v13197_v24, %v4711_v28  ;;  %v4801_v27 = vsel %vm215_vm0, %v4799_v51, %v4800_v41  ;;  %v4803_v21 = vsel %vm215_vm0, %v4800_v41, %v4802_v16  ;;  %7930 = vmatpush1.bf16.msra.mxu1 %v10272_v42  ;;  %v10278_v24 = vld [vmem:[#allocation10 + $0xe8] ss:$16 sps:$4 sm:$0xff]   ;;  %v10280_v51 = vld [vmem:[#allocation10 + $0xec] ss:$16 sps:$4 sm:$0xff]   ;;  %v10283_v35 = vld [vmem:[#allocation10 + $0x104] ss:$16 sps:$4 sm:$0xff]  }
 0x510   :  { %v9586_v61 = vpop.f32.mrb[40].mxu1  ;;  %v4871_v37 = vsel %vm2592_vm9, %v4869_v52, %v4870_v3  ;;  %v4873_v60 = vsel %vm2592_vm9, %v4870_v3, %v4872_v7  ;;  %v4609_v16 = vadd.f32 %v9883_v63, %v13081_v62  ;;  %v4988_v41 = vrot.slane %v13205_v22, 4  ;;  %7644 = vmatprep.subr.bf16.mxu0 %v10277_v48  ;;  %v10286_v7 = vld [vmem:[#allocation10 + $0x10c] ss:$16 sps:$4 sm:$0xff]   ;;  %10179 = vrot.lane.b32.xlu1 %v10178_v39, %s11047_s29  ;;  %v10313_v22 = vld [vmem:[#allocation10 + $0x1a4] ss:$16 sps:$4 sm:$0xff]  }
 0x511   :  { %v4477_v13 = vpop.f32.mrb[41].mxu1  ;;  %v4927_v36 = vmax.f32 %v4801_v27, %v4871_v37  ;;  %v13246_v9 = vmax.f32 %v4610_v43, 0.0  ;;  %v4928_v28 = vmax.f32 %v4803_v21, %v4873_v60  ;;  %v9884_v52 = vadd.f32 %v9586_v61, %v13038_v56  ;;  %7931 = vmatprep.subr.bf16.mxu1 %v10280_v51  ;;  %7645 = vmatpush1.bf16.msra.mxu0 %v10275_v55 }
 0x512   :  { %v10188_v43 = vpack.i.bf16 %v4968_v11, %v4975_v31  ;;  %v9885_v45 = vadd.f32 %v4477_v13, %v13043_v2  ;;  %v5000_v27 = vrot.slane %v13139_v8, 6  ;;  %v4641_v63 = vmax.f32 %v4609_v16, 0.0  ;;  %v10281_v2 = vld [vmem:[#allocation10 + $0x100] ss:$16 sps:$4 sm:$0xff]   ;;  %v10284_v13 = vld [vmem:[#allocation10 + $0x108] ss:$16 sps:$4 sm:$0xff]   ;;  %7646 = vmatprep.subr.bf16.mxu0 %v10283_v35 }
 0x513   :  { %v4713_v3 = vrot.slane %v13246_v9, 1  ;;  %v13257_v21 = vmax.f32 %v4766_v38, %v4928_v28  ;;  %v4612_v56 = vadd.f32 %v9884_v52, %v13081_v62  ;;  %v4804_v48 = vrot.slane %v13246_v9, 4  ;;  %7932 = vmatpush1.bf16.msra.mxu1 %v10278_v24 }
 0x514   :  { %v9589_v42 = vpop.f32.mrb[42].mxu1  ;;  %v4611_v60 = vadd.f32 %v9885_v45, %v13081_v62  ;;  %v13264_v31 = vmax.f32 %v4765_v49, %v4927_v36  ;;  %v4712_v38 = vrot.slane %v4641_v63, 1  ;;  %7933 = vmatprep.subr.bf16.mxu1 %v10286_v7  ;;  %v10292_v49 = vld [vmem:[#allocation10 + $0x12c] ss:$16 sps:$4 sm:$0xff]   ;;  %v4874_v55 = vrot.slane %v13246_v9, 5  ;;  %10189 = vrot.lane.b32.xlu1 %v10188_v43, %s11047_s29 }
 0x515   :  { %v9886_v61 = vadd.f32 %v9589_v42, %v13049_v18  ;;  %v4487_v37 = vpop.f32.mrb[43].mxu1  ;;  %v13266_v39 = vmax.f32 %v4612_v56, 0.0  ;;  %v13274_v18 = vsel %vm158_vm3, %v4693_v15, %v4695_v29  ;;  %v4994_v35 = vrot.slane %v13235_v40, 4  ;;  %v10287_v7 = vld [vmem:[#allocation10 + $0x120] ss:$16 sps:$4 sm:$0xff]   ;;  %7647 = vmatpush1.bf16.msra.mxu0 %v10281_v2 }
 0x516   :  { %v9887_v11 = vadd.f32 %v4487_v37, %v13053_v34  ;;  %v10289_v34 = vld [vmem:[#allocation10 + $0x124] ss:$16 sps:$4 sm:$0xff]   ;;  %v4643_v36 = vmax.f32 %v4611_v60, 0.0  ;;  %v4982_v28 = vrot.slane %v13264_v31, 2  ;;  %v4714_v52 = vsel %vm158_vm3, %v4712_v38, %v4713_v3  ;;  %v10290_v37 = vld [vmem:[#allocation10 + $0x128] ss:$16 sps:$4 sm:$0xff]  }
 0x517   :  { %v4614_v51 = vadd.f32 %v9886_v61, %v13081_v62  ;;  %v4807_v45 = vrot.slane %v13266_v39, 4  ;;  %v4877_v15 = vrot.slane %v13266_v39, 5  ;;  %v13284_v42 = vmax.f32 %v4641_v63, %v4714_v52  ;;  %7934 = vmatpush1.bf16.msra.mxu1 %v10284_v13  ;;  %7648 = vmatprep.subr.bf16.mxu0 %v10289_v34 }
 0x518   :  { %v4613_v24 = vadd.f32 %v9887_v11, %v13081_v62  ;;  %v9592_v16 = vpop.f32.mrb[44].mxu1  ;;  %v4715_v56 = vrot.slane %v4643_v36, 1  ;;  %v4805_v43 = vrot.slane %v4643_v36, 4  ;;  %v4875_v61 = vrot.slane %v4643_v36, 5  ;;  %7935 = vmatprep.subr.bf16.mxu1 %v10292_v49 }
 0x519   :  { %v4497_v29 = vpop.f32.mrb[45].mxu1  ;;  %v13286_v60 = vmax.f32 %v4614_v51, 0.0  ;;  %v10198_v38 = vpack.i.bf16 %v4982_v28, %v4988_v41  ;;  %v9888_v47 = vadd.f32 %v9592_v16, %v13065_v53  ;;  %7649 = vmatpush1.bf16.msra.mxu0 %v10287_v7  ;;  %v10293_v28 = vld [vmem:[#allocation10 + $0x140] ss:$16 sps:$4 sm:$0xff]  }
 0x51a   :  { %v13288_v11 = vmax.f32 %v4613_v24, 0.0  ;;  %v13292_v63 = vsel %vm158_vm3, %v4713_v3, %v4715_v56  ;;  %v13295_v52 = vsel %vm215_vm0, %v4804_v48, %v4805_v43  ;;  %v13298_v2 = vsel %vm215_vm0, %v4805_v43, %v4807_v45  ;;  %7650 = vmatprep.subr.bf16.mxu0 %v10295_v50  ;;  %v10296_v43 = vld [vmem:[#allocation10 + $0x148] ss:$16 sps:$4 sm:$0xff]   ;;  %v10310_v3 = vld [vmem:[#allocation10 + $0x18c] ss:$16 sps:$4 sm:$0xff]  }
 0x51b   :  { %v13301_v13 = vsel %vm2592_vm9, %v4874_v55, %v4875_v61  ;;  %v13306_v41 = vsel %vm2592_vm9, %v4875_v61, %v4877_v15  ;;  %v4720_v34 = vrot.slane %v13286_v60, 1  ;;  %10199 = vrot.lane.b32.xlu1 %v10198_v38, %s11047_s29  ;;  %v10208_v24 = vpack.i.bf16 %v4994_v35, %v5000_v27  ;;  %7936 = vmatpush1.bf16.msra.mxu1 %v10290_v37  ;;  %v10301_v61 = vld [vmem:[#allocation10 + $0x164] ss:$16 sps:$4 sm:$0xff]   ;;  %v10308_v45 = vld [vmem:[#allocation10 + $0x188] ss:$16 sps:$4 sm:$0xff]  }
 0x51c   :  { %v9595_v51 = vpop.f32.mrb[46].mxu1  ;;  %v13929_v36 = vrot.slane %v13288_v11, 1  ;;  %v4616_v15 = vadd.f32 %v9888_v47, %v13081_v62  ;;  %v9889_v56 = vadd.f32 %v4497_v29, %v13067_v58  ;;  %7937 = vmatprep.subr.bf16.mxu1 %v10298_v0  ;;  %v10304_v47 = vld [vmem:[#allocation10 + $0x16c] ss:$16 sps:$4 sm:$0xff]  }
 0x51d   :  { %v4507_v48 = vpop.f32.mrb[47].mxu1  ;;  %v9890_v38 = vadd.f32 %v9595_v51, %v13069_v54  ;;  %7651 = vmatpush1.bf16.msra.mxu0 %v10293_v28 }
 0x51e   :  { %v9891_v53 = vadd.f32 %v4507_v48, %v13071_v57  ;;  %v13327_v35 = vsel %vm158_vm3, %v13929_v36, %v4720_v34  ;;  %v13331_v37 = vmax.f32 %v4616_v15, 0.0  ;;  %v4615_v58 = vadd.f32 %v9889_v56, %v13081_v62  ;;  %7652 = vmatprep.subr.bf16.mxu0 %v10301_v61 }
 0x51f   :  { %10209 = vrot.lane.b32.xlu1 %v10208_v24, %s11047_s29  ;;  %v4618_v0 = vadd.f32 %v9890_v38, %v13081_v62  ;;  %v13978_v34 = vrot.slane %v13145_v59, 4  ;;  %v13979_v48 = vrot.slane %v13119_v12, 4  ;;  %v10299_v24 = vld [vmem:[#allocation10 + $0x160] ss:$16 sps:$4 sm:$0xff]   ;;  %7938 = vmatpush1.bf16.msra.mxu1 %v10296_v43 }
 0x520   :  { %v9598_v27 = vpop.f32.mrb[48].mxu1  ;;  %v4617_v29 = vadd.f32 %v9891_v53, %v13081_v62  ;;  %v4723_v38 = vrot.slane %v13331_v37, 1  ;;  %v13351_v55 = vmax.f32 %v4615_v58, 0.0  ;;  %7939 = vmatprep.subr.bf16.mxu1 %v10304_v47  ;;  %v4814_v56 = vrot.slane %v13331_v37, 4 }
 0x521   :  { %v9892_v54 = vadd.f32 %v9598_v27, %v13073_v17  ;;  %v4517_v50 = vpop.f32.mrb[49].mxu1  ;;  %v13346_v15 = vsel %vm215_vm0, %v13979_v48, %v13978_v34  ;;  %v10302_v17 = vld [vmem:[#allocation10 + $0x168] ss:$16 sps:$4 sm:$0xff]   ;;  %v13353_v53 = vmax.f32 %v4618_v0, 0.0  ;;  %v4884_v27 = vrot.slane %v13331_v37, 5  ;;  %7653 = vmatpush1.bf16.msra.mxu0 %v10299_v24 }
 0x522   :  { %v9893_v51 = vadd.f32 %v4517_v50, %v13075_v10  ;;  %v10307_v10 = vld [vmem:[#allocation10 + $0x184] ss:$16 sps:$4 sm:$0xff]   ;;  %v4649_v50 = vmax.f32 %v4617_v29, 0.0  ;;  %v4722_v58 = vrot.slane %v13351_v55, 1  ;;  %v4812_v0 = vrot.slane %v13351_v55, 4 }
 0x523   :  { %v4620_v34 = vadd.f32 %v9892_v54, %v13081_v62  ;;  %v4817_v29 = vrot.slane %v13353_v53, 4  ;;  %v4887_v54 = vrot.slane %v13353_v53, 5  ;;  %7940 = vmatpush1.bf16.msra.mxu1 %v10302_v17  ;;  %7654 = vmatprep.subr.bf16.mxu0 %v10307_v10 }
 0x524   :  { %v4619_v28 = vadd.f32 %v9893_v51, %v13081_v62  ;;  %v9601_v48 = vpop.f32.mrb[50].mxu1  ;;  %v4725_v57 = vrot.slane %v4649_v50, 1  ;;  %v10305_v51 = vld [vmem:[#allocation10 + $0x180] ss:$16 sps:$4 sm:$0xff]   ;;  %v4724_v47 = vsel %vm158_vm3, %v4722_v58, %v4723_v38  ;;  %v4815_v7 = vrot.slane %v4649_v50, 4  ;;  %7941 = vmatprep.subr.bf16.mxu1 %v10310_v3 }
 0x525   :  { %v9894_v43 = vadd.f32 %v9601_v48, %v13077_v14  ;;  %v4527_v61 = vpop.f32.mrb[51].mxu1  ;;  %v4885_v49 = vrot.slane %v4649_v50, 5  ;;  %v13365_v36 = vmax.f32 %v4620_v34, 0.0  ;;  %v4771_v14 = vmax.f32 %v13351_v55, %v4724_v47  ;;  %7655 = vmatpush1.bf16.msra.mxu0 %v10305_v51  ;;  %v10311_v47 = vld [vmem:[#allocation10 + $0x1a0] ss:$16 sps:$4 sm:$0xff]  }
 0x526   :  { %v13369_v48 = vsel %vm158_vm3, %v4723_v38, %v4725_v57  ;;  %v13371_v16 = vmax.f32 %v4619_v28, 0.0  ;;  %v4816_v34 = vsel %vm215_vm0, %v4814_v56, %v4815_v7  ;;  %v13378_v17 = vsel %vm215_vm0, %v4815_v7, %v4817_v29  ;;  %v10316_v57 = vld [vmem:[#allocation10 + $0x1ac] ss:$16 sps:$4 sm:$0xff]   ;;  %7656 = vmatprep.subr.bf16.mxu0 %v10313_v22 }
 0x527   :  { %v4622_v40 = vadd.f32 %v9894_v43, %v13081_v62  ;;  %v4886_v10 = vsel %vm2592_vm9, %v4884_v27, %v4885_v49  ;;  %v4882_v38 = vrot.slane %v13351_v55, 5  ;;  %v4727_v28 = vrot.slane %v13353_v53, 1  ;;  %7942 = vmatpush1.bf16.msra.mxu1 %v10308_v45  ;;  %v10314_v55 = vld [vmem:[#allocation10 + $0x1a8] ss:$16 sps:$4 sm:$0xff]  }
 0x528   :  { %v9604_v24 = vpop.f32.mrb[16].mxu1  ;;  %v13384_v43 = vsel %vm2592_vm9, %v4885_v49, %v4887_v54  ;;  %v4933_v3 = vmax.f32 %v4816_v34, %v4886_v10  ;;  %v9895_v49 = vadd.f32 %v4527_v61, %v13079_v23  ;;  %7943 = vmatprep.subr.bf16.mxu1 %v10316_v57  ;;  %v13980_v7 = vrot.slane %v13286_v60, 4 }
 0x529   :  { %v4537_v58 = vpop.f32.mrb[17].mxu1  ;;  %v4654_v8 = vmax.f32 %v4622_v40, 0.0  ;;  %v4624_v54 = vadd.f32 %v9604_v24, %v13081_v62  ;;  %v13981_v22 = vrot.slane %v13145_v59, 5  ;;  %v13982_v27 = vrot.slane %v13119_v12, 5  ;;  %7657 = vmatpush1.bf16.msra.mxu0 %v10311_v47 }
 0x52a   :  { %v4623_v34 = vadd.f32 %v13081_v62, %v4537_v58  ;;  %v13395_v10 = vmax.f32 %v4771_v14, %v4933_v3  ;;  %v4813_v45 = vsel %vm215_vm0, %v13980_v7, %v4812_v0  ;;  %v4819_v23 = vrot.slane %v13371_v16, 4 }
 0x52b   :  { %v4858_v40 = vsel %vm2592_vm9, %v13982_v27, %v13981_v22  ;;  %v4733_v61 = vrot.slane %v4654_v8, 1  ;;  %v4824_v24 = vrot.slane %v4654_v8, 4  ;;  %v4621_v57 = vadd.f32 %v9895_v49, %v13081_v62  ;;  %7944 = vmatpush1.bf16.msra.mxu1 %v10314_v55 }
 0x52c   :  { %v9607_v51 = vpop.f32.mrb[60].mxu1  ;;  %v4656_v14 = vmax.f32 %v4624_v54, 0.0  ;;  %v4655_v58 = vmax.f32 %v4623_v34, 0.0  ;;  %v10218_v3 = vpack.i.bf16 %v13395_v10, %v13224_v5  ;;  %v13983_v0 = vrot.slane %v13286_v60, 5 }
 0x52d   :  { %v4547_v56 = vpop.f32.mrb[61].mxu1  ;;  %v13412_v12 = vmax.f32 %v4621_v57, 0.0  ;;  %v13984_v27 = vrot.slane %v13288_v11, 1  ;;  %v13985_v62 = vrot.slane %v13266_v39, 1  ;;  %v4894_v55 = vrot.slane %v4654_v8, 5 }
 0x52e   :  { %v4883_v59 = vsel %vm2592_vm9, %v13983_v0, %v4882_v38  ;;  %v4922_v56 = vmax.f32 %v13346_v15, %v4858_v40  ;;  %v4827_v49 = vrot.slane %v4656_v14, 4  ;;  %v4897_v54 = vrot.slane %v4656_v14, 5  ;;  %10219 = vrot.lane.b32.xlu1 %v10218_v3, %s11047_s29 }
 0x52f   :  { %v4932_v7 = vmax.f32 %v4813_v45, %v4883_v59  ;;  %v4719_v47 = vsel %vm158_vm3, %v13985_v62, %v13984_v27  ;;  %v4735_v51 = vrot.slane %v4655_v58, 1  ;;  %v4825_v34 = vrot.slane %v4655_v58, 4 }
 0x530   :  { %v4889_v38 = vrot.slane %v13371_v16, 5  ;;  %v4732_v22 = vrot.slane %v13412_v12, 1  ;;  %v4895_v57 = vrot.slane %v4655_v58, 5  ;;  %v13986_v0 = vmax.f32 %v13123_v44, %v13274_v18 }
 0x531   :  { %v4736_v15 = vsel %vm158_vm3, %v4733_v61, %v4735_v51  ;;  %v4826_v45 = vsel %vm215_vm0, %v4824_v24, %v4825_v34  ;;  %v4828_v40 = vsel %vm215_vm0, %v4825_v34, %v4827_v49  ;;  %v13987_v24 = vmax.f32 %v13288_v11, %v13327_v35 }
 0x532   :  { %v4942_v14 = vmax.f32 %v13986_v0, %v4922_v56  ;;  %v4734_v59 = vsel %vm158_vm3, %v4732_v22, %v4733_v61  ;;  %v4776_v27 = vmax.f32 %v4654_v8, %v4736_v15  ;;  %v4896_v3 = vsel %vm2592_vm9, %v4894_v55, %v4895_v57 }
 0x533   :  { %v4898_v62 = vsel %vm2592_vm9, %v4895_v57, %v4897_v54  ;;  %v4775_v29 = vmax.f32 %v13412_v12, %v4734_v59  ;;  %v4937_v58 = vmax.f32 %v4826_v45, %v4896_v3  ;;  %v4952_v51 = vmax.f32 %v13987_v24, %v4932_v7  ;;  %v10322_v59 = vld [vmem:[#allocation10 + $0x1cc] ss:$16 sps:$4 sm:$0xff]  }
 0x534   :  { %v4938_v50 = vmax.f32 %v4828_v40, %v4898_v62  ;;  %v5023_v49 = vrot.slane %v4942_v14, 2  ;;  %v13988_v34 = vrot.slane %v13371_v16, 1  ;;  %v4769_v18 = vmax.f32 %v13266_v39, %v4719_v47  ;;  %v10317_v14 = vld [vmem:[#allocation10 + $0x1c0] ss:$16 sps:$4 sm:$0xff]   ;;  %v10328_v24 = vld [vmem:[#allocation10 + $0x1ec] ss:$16 sps:$4 sm:$0xff]   ;;  %7945 = vmatprep.subr.bf16.mxu1 %v10322_v59 }
 0x535   :  { %v13989_v8 = vrot.slane %v13286_v60, 4  ;;  %v13990_v61 = vrot.slane %v13288_v11, 4  ;;  %v13445_v54 = vmax.f32 %v4775_v29, %v4937_v58  ;;  %v5118_v22 = vrot.slane %v4952_v51, 2 }
 0x536   :  { %v4729_v44 = vsel %vm158_vm3, %v4727_v28, %v13988_v34  ;;  %v13447_v55 = vmax.f32 %v4776_v27, %v4938_v50  ;;  %v13991_v7 = vrot.slane %v13365_v36, 4  ;;  %v13992_v28 = vrot.slane %v13286_v60, 5  ;;  %v10320_v60 = vld [vmem:[#allocation10 + $0x1c8] ss:$16 sps:$4 sm:$0xff]  }
 0x537   :  { %v4811_v56 = vsel %vm215_vm0, %v13990_v61, %v13989_v8  ;;  %v4773_v35 = vmax.f32 %v13353_v53, %v4729_v44  ;;  %v13993_v39 = vrot.slane %v13288_v11, 5  ;;  %v13994_v15 = vrot.slane %v13365_v36, 5  ;;  %v10319_v53 = vld [vmem:[#allocation10 + $0x1c4] ss:$16 sps:$4 sm:$0xff]   ;;  %7946 = vmatpush1.bf16.msra.mxu1 %v10320_v60 }
 0x538   :  { %v4821_v57 = vsel %vm215_vm0, %v4819_v23, %v13991_v7  ;;  %v13995_v50 = vmax.f32 %v13295_v52, %v13301_v13  ;;  %v10228_v40 = vpack.i.bf16 %v5118_v22, %v5023_v49  ;;  %v4867_v11 = vrot.slane %v13210_v30, 5  ;;  %7658 = vmatprep.subr.bf16.mxu0 %v10319_v53  ;;  %7947 = vmatprep.subr.bf16.mxu1 %v10328_v24 }
 0x539   :  { %v4881_v47 = vsel %vm2592_vm9, %v13993_v39, %v13992_v28  ;;  %v4891_v29 = vsel %vm2592_vm9, %v4889_v38, %v13994_v15  ;;  %v4822_v27 = vrot.slane %v13412_v12, 4  ;;  %v4892_v3 = vrot.slane %v13412_v12, 5  ;;  %v10325_v38 = vld [vmem:[#allocation10 + $0x1e4] ss:$16 sps:$4 sm:$0xff]   ;;  %7659 = vmatpush1.bf16.msra.mxu0 %v10317_v14 }
 0x53a   :  { %v13465_v45 = vmax.f32 %v13284_v42, %v13995_v50  ;;  %v4931_v0 = vmax.f32 %v4811_v56, %v4881_v47  ;;  %v4935_v23 = vmax.f32 %v4821_v57, %v4891_v29  ;;  %10229 = vrot.lane.b32.xlu1 %v10228_v40, %s11047_s29  ;;  %v13996_v13 = vrot.slane %v13170_v26, 1  ;;  %7660 = vmatprep.subr.bf16.mxu0 %v10325_v38  ;;  %v10334_v40 = vld [vmem:[#allocation10 + $0x20c] ss:$16 sps:$4 sm:$0xff]  }
 0x53b   :  { %v13997_v62 = vrot.slane %v13172_v1, 1  ;;  %v5071_v51 = vrot.slane %v13395_v10, 2  ;;  %v13998_v49 = vrot.slane %v13365_v36, 1  ;;  %v13999_v12 = vmov %v13988_v34 }
 0x53c   :  { %v13471_v52 = vmax.f32 %v4769_v18, %v4931_v0  ;;  %v13473_v42 = vmax.f32 %v4773_v35, %v4935_v23  ;;  %v14000_v18 = vrot.slane %v13210_v30, 4  ;;  %v14001_v8 = vrot.slane %v13170_v26, 4  ;;  %v10323_v35 = vld [vmem:[#allocation10 + $0x1e0] ss:$16 sps:$4 sm:$0xff]  }
 0x53d   :  { %v4706_v58 = vsel %vm158_vm3, %v13997_v62, %v13996_v13  ;;  %v4731_v34 = vsel %vm158_vm3, %v13999_v12, %v13998_v49  ;;  %v5064_v7 = vrot.slane %v13465_v45, 2  ;;  %v14002_v57 = vrot.slane %v13365_v36, 4  ;;  %7661 = vmatpush1.bf16.msra.mxu0 %v10323_v35 }
 0x53e   :  { %v4764_v44 = vmax.f32 %v13172_v1, %v4706_v58  ;;  %v4798_v61 = vsel %vm215_vm0, %v14001_v8, %v14000_v18  ;;  %v10173_v56 = vpack.i.bf16 %v13471_v52, %v13473_v42  ;;  %v4774_v22 = vmax.f32 %v13371_v16, %v4731_v34  ;;  %v10331_v16 = vld [vmem:[#allocation10 + $0x204] ss:$16 sps:$4 sm:$0xff]  }
 0x53f   :  { %v4823_v1 = vsel %vm215_vm0, %v14002_v57, %v4822_v27  ;;  %v14003_v30 = vrot.slane %v13170_v26, 5  ;;  %v14004_v39 = vmov %v13994_v15  ;;  %v10326_v15 = vld [vmem:[#allocation10 + $0x1e8] ss:$16 sps:$4 sm:$0xff]   ;;  %v5078_v29 = vrot.slane %v13445_v54, 2  ;;  %7671 = vmatprep.subr.bf16.mxu0 %v10331_v16  ;;  %v14013_v16 = vld [vmem:[#allocation21_spill] sm:$0xff] }
 0x540   :  { %v4893_v47 = vsel %vm2592_vm9, %v14004_v39, %v4892_v3  ;;  %10174 = vrot.lane.b32.xlu0 %v10173_v56, %s11047_s29  ;;  %v8726_v0 = vrot.slane %v13447_v55, 15  ;;  %v10183_v26 = vpack.i.bf16 %v5064_v7, %v5071_v51  ;;  %v5084_v23 = vrot.slane %v13471_v52, 4  ;;  %7948 = vmatpush1.bf16.msra.mxu1 %v10326_v15 }
 0x541   :  { %v4868_v28 = vsel %vm2592_vm9, %v14003_v30, %v4867_v11  ;;  %v4936_v53 = vmax.f32 %v4823_v1, %v4893_v47  ;;  %v14005_v60 = vmax.f32 %v13111_v25, %v13117_v4  ;;  %v14006_v59 = vmax.f32 %v13087_v20, %v13107_v6  ;;  %7958 = vmatprep.subr.bf16.mxu1 %v10334_v40 }
 0x542   :  { %v4926_v50 = vmax.f32 %v4798_v61, %v4868_v28  ;;  %v14007_v27 = vmax.f32 %v13298_v2, %v13306_v41  ;;  %v14008_v3 = vmax.f32 %v13246_v9, %v13292_v63  ;;  %v10193_v55 = vpack.i.bf16 %v5078_v29, %v5084_v23  ;;  %v14014_v23 = vld [vmem:[#allocation22_spill] sm:$0xff] }
 0x543   :  { %v4956_v36 = vmax.f32 %v4774_v22, %v4936_v53  ;;  %v4940_v11 = vmax.f32 %v14006_v59, %v14005_v60  ;;  %v14009_v20 = vmax.f32 %v13181_v46, %v13188_v33  ;;  %v14010_v6 = vmax.f32 %v13134_v32, %v13177_v19 }
 0x544   :  { %v4946_v14 = vmax.f32 %v4764_v44, %v4926_v50  ;;  %v4950_v38 = vmax.f32 %v14008_v3, %v14007_v27  ;;  %10184 = vrot.lane.b32.xlu0 %v10183_v26, %s11047_s29  ;;  %v14011_v4 = vmax.f32 %v13378_v17, %v13384_v43  ;;  %v14012_v9 = vmax.f32 %v13331_v37, %v13369_v48  ;;  %v10332_v27 = vld [vmem:[#allocation10 + $0x208] ss:$16 sps:$4 sm:$0xff]  }
 0x545   :  { %v5126_v62 = vrot.slane %v4956_v36, 2  ;;  %v13528_v25 = vmax.f32 %v14010_v6, %v14009_v20  ;;  %v13540_v2 = vsel %vm2578_vm7, %v13257_v21, %v8726_v0  ;;  %v5090_v41 = vrot.slane %v13473_v42, 4  ;;  %v10335_v6 = vld [vmem:[#allocation10 + $0x220] ss:$16 sps:$4 sm:$0xff]  }
 0x546   :  { %v5031_v13 = vrot.slane %v4946_v14, 2  ;;  %v13536_v63 = vmax.f32 %v14012_v9, %v14011_v4  ;;  %v5096_v32 = vrot.slane %v13465_v45, 6  ;;  %v10213_v33 = vpack.i.bf16 %v13445_v54, %v13264_v31  ;;  %v10338_v9 = vld [vmem:[#allocation10 + $0x228] ss:$16 sps:$4 sm:$0xff]  }
 0x547   :  { %v5020_v24 = vrot.slane %v4940_v11, 2  ;;  %v5115_v51 = vrot.slane %v4950_v38, 2  ;;  %v5068_v47 = vrot.slane %v13471_v52, 2  ;;  %v4972_v14 = vrot.slane %v14014_v23, 2  ;;  %v10329_v11 = vld [vmem:[#allocation10 + $0x200] ss:$16 sps:$4 sm:$0xff]  }
 0x548   :  { %v10223_v46 = vpack.i.bf16 %v5126_v62, %v5031_v13  ;;  %10194 = vrot.lane.b32.xlu0 %v10193_v55, %s11047_s29  ;;  %v10203_v19 = vpack.i.bf16 %v5090_v41, %v5096_v32  ;;  %v10337_v55 = vld [vmem:[#allocation10 + $0x224] ss:$16 sps:$4 sm:$0xff]   ;;  %v10340_v13 = vld [vmem:[#allocation10 + $0x22c] ss:$16 sps:$4 sm:$0xff]  }
 0x549   :  { %v10346_v32 = vld [vmem:[#allocation10 + $0x24c] ss:$16 sps:$4 sm:$0xff]  }
 0x54c   :  { %10204 = vrot.lane.b32.xlu0 %v10203_v19, %s11047_s29  ;;  %v10341_v19 = vld [vmem:[#allocation10 + $0x240] ss:$16 sps:$4 sm:$0xff]  }
 0x550   :  { %10214 = vrot.lane.b32.xlu0 %v10213_v33, %s11047_s29  ;;  %v10344_v33 = vld [vmem:[#allocation10 + $0x248] ss:$16 sps:$4 sm:$0xff]  }
 0x554   :  { %10224 = vrot.lane.b32.xlu0 %v10223_v46, %s11047_s29  ;;  %v10343_v46 = vld [vmem:[#allocation10 + $0x244] ss:$16 sps:$4 sm:$0xff]  }
 0x582   :  { %v10180_v37 = vpop.permute.xlu1 %10179 }
 0x583   :  { %v10182_v56 = vunpack.i.h.bf16 %v10180_v37  ;;  %v10181_v22 = vunpack.i.l.bf16 %v10180_v37 }
 0x585   :  { %v5005_v29 = vsel %vm5004_vm11, %v14013_v16, %v10182_v56  ;;  %v5006_v50 = vsel %vm5004_vm11, %v13224_v5, %v10181_v22 }
 0x586   :  { %v13550_v21 = vpop.permute.xlu1 %10189 }
 0x587   :  { %v10191_v53 = vunpack.i.l.bf16 %v13550_v21 }
 0x589   :  { %v5008_v62 = vsel %vm5004_vm11, %v4972_v14, %v10191_v53  ;;  %v10370_v53 = vld [vmem:[#allocation10 + $0x2cc] ss:$16 sps:$4 sm:$0xff]  }
 0x58a   :  { %v10376_v14 = vld [vmem:[#allocation10 + $0x2ec] ss:$16 sps:$4 sm:$0xff]  }
 0x58d   :  { %v13552_v48 = vpop.permute.xlu1 %10199 }
 0x591   :  { %v13554_v17 = vpop.permute.xlu1 %10209 }
 0x5a0   :  { %v13556_v43 = vpop.permute.xlu1 %10219 }
 0x5ac   :  { %v10230_v58 = vpop.permute.xlu1 %10229 }
 0x5ad   :  { %v10232_v49 = vunpack.i.h.bf16 %v10230_v58  ;;  %v10231_v12 = vunpack.i.l.bf16 %v10230_v58  ;;  %v10349_v58 = vld [vmem:[#allocation10 + $0x264] ss:$16 sps:$4 sm:$0xff]  }
 0x5af   :  { %v5134_v34 = vsel %vm5004_vm11, %v5115_v51, %v10232_v49  ;;  %v5039_v44 = vsel %vm5004_vm11, %v5020_v24, %v10231_v12  ;;  %v10352_v24 = vld [vmem:[#allocation10 + $0x26c] ss:$16 sps:$4 sm:$0xff]   ;;  %v10347_v51 = vld [vmem:[#allocation10 + $0x260] ss:$16 sps:$4 sm:$0xff]   ;;  %v10350_v49 = vld [vmem:[#allocation10 + $0x268] ss:$16 sps:$4 sm:$0xff]  }
 0x5b0   :  { %v8724_v18 = vrot.slane %v5134_v34, 13  ;;  %v5047_v8 = vrot.slane %v5039_v44, 6  ;;  %v10355_v34 = vld [vmem:[#allocation10 + $0x284] ss:$16 sps:$4 sm:$0xff]   ;;  %v10358_v44 = vld [vmem:[#allocation10 + $0x28c] ss:$16 sps:$4 sm:$0xff]  }
 0x5b2   :  { %v10175_v61 = vpop.permute.xlu0 %10174  ;;  %v13561_v57 = vsel %vm2578_vm7, %v5047_v8, %v8724_v18  ;;  %v5028_v18 = vrot.slane %v13528_v25, 2  ;;  %v5123_v8 = vrot.slane %v13536_v63, 2  ;;  %v10359_v63 = vld [vmem:[#allocation10 + $0x2a0] ss:$16 sps:$4 sm:$0xff]  }
 0x5b3   :  { %v10177_v35 = vunpack.i.h.bf16 %v10175_v61  ;;  %v10176_v7 = vunpack.i.l.bf16 %v10175_v61 }
 0x5b5   :  { %v5100_v1 = vsel %vm5004_vm11, %v13465_v45, %v10177_v35  ;;  %v5101_v30 = vsel %vm5004_vm11, %v13395_v10, %v10176_v7  ;;  %v10353_v7 = vld [vmem:[#allocation10 + $0x280] ss:$16 sps:$4 sm:$0xff]  }
 0x5b6   :  { %v5153_v28 = vrot.slane %v5100_v1, 7  ;;  %v5154_v39 = vrot.slane %v5101_v30, 7  ;;  %v13568_v15 = vpop.permute.xlu0 %10184  ;;  %v10356_v1 = vld [vmem:[#allocation10 + $0x288] ss:$16 sps:$4 sm:$0xff]  }
 0x5b7   :  { %v10186_v40 = vunpack.i.l.bf16 %v13568_v15 }
 0x5b8   :  { %v5179_v0 = vsel %vm2578_vm7, %v5005_v29, %v5153_v28  ;;  %v5180_v26 = vsel %vm2578_vm7, %v5006_v50, %v5154_v39  ;;  %v10361_v39 = vld [vmem:[#allocation10 + $0x2a4] ss:$16 sps:$4 sm:$0xff]   ;;  %v10362_v29 = vld [vmem:[#allocation10 + $0x2a8] ss:$16 sps:$4 sm:$0xff]  }
 0x5b9   :  { %v5192_v36 = vpack.c.bf16 %v5179_v0, %v5179_v0  ;;  %v5103_v60 = vsel %vm5004_vm11, %v5068_v47, %v10186_v40  ;;  %v5193_v59 = vpack.c.bf16 %v5180_v26, %v5180_v26  ;;  %v10364_v47 = vld [vmem:[#allocation10 + $0x2ac] ss:$16 sps:$4 sm:$0xff]   ;;  %v10367_v50 = vld [vmem:[#allocation10 + $0x2c4] ss:$16 sps:$4 sm:$0xff]   ;;  %v10365_v40 = vld [vmem:[#allocation10 + $0x2c0] ss:$16 sps:$4 sm:$0xff]  }
 0x5ba   :  { %v5156_v3 = vrot.slane %v5103_v60, 7  ;;  %v13580_v38 = vpop.permute.xlu0 %10194  ;;  %v10368_v0 = vld [vmem:[#allocation10 + $0x2c8] ss:$16 sps:$4 sm:$0xff]   ;;  %v10373_v26 = vld [vmem:[#allocation10 + $0x2e4] ss:$16 sps:$4 sm:$0xff]  }
 0x5bb   :  { %7662 = vmatprep.mubr.bf16.mxu0 %v5193_v59  ;;  %7949 = vmatprep.mubr.bf16.mxu1 %v5193_v59  ;;  %v10374_v60 = vld [vmem:[#allocation10 + $0x2e8] ss:$16 sps:$4 sm:$0xff]   ;;  %v10379_v59 = vld [vmem:[#allocation10 + $0x304] ss:$16 sps:$4 sm:$0xff]  }
 0x5bc   :  { %7663 = vmatmul.mubr.bf16.vlgmr.msra.gmra.mrb[56].mxu0 %v5192_v36  ;;  %7950 = vmatmul.mubr.bf16.vlgmr.msra.gmra.mrb[64].mxu1 %v5192_v36  ;;  %v5182_v20 = vsel %vm2578_vm7, %v5008_v62, %v5156_v3  ;;  %v10371_v36 = vld [vmem:[#allocation10 + $0x2e0] ss:$16 sps:$4 sm:$0xff]   ;;  %v10380_v3 = vld [vmem:[#allocation10 + $0x308] ss:$16 sps:$4 sm:$0xff]  }
 0x5bd   :  { %7672 = vmatpush1.bf16.msra.mxu0 %v10329_v11  ;;  %7959 = vmatpush1.bf16.msra.mxu1 %v10332_v27  ;;  %v5195_v4 = vpack.c.bf16 %v5182_v20, %v5182_v20  ;;  %v10382_v11 = vld [vmem:[#allocation10 + $0x30c] ss:$16 sps:$4 sm:$0xff]   ;;  %v10377_v27 = vld [vmem:[#allocation10 + $0x300] ss:$16 sps:$4 sm:$0xff]   ;;  %v10386_v20 = vld [vmem:[#allocation10 + $0x328] ss:$16 sps:$4 sm:$0xff]  }
 0x5be   :  { %v13584_v41 = vpop.permute.xlu0 %10204  ;;  %7673 = vmatprep.subr.bf16.mxu0 %v10337_v55  ;;  %7960 = vmatprep.subr.bf16.mxu1 %v10340_v13  ;;  %v10385_v55 = vld [vmem:[#allocation10 + $0x324] ss:$16 sps:$4 sm:$0xff]   ;;  %v10388_v13 = vld [vmem:[#allocation10 + $0x32c] ss:$16 sps:$4 sm:$0xff]   ;;  %v10383_v62 = vld [vmem:[#allocation10 + $0x320] ss:$16 sps:$4 sm:$0xff]  }
 0x5bf   :  { %7703 = vmatprep.mubr.bf16.mxu0 %v5195_v4  ;;  %7990 = vmatprep.mubr.bf16.mxu1 %v5195_v4  ;;  %v10394_v4 = vld [vmem:[#allocation10 + $0x34c] ss:$16 sps:$4 sm:$0xff]  }
 0x5c1   :  { %7674 = vmatpush1.bf16.msra.mxu0 %v10335_v6  ;;  %7961 = vmatpush1.bf16.msra.mxu1 %v10338_v9  ;;  %v10391_v6 = vld [vmem:[#allocation10 + $0x344] ss:$16 sps:$4 sm:$0xff]   ;;  %v10389_v9 = vld [vmem:[#allocation10 + $0x340] ss:$16 sps:$4 sm:$0xff]  }
 0x5c2   :  { %v13586_v37 = vpop.permute.xlu0 %10214  ;;  %7675 = vmatprep.subr.bf16.mxu0 %v10343_v46  ;;  %7962 = vmatprep.subr.bf16.mxu1 %v10346_v32  ;;  %v10392_v46 = vld [vmem:[#allocation10 + $0x348] ss:$16 sps:$4 sm:$0xff]   ;;  %v10397_v32 = vld [vmem:[#allocation10 + $0x364] ss:$16 sps:$4 sm:$0xff]  }
 0x5c5   :  { %7676 = vmatpush1.bf16.msra.mxu0 %v10341_v19  ;;  %7963 = vmatpush1.bf16.msra.mxu1 %v10344_v33  ;;  %v10400_v19 = vld [vmem:[#allocation10 + $0x36c] ss:$16 sps:$4 sm:$0xff]   ;;  %v10395_v33 = vld [vmem:[#allocation10 + $0x360] ss:$16 sps:$4 sm:$0xff]  }
 0x5c6   :  { %v10225_v12 = vpop.permute.xlu0 %10224  ;;  %7677 = vmatprep.subr.bf16.mxu0 %v10349_v58  ;;  %7964 = vmatprep.subr.bf16.mxu1 %v10352_v24  ;;  %v10398_v58 = vld [vmem:[#allocation10 + $0x368] ss:$16 sps:$4 sm:$0xff]   ;;  %v10403_v24 = vld [vmem:[#allocation10 + $0x384] ss:$16 sps:$4 sm:$0xff]  }
 0x5c7   :  { %v10227_v61 = vunpack.i.h.bf16 %v10225_v12  ;;  %v10226_v56 = vunpack.i.l.bf16 %v10225_v12  ;;  %v10404_v12 = vld [vmem:[#allocation10 + $0x388] ss:$16 sps:$4 sm:$0xff]  }
 0x5c9   :  { %v5135_v22 = vsel %vm5004_vm11, %v5123_v8, %v10227_v61  ;;  %v5040_v35 = vsel %vm5004_vm11, %v5028_v18, %v10226_v56  ;;  %7678 = vmatpush1.bf16.msra.mxu0 %v10347_v51  ;;  %7965 = vmatpush1.bf16.msra.mxu1 %v10350_v49  ;;  %v10406_v51 = vld [vmem:[#allocation10 + $0x38c] ss:$16 sps:$4 sm:$0xff]   ;;  %v10401_v49 = vld [vmem:[#allocation10 + $0x380] ss:$16 sps:$4 sm:$0xff]   ;;  %v10187_v18 = vunpack.i.h.bf16 %v13568_v15  ;;  %v10196_v8 = vunpack.i.l.bf16 %v13580_v38  ;;  %v10410_v56 = vld [vmem:[#allocation10 + $0x3a8] ss:$16 sps:$4 sm:$0xff]  }
 0x5ca   :  { %v8725_v30 = vrot.slane %v5135_v22, 13  ;;  %v5048_v28 = vrot.slane %v5040_v35, 6  ;;  %7679 = vmatprep.subr.bf16.mxu0 %v10355_v34  ;;  %7966 = vmatprep.subr.bf16.mxu1 %v10358_v44  ;;  %v10409_v34 = vld [vmem:[#allocation10 + $0x3a4] ss:$16 sps:$4 sm:$0xff]   ;;  %v10412_v44 = vld [vmem:[#allocation10 + $0x3ac] ss:$16 sps:$4 sm:$0xff]  }
 0x5cb   :  { %v10407_v61 = vld [vmem:[#allocation10 + $0x3a0] ss:$16 sps:$4 sm:$0xff]   ;;  %v10415_v22 = vld [vmem:[#allocation10 + $0x3c4] ss:$16 sps:$4 sm:$0xff]   ;;  %v10418_v35 = vld [vmem:[#allocation10 + $0x3cc] ss:$16 sps:$4 sm:$0xff]  }
 0x5cc   :  { %v13593_v25 = vsel %vm2578_vm7, %v5048_v28, %v8725_v30  ;;  %v10413_v15 = vld [vmem:[#allocation10 + $0x3c0] ss:$16 sps:$4 sm:$0xff]   ;;  %v10416_v28 = vld [vmem:[#allocation10 + $0x3c8] ss:$16 sps:$4 sm:$0xff]  }
 0x5cd   :  { %7680 = vmatpush1.bf16.msra.mxu0 %v10353_v7  ;;  %7967 = vmatpush1.bf16.msra.mxu1 %v10356_v1  ;;  %v5082_v7 = vrot.slane %v13465_v45, 4  ;;  %v5102_v1 = vsel %vm5004_vm11, %v13445_v54, %v10187_v18  ;;  %v4986_v45 = vrot.slane %v14013_v16, 4  ;;  %v10425_v16 = vld [vmem:[#allocation10 + $0x400] ss:$16 sps:$4 sm:$0xff]  }
 0x5ce   :  { %7681 = vmatprep.subr.bf16.mxu0 %v10361_v39  ;;  %7968 = vmatprep.subr.bf16.mxu1 %v10364_v47  ;;  %v10192_v39 = vunpack.i.h.bf16 %v13550_v21  ;;  %v10421_v47 = vld [vmem:[#allocation10 + $0x3e4] ss:$16 sps:$4 sm:$0xff]   ;;  %v10455_v18 = vld [vmem:[#allocation10 + $0x4a0] ss:$16 sps:$4 sm:$0xff]  }
 0x5cf   :  { %v5105_v30 = vsel %vm5004_vm11, %v5082_v7, %v10196_v8  ;;  %v10427_v21 = vld [vmem:[#allocation10 + $0x404] ss:$16 sps:$4 sm:$0xff]   ;;  %v10458_v8 = vld [vmem:[#allocation10 + $0x4a8] ss:$16 sps:$4 sm:$0xff]  }
 0x5d0   :  { %v10469_v7 = vld [vmem:[#allocation10 + $0x4e4] ss:$16 sps:$4 sm:$0xff]  }
 0x5d1   :  { %7682 = vmatpush1.bf16.msra.mxu0 %v10359_v63  ;;  %7969 = vmatpush1.bf16.msra.mxu1 %v10362_v29  ;;  %v10424_v63 = vld [vmem:[#allocation10 + $0x3ec] ss:$16 sps:$4 sm:$0xff]   ;;  %v10201_v29 = vunpack.i.l.bf16 %v13552_v48 }
 0x5d2   :  { %7683 = vmatprep.subr.bf16.mxu0 %v10367_v50  ;;  %7970 = vmatprep.subr.bf16.mxu1 %v10370_v53  ;;  %v5155_v50 = vrot.slane %v5102_v1, 7  ;;  %v5158_v53 = vrot.slane %v5105_v30, 7  ;;  %v10472_v1 = vld [vmem:[#allocation10 + $0x4ec] ss:$16 sps:$4 sm:$0xff]   ;;  %v10467_v30 = vld [vmem:[#allocation10 + $0x4e0] ss:$16 sps:$4 sm:$0xff]  }
 0x5d5   :  { %7684 = vmatpush1.bf16.msra.mxu0 %v10365_v40  ;;  %7971 = vmatpush1.bf16.msra.mxu1 %v10368_v0  ;;  %v10419_v40 = vld [vmem:[#allocation10 + $0x3e0] ss:$16 sps:$4 sm:$0xff]   ;;  %v10422_v0 = vld [vmem:[#allocation10 + $0x3e8] ss:$16 sps:$4 sm:$0xff]  }
 0x5d6   :  { %7685 = vmatprep.subr.bf16.mxu0 %v10373_v26  ;;  %7972 = vmatprep.subr.bf16.mxu1 %v10376_v14  ;;  %v5007_v26 = vsel %vm5004_vm11, %v13264_v31, %v10192_v39  ;;  %v10430_v14 = vld [vmem:[#allocation10 + $0x40c] ss:$16 sps:$4 sm:$0xff]  }
 0x5d7   :  { %v10478_v39 = vld [vmem:[#allocation10 + $0x50c] ss:$16 sps:$4 sm:$0xff]  }
 0x5d9   :  { %7686 = vmatpush1.bf16.msra.mxu0 %v10371_v36  ;;  %7973 = vmatpush1.bf16.msra.mxu1 %v10374_v60  ;;  %v5010_v36 = vsel %vm5004_vm11, %v4986_v45, %v10201_v29  ;;  %v5181_v60 = vsel %vm2578_vm7, %v5007_v26, %v5155_v50  ;;  %v10481_v29 = vld [vmem:[#allocation10 + $0x524] ss:$16 sps:$4 sm:$0xff]   ;;  %v10484_v50 = vld [vmem:[#allocation10 + $0x52c] ss:$16 sps:$4 sm:$0xff]   ;;  %v10482_v45 = vld [vmem:[#allocation10 + $0x528] ss:$16 sps:$4 sm:$0xff]  }
 0x5da   :  { %7687 = vmatprep.subr.bf16.mxu0 %v10379_v59  ;;  %7974 = vmatprep.subr.bf16.mxu1 %v10382_v11  ;;  %v5184_v59 = vsel %vm2578_vm7, %v5010_v36, %v5158_v53  ;;  %v5194_v11 = vpack.c.bf16 %v5181_v60, %v5181_v60  ;;  %v10479_v53 = vld [vmem:[#allocation10 + $0x520] ss:$16 sps:$4 sm:$0xff]   ;;  %v10496_v36 = vld [vmem:[#allocation10 + $0x56c] ss:$16 sps:$4 sm:$0xff]  }
 0x5db   :  { %v10485_v26 = vld [vmem:[#allocation10 + $0x540] ss:$16 sps:$4 sm:$0xff]  }
 0x5dc   :  { %v10491_v60 = vld [vmem:[#allocation10 + $0x560] ss:$16 sps:$4 sm:$0xff]  }
 0x5dd   :  { %7688 = vmatpush1.bf16.msra.mxu0 %v10377_v27  ;;  %7975 = vmatpush1.bf16.msra.mxu1 %v10380_v3  ;;  %v10428_v27 = vld [vmem:[#allocation10 + $0x408] ss:$16 sps:$4 sm:$0xff]   ;;  %v5197_v3 = vpack.c.bf16 %v5184_v59, %v5184_v59 }
 0x5de   :  { %7689 = vmatprep.subr.bf16.mxu0 %v10385_v55  ;;  %7976 = vmatprep.subr.bf16.mxu1 %v10388_v13  ;;  %v10433_v55 = vld [vmem:[#allocation10 + $0x424] ss:$16 sps:$4 sm:$0xff]   ;;  %v10436_v13 = vld [vmem:[#allocation10 + $0x42c] ss:$16 sps:$4 sm:$0xff]   ;;  %v10494_v59 = vld [vmem:[#allocation10 + $0x568] ss:$16 sps:$4 sm:$0xff]  }
 0x5e1   :  { %7690 = vmatpush1.bf16.msra.mxu0 %v10383_v62  ;;  %7977 = vmatpush1.bf16.msra.mxu1 %v10386_v20  ;;  %v10431_v62 = vld [vmem:[#allocation10 + $0x420] ss:$16 sps:$4 sm:$0xff]   ;;  %v10434_v20 = vld [vmem:[#allocation10 + $0x428] ss:$16 sps:$4 sm:$0xff]  }
 0x5e2   :  { %7691 = vmatprep.subr.bf16.mxu0 %v10391_v6  ;;  %7978 = vmatprep.subr.bf16.mxu1 %v10394_v4  ;;  %v10439_v6 = vld [vmem:[#allocation10 + $0x444] ss:$16 sps:$4 sm:$0xff]   ;;  %v10442_v4 = vld [vmem:[#allocation10 + $0x44c] ss:$16 sps:$4 sm:$0xff]  }
 0x5e5   :  { %7692 = vmatpush1.bf16.msra.mxu0 %v10389_v9  ;;  %7979 = vmatpush1.bf16.msra.mxu1 %v10392_v46  ;;  %v10437_v9 = vld [vmem:[#allocation10 + $0x440] ss:$16 sps:$4 sm:$0xff]   ;;  %v10440_v46 = vld [vmem:[#allocation10 + $0x448] ss:$16 sps:$4 sm:$0xff]  }
 0x5e6   :  { %7693 = vmatprep.subr.bf16.mxu0 %v10397_v32  ;;  %7980 = vmatprep.subr.bf16.mxu1 %v10400_v19  ;;  %v10445_v32 = vld [vmem:[#allocation10 + $0x464] ss:$16 sps:$4 sm:$0xff]   ;;  %v10448_v19 = vld [vmem:[#allocation10 + $0x46c] ss:$16 sps:$4 sm:$0xff]  }
 0x5e9   :  { %7694 = vmatpush1.bf16.msra.mxu0 %v10395_v33  ;;  %7981 = vmatpush1.bf16.msra.mxu1 %v10398_v58  ;;  %v10443_v33 = vld [vmem:[#allocation10 + $0x460] ss:$16 sps:$4 sm:$0xff]   ;;  %v10446_v58 = vld [vmem:[#allocation10 + $0x468] ss:$16 sps:$4 sm:$0xff]  }
 0x5ea   :  { %7695 = vmatprep.subr.bf16.mxu0 %v10403_v24  ;;  %7982 = vmatprep.subr.bf16.mxu1 %v10406_v51  ;;  %v10451_v24 = vld [vmem:[#allocation10 + $0x484] ss:$16 sps:$4 sm:$0xff]   ;;  %v10454_v51 = vld [vmem:[#allocation10 + $0x48c] ss:$16 sps:$4 sm:$0xff]  }
 0x5ed   :  { %7696 = vmatpush1.bf16.msra.mxu0 %v10401_v49  ;;  %7983 = vmatpush1.bf16.msra.mxu1 %v10404_v12  ;;  %v10449_v49 = vld [vmem:[#allocation10 + $0x480] ss:$16 sps:$4 sm:$0xff]   ;;  %v10452_v12 = vld [vmem:[#allocation10 + $0x488] ss:$16 sps:$4 sm:$0xff]  }
 0x5ee   :  { %7697 = vmatprep.subr.bf16.mxu0 %v10409_v34  ;;  %7984 = vmatprep.subr.bf16.mxu1 %v10412_v44  ;;  %v10457_v34 = vld [vmem:[#allocation10 + $0x4a4] ss:$16 sps:$4 sm:$0xff]   ;;  %v10460_v44 = vld [vmem:[#allocation10 + $0x4ac] ss:$16 sps:$4 sm:$0xff]  }
 0x5f1   :  { %7698 = vmatpush1.bf16.msra.mxu0 %v10407_v61  ;;  %7985 = vmatpush1.bf16.msra.mxu1 %v10410_v56  ;;  %v10463_v61 = vld [vmem:[#allocation10 + $0x4c4] ss:$16 sps:$4 sm:$0xff]   ;;  %v10466_v56 = vld [vmem:[#allocation10 + $0x4cc] ss:$16 sps:$4 sm:$0xff]  }
 0x5f2   :  { %7699 = vmatprep.subr.bf16.mxu0 %v10415_v22  ;;  %7986 = vmatprep.subr.bf16.mxu1 %v10418_v35  ;;  %v10461_v22 = vld [vmem:[#allocation10 + $0x4c0] ss:$16 sps:$4 sm:$0xff]   ;;  %v10464_v35 = vld [vmem:[#allocation10 + $0x4c8] ss:$16 sps:$4 sm:$0xff]  }
 0x5f5   :  { %7700 = vmatpush1.bf16.msra.mxu0 %v10413_v15  ;;  %7987 = vmatpush1.bf16.msra.mxu1 %v10416_v28  ;;  %v10470_v15 = vld [vmem:[#allocation10 + $0x4e8] ss:$16 sps:$4 sm:$0xff]   ;;  %v10475_v28 = vld [vmem:[#allocation10 + $0x504] ss:$16 sps:$4 sm:$0xff]  }
 0x5f6   :  { %7701 = vmatprep.subr.bf16.mxu0 %v10421_v47  ;;  %7988 = vmatprep.subr.bf16.mxu1 %v10424_v63  ;;  %v10473_v47 = vld [vmem:[#allocation10 + $0x500] ss:$16 sps:$4 sm:$0xff]   ;;  %v10476_v63 = vld [vmem:[#allocation10 + $0x508] ss:$16 sps:$4 sm:$0xff]  }
 0x5f9   :  { %7702 = vmatpush1.bf16.msra.mxu0 %v10419_v40  ;;  %7989 = vmatpush1.bf16.msra.mxu1 %v10422_v0  ;;  %v10487_v40 = vld [vmem:[#allocation10 + $0x544] ss:$16 sps:$4 sm:$0xff]   ;;  %v10490_v0 = vld [vmem:[#allocation10 + $0x54c] ss:$16 sps:$4 sm:$0xff]  }
 0x5fa   :  { %7712 = vmatprep.subr.bf16.mxu0 %v10427_v21  ;;  %7999 = vmatprep.subr.bf16.mxu1 %v10430_v14  ;;  %v10488_v21 = vld [vmem:[#allocation10 + $0x548] ss:$16 sps:$4 sm:$0xff]   ;;  %v10493_v14 = vld [vmem:[#allocation10 + $0x564] ss:$16 sps:$4 sm:$0xff]  }
 0x5fc   :  { %7704 = vmatmul.mubr.bf16.vlgmr.msra.gmra.mrb[56].mxu0 %v5194_v11  ;;  %7991 = vmatmul.mubr.bf16.vlgmr.msra.gmra.mrb[64].mxu1 %v5194_v11  ;;  %v10502_v11 = vld [vmem:[#allocation10 + $0x58c] ss:$16 sps:$4 sm:$0xff]  }
 0x5fd   :  { %7713 = vmatpush1.bf16.msra.mxu0 %v10425_v16  ;;  %7744 = vmatprep.mubr.bf16.mxu0 %v5197_v3  ;;  %v10499_v16 = vld [vmem:[#allocation10 + $0x584] ss:$16 sps:$4 sm:$0xff]  }
 0x5fe   :  { %8000 = vmatpush1.bf16.msra.mxu1 %v10428_v27  ;;  %8031 = vmatprep.mubr.bf16.mxu1 %v5197_v3  ;;  %v10497_v27 = vld [vmem:[#allocation10 + $0x580] ss:$16 sps:$4 sm:$0xff]   ;;  %v10500_v3 = vld [vmem:[#allocation10 + $0x588] ss:$16 sps:$4 sm:$0xff]  }
 0x5ff   :  { %7714 = vmatprep.subr.bf16.mxu0 %v10433_v55  ;;  %8001 = vmatprep.subr.bf16.mxu1 %v10436_v13  ;;  %v10505_v55 = vld [vmem:[#allocation10 + $0x5a4] ss:$16 sps:$4 sm:$0xff]   ;;  %v10508_v13 = vld [vmem:[#allocation10 + $0x5ac] ss:$16 sps:$4 sm:$0xff]  }
 0x601   :  { %7715 = vmatpush1.bf16.msra.mxu0 %v10431_v62  ;;  %v10197_v62 = vunpack.i.h.bf16 %v13580_v38  ;;  %v10202_v38 = vunpack.i.h.bf16 %v13552_v48  ;;  %v4998_v48 = vrot.slane %v13264_v31, 4  ;;  %v10529_v31 = vld [vmem:[#allocation10 + $0x624] ss:$16 sps:$4 sm:$0xff]  }
 0x602   :  { %8002 = vmatpush1.bf16.msra.mxu1 %v10434_v20  ;;  %7716 = vmatprep.subr.bf16.mxu0 %v10439_v6  ;;  %v10503_v20 = vld [vmem:[#allocation10 + $0x5a0] ss:$16 sps:$4 sm:$0xff]   ;;  %v5075_v6 = vrot.slane %v13473_v42, 2 }
 0x603   :  { %8003 = vmatprep.subr.bf16.mxu1 %v10442_v4  ;;  %v10206_v4 = vunpack.i.l.bf16 %v13584_v41 }
 0x605   :  { %7717 = vmatpush1.bf16.msra.mxu0 %v10437_v9  ;;  %v10506_v9 = vld [vmem:[#allocation10 + $0x5a8] ss:$16 sps:$4 sm:$0xff]  }
 0x606   :  { %8004 = vmatpush1.bf16.msra.mxu1 %v10440_v46  ;;  %7718 = vmatprep.subr.bf16.mxu0 %v10445_v32  ;;  %v10511_v46 = vld [vmem:[#allocation10 + $0x5c4] ss:$16 sps:$4 sm:$0xff]   ;;  %v10514_v32 = vld [vmem:[#allocation10 + $0x5cc] ss:$16 sps:$4 sm:$0xff]  }
 0x607   :  { %8005 = vmatprep.subr.bf16.mxu1 %v10448_v19  ;;  %v5104_v19 = vsel %vm5004_vm11, %v5075_v6, %v10197_v62  ;;  %v10554_v62 = vld [vmem:[#allocation10 + $0x6a8] ss:$16 sps:$4 sm:$0xff]   ;;  %v10562_v6 = vld [vmem:[#allocation10 + $0x6cc] ss:$16 sps:$4 sm:$0xff]  }
 0x609   :  { %7719 = vmatpush1.bf16.msra.mxu0 %v10443_v33  ;;  %v5094_v33 = vrot.slane %v13445_v54, 4  ;;  %v10515_v54 = vld [vmem:[#allocation10 + $0x5e0] ss:$16 sps:$4 sm:$0xff]  }
 0x60a   :  { %8006 = vmatpush1.bf16.msra.mxu1 %v10446_v58  ;;  %7720 = vmatprep.subr.bf16.mxu0 %v10451_v24  ;;  %v10509_v58 = vld [vmem:[#allocation10 + $0x5c0] ss:$16 sps:$4 sm:$0xff]  }
 0x60b   :  { %8007 = vmatprep.subr.bf16.mxu1 %v10454_v51  ;;  %v5107_v24 = vsel %vm5004_vm11, %v5094_v33, %v10206_v4  ;;  %v10512_v51 = vld [vmem:[#allocation10 + $0x5c8] ss:$16 sps:$4 sm:$0xff]   ;;  %v10557_v4 = vld [vmem:[#allocation10 + $0x6c0] ss:$16 sps:$4 sm:$0xff]  }
 0x60c   :  { %v10566_v33 = vld [vmem:[#allocation10 + $0x6e8] ss:$16 sps:$4 sm:$0xff]  }
 0x60d   :  { %7721 = vmatpush1.bf16.msra.mxu0 %v10449_v49  ;;  %v10517_v49 = vld [vmem:[#allocation10 + $0x5e4] ss:$16 sps:$4 sm:$0xff]  }
 0x60e   :  { %8008 = vmatpush1.bf16.msra.mxu1 %v10452_v12  ;;  %7722 = vmatprep.subr.bf16.mxu0 %v10457_v34  ;;  %v5157_v12 = vrot.slane %v5104_v19, 7  ;;  %v10520_v34 = vld [vmem:[#allocation10 + $0x5ec] ss:$16 sps:$4 sm:$0xff]   ;;  %v10563_v19 = vld [vmem:[#allocation10 + $0x6e0] ss:$16 sps:$4 sm:$0xff]  }
 0x60f   :  { %8009 = vmatprep.subr.bf16.mxu1 %v10460_v44  ;;  %v14015_v44 = vld [vmem:[#allocation23_spill] sm:$0xff] }
 0x611   :  { %7723 = vmatpush1.bf16.msra.mxu0 %v10455_v18  ;;  %v4979_v18 = vrot.slane %v14015_v44, 2 }
 0x612   :  { %8010 = vmatpush1.bf16.msra.mxu1 %v10458_v8  ;;  %7724 = vmatprep.subr.bf16.mxu0 %v10463_v61  ;;  %v10211_v8 = vunpack.i.l.bf16 %v13554_v17  ;;  %v5160_v61 = vrot.slane %v5107_v24, 7  ;;  %v10569_v24 = vld [vmem:[#allocation10 + $0x700] ss:$16 sps:$4 sm:$0xff]  }
 0x613   :  { %8011 = vmatprep.subr.bf16.mxu1 %v10466_v56  ;;  %v5009_v56 = vsel %vm5004_vm11, %v4979_v18, %v10202_v38  ;;  %v10574_v38 = vld [vmem:[#allocation10 + $0x70c] ss:$16 sps:$4 sm:$0xff]   ;;  %v10578_v18 = vld [vmem:[#allocation10 + $0x728] ss:$16 sps:$4 sm:$0xff]  }
 0x615   :  { %7725 = vmatpush1.bf16.msra.mxu0 %v10461_v22  ;;  %v10518_v22 = vld [vmem:[#allocation10 + $0x5e8] ss:$16 sps:$4 sm:$0xff]  }
 0x616   :  { %8012 = vmatpush1.bf16.msra.mxu1 %v10464_v35  ;;  %7726 = vmatprep.subr.bf16.mxu0 %v10469_v7  ;;  %v10523_v35 = vld [vmem:[#allocation10 + $0x604] ss:$16 sps:$4 sm:$0xff]   ;;  %v5183_v7 = vsel %vm2578_vm7, %v5009_v56, %v5157_v12  ;;  %v10580_v12 = vld [vmem:[#allocation10 + $0x72c] ss:$16 sps:$4 sm:$0xff]   ;;  %v10584_v56 = vld [vmem:[#allocation10 + $0x748] ss:$16 sps:$4 sm:$0xff]  }
 0x617   :  { %8013 = vmatprep.subr.bf16.mxu1 %v10472_v1  ;;  %v10526_v1 = vld [vmem:[#allocation10 + $0x60c] ss:$16 sps:$4 sm:$0xff]  }
 0x619   :  { %7727 = vmatpush1.bf16.msra.mxu0 %v10467_v30  ;;  %v5012_v30 = vsel %vm5004_vm11, %v4998_v48, %v10211_v8  ;;  %v10583_v8 = vld [vmem:[#allocation10 + $0x744] ss:$16 sps:$4 sm:$0xff]  }
 0x61a   :  { %8014 = vmatpush1.bf16.msra.mxu1 %v10470_v15  ;;  %7728 = vmatprep.subr.bf16.mxu0 %v10475_v28  ;;  %v10521_v15 = vld [vmem:[#allocation10 + $0x600] ss:$16 sps:$4 sm:$0xff]   ;;  %v5186_v28 = vsel %vm2578_vm7, %v5012_v30, %v5160_v61  ;;  %v10586_v61 = vld [vmem:[#allocation10 + $0x74c] ss:$16 sps:$4 sm:$0xff]   ;;  %v10589_v48 = vld [vmem:[#allocation10 + $0x764] ss:$16 sps:$4 sm:$0xff]  }
 0x61b   :  { %8015 = vmatprep.subr.bf16.mxu1 %v10478_v39  ;;  %v5196_v39 = vpack.c.bf16 %v5183_v7, %v5183_v7  ;;  %v10590_v7 = vld [vmem:[#allocation10 + $0x768] ss:$16 sps:$4 sm:$0xff]   ;;  %v10598_v30 = vld [vmem:[#allocation10 + $0x78c] ss:$16 sps:$4 sm:$0xff]  }
 0x61d   :  { %7729 = vmatpush1.bf16.msra.mxu0 %v10473_v47  ;;  %v10524_v47 = vld [vmem:[#allocation10 + $0x608] ss:$16 sps:$4 sm:$0xff]  }
 0x61e   :  { %8016 = vmatpush1.bf16.msra.mxu1 %v10476_v63  ;;  %7730 = vmatprep.subr.bf16.mxu0 %v10481_v29  ;;  %v5199_v63 = vpack.c.bf16 %v5186_v28, %v5186_v28  ;;  %v10532_v29 = vld [vmem:[#allocation10 + $0x62c] ss:$16 sps:$4 sm:$0xff]   ;;  %v10596_v28 = vld [vmem:[#allocation10 + $0x788] ss:$16 sps:$4 sm:$0xff]  }
 0x61f   :  { %8017 = vmatprep.subr.bf16.mxu1 %v10484_v50  ;;  %v10527_v50 = vld [vmem:[#allocation10 + $0x620] ss:$16 sps:$4 sm:$0xff]  }
 0x621   :  { %7731 = vmatpush1.bf16.msra.mxu0 %v10479_v53  ;;  %v10530_v53 = vld [vmem:[#allocation10 + $0x628] ss:$16 sps:$4 sm:$0xff]  }
 0x622   :  { %8018 = vmatpush1.bf16.msra.mxu1 %v10482_v45  ;;  %7732 = vmatprep.subr.bf16.mxu0 %v10487_v40  ;;  %v10535_v45 = vld [vmem:[#allocation10 + $0x644] ss:$16 sps:$4 sm:$0xff]   ;;  %v10538_v40 = vld [vmem:[#allocation10 + $0x64c] ss:$16 sps:$4 sm:$0xff]  }
 0x623   :  { %8019 = vmatprep.subr.bf16.mxu1 %v10490_v0  ;;  %v10533_v0 = vld [vmem:[#allocation10 + $0x640] ss:$16 sps:$4 sm:$0xff]  }
 0x625   :  { %7733 = vmatpush1.bf16.msra.mxu0 %v10485_v26  ;;  %v10536_v26 = vld [vmem:[#allocation10 + $0x648] ss:$16 sps:$4 sm:$0xff]  }
 0x626   :  { %8020 = vmatpush1.bf16.msra.mxu1 %v10488_v21  ;;  %7734 = vmatprep.subr.bf16.mxu0 %v10493_v14  ;;  %v10541_v21 = vld [vmem:[#allocation10 + $0x664] ss:$16 sps:$4 sm:$0xff]   ;;  %v10544_v14 = vld [vmem:[#allocation10 + $0x66c] ss:$16 sps:$4 sm:$0xff]  }
 0x627   :  { %8021 = vmatprep.subr.bf16.mxu1 %v10496_v36  ;;  %v10539_v36 = vld [vmem:[#allocation10 + $0x660] ss:$16 sps:$4 sm:$0xff]  }
 0x629   :  { %7735 = vmatpush1.bf16.msra.mxu0 %v10491_v60  ;;  %v10542_v60 = vld [vmem:[#allocation10 + $0x668] ss:$16 sps:$4 sm:$0xff]  }
 0x62a   :  { %8022 = vmatpush1.bf16.msra.mxu1 %v10494_v59  ;;  %7736 = vmatprep.subr.bf16.mxu0 %v10499_v16  ;;  %v10547_v59 = vld [vmem:[#allocation10 + $0x684] ss:$16 sps:$4 sm:$0xff]   ;;  %v10550_v16 = vld [vmem:[#allocation10 + $0x68c] ss:$16 sps:$4 sm:$0xff]  }
 0x62b   :  { %8023 = vmatprep.subr.bf16.mxu1 %v10502_v11  ;;  %v10545_v11 = vld [vmem:[#allocation10 + $0x680] ss:$16 sps:$4 sm:$0xff]  }
 0x62d   :  { %7737 = vmatpush1.bf16.msra.mxu0 %v10497_v27  ;;  %v10548_v27 = vld [vmem:[#allocation10 + $0x688] ss:$16 sps:$4 sm:$0xff]  }
 0x62e   :  { %8024 = vmatpush1.bf16.msra.mxu1 %v10500_v3  ;;  %7738 = vmatprep.subr.bf16.mxu0 %v10505_v55  ;;  %v10553_v3 = vld [vmem:[#allocation10 + $0x6a4] ss:$16 sps:$4 sm:$0xff]   ;;  %v10556_v55 = vld [vmem:[#allocation10 + $0x6ac] ss:$16 sps:$4 sm:$0xff]  }
 0x62f   :  { %8025 = vmatprep.subr.bf16.mxu1 %v10508_v13  ;;  %v10551_v13 = vld [vmem:[#allocation10 + $0x6a0] ss:$16 sps:$4 sm:$0xff]  }
 0x631   :  { %7739 = vmatpush1.bf16.msra.mxu0 %v10503_v20  ;;  %v10559_v20 = vld [vmem:[#allocation10 + $0x6c4] ss:$16 sps:$4 sm:$0xff]  }
 0x632   :  { %8026 = vmatpush1.bf16.msra.mxu1 %v10506_v9  ;;  %7740 = vmatprep.subr.bf16.mxu0 %v10511_v46  ;;  %v10560_v9 = vld [vmem:[#allocation10 + $0x6c8] ss:$16 sps:$4 sm:$0xff]   ;;  %v10565_v46 = vld [vmem:[#allocation10 + $0x6e4] ss:$16 sps:$4 sm:$0xff]  }
 0x633   :  { %8027 = vmatprep.subr.bf16.mxu1 %v10514_v32  ;;  %v10568_v32 = vld [vmem:[#allocation10 + $0x6ec] ss:$16 sps:$4 sm:$0xff]  }
 0x635   :  { %7741 = vmatpush1.bf16.msra.mxu0 %v10509_v58  ;;  %v10571_v58 = vld [vmem:[#allocation10 + $0x704] ss:$16 sps:$4 sm:$0xff]  }
 0x636   :  { %8028 = vmatpush1.bf16.msra.mxu1 %v10512_v51  ;;  %7742 = vmatprep.subr.bf16.mxu0 %v10517_v49  ;;  %v10572_v51 = vld [vmem:[#allocation10 + $0x708] ss:$16 sps:$4 sm:$0xff]   ;;  %v10577_v49 = vld [vmem:[#allocation10 + $0x724] ss:$16 sps:$4 sm:$0xff]  }
 0x637   :  { %8029 = vmatprep.subr.bf16.mxu1 %v10520_v34  ;;  %v10575_v34 = vld [vmem:[#allocation10 + $0x720] ss:$16 sps:$4 sm:$0xff]  }
 0x639   :  { %7743 = vmatpush1.bf16.msra.mxu0 %v10515_v54  ;;  %v10581_v54 = vld [vmem:[#allocation10 + $0x740] ss:$16 sps:$4 sm:$0xff]  }
 0x63a   :  { %8030 = vmatpush1.bf16.msra.mxu1 %v10518_v22  ;;  %7753 = vmatprep.subr.bf16.mxu0 %v10523_v35  ;;  %v10592_v22 = vld [vmem:[#allocation10 + $0x76c] ss:$16 sps:$4 sm:$0xff]   ;;  %v10587_v35 = vld [vmem:[#allocation10 + $0x760] ss:$16 sps:$4 sm:$0xff]  }
 0x63b   :  { %8040 = vmatprep.subr.bf16.mxu1 %v10526_v1  ;;  %v10595_v1 = vld [vmem:[#allocation10 + $0x784] ss:$16 sps:$4 sm:$0xff]  }
 0x63c   :  { %7745 = vmatmul.mubr.bf16.vlgmr.msra.gmra.mrb[56].mxu0 %v5196_v39 }
 0x63d   :  { %8032 = vmatmul.mubr.bf16.vlgmr.msra.gmra.mrb[64].mxu1 %v5196_v39  ;;  %7754 = vmatpush1.bf16.msra.mxu0 %v10521_v15  ;;  %v10593_v15 = vld [vmem:[#allocation10 + $0x780] ss:$16 sps:$4 sm:$0xff]   ;;  %v10601_v39 = vld [vmem:[#allocation10 + $0x7a4] ss:$16 sps:$4 sm:$0xff]  }
 0x63e   :  { %7785 = vmatprep.mubr.bf16.mxu0 %v5199_v63  ;;  %8041 = vmatpush1.bf16.msra.mxu1 %v10524_v47  ;;  %v10604_v47 = vld [vmem:[#allocation10 + $0x7ac] ss:$16 sps:$4 sm:$0xff]  }
 0x63f   :  { %8072 = vmatprep.mubr.bf16.mxu1 %v5199_v63  ;;  %7755 = vmatprep.subr.bf16.mxu0 %v10529_v31  ;;  %v10207_v31 = vunpack.i.h.bf16 %v13584_v41  ;;  %v10599_v63 = vld [vmem:[#allocation10 + $0x7a0] ss:$16 sps:$4 sm:$0xff]   ;;  %v10212_v41 = vunpack.i.h.bf16 %v13554_v17 }
 0x640   :  { %8042 = vmatprep.subr.bf16.mxu1 %v10532_v29  ;;  %v5088_v29 = vrot.slane %v13395_v10, 4 }
 0x641   :  { %7756 = vmatpush1.bf16.msra.mxu0 %v10527_v50  ;;  %v10217_v50 = vunpack.i.h.bf16 %v13586_v37 }
 0x642   :  { %8043 = vmatpush1.bf16.msra.mxu1 %v10530_v53  ;;  %7757 = vmatprep.subr.bf16.mxu0 %v10535_v45  ;;  %v10216_v53 = vunpack.i.l.bf16 %v13586_v37  ;;  %v10602_v45 = vld [vmem:[#allocation10 + $0x7a8] ss:$16 sps:$4 sm:$0xff]  }
 0x643   :  { %8044 = vmatprep.subr.bf16.mxu1 %v10538_v40  ;;  %v10607_v40 = vld [vmem:[#allocation10 + $0x7c4] ss:$16 sps:$4 sm:$0xff]   ;;  %v10608_v37 = vld [vmem:[#allocation10 + $0x7c8] ss:$16 sps:$4 sm:$0xff]  }
 0x644   :  { %v5038_v10 = vsel %vm5004_vm11, %v14015_v44, %v10216_v53  ;;  %v10668_v53 = vld [vmem:[#allocation10 + $0x908] ss:$16 sps:$4 sm:$0xff]  }
 0x645   :  { %7758 = vmatpush1.bf16.msra.mxu0 %v10533_v0  ;;  %v10610_v0 = vld [vmem:[#allocation10 + $0x7cc] ss:$16 sps:$4 sm:$0xff]  }
 0x646   :  { %8045 = vmatpush1.bf16.msra.mxu1 %v10536_v26  ;;  %7759 = vmatprep.subr.bf16.mxu0 %v10541_v21  ;;  %v5106_v26 = vsel %vm5004_vm11, %v5088_v29, %v10207_v31  ;;  %v10605_v21 = vld [vmem:[#allocation10 + $0x7c0] ss:$16 sps:$4 sm:$0xff]   ;;  %v10662_v31 = vld [vmem:[#allocation10 + $0x8e8] ss:$16 sps:$4 sm:$0xff]   ;;  %v10670_v29 = vld [vmem:[#allocation10 + $0x90c] ss:$16 sps:$4 sm:$0xff]  }
 0x647   :  { %8046 = vmatprep.subr.bf16.mxu1 %v10544_v14  ;;  %v5133_v14 = vsel %vm5004_vm11, %v13473_v42, %v10217_v50  ;;  %v10614_v42 = vld [vmem:[#allocation10 + $0x7e8] ss:$16 sps:$4 sm:$0xff]   ;;  %v10665_v50 = vld [vmem:[#allocation10 + $0x900] ss:$16 sps:$4 sm:$0xff]  }
 0x649   :  { %7760 = vmatpush1.bf16.msra.mxu0 %v10539_v36  ;;  %v10613_v36 = vld [vmem:[#allocation10 + $0x7e4] ss:$16 sps:$4 sm:$0xff]  }
 0x64a   :  { %8047 = vmatpush1.bf16.msra.mxu1 %v10542_v60  ;;  %7761 = vmatprep.subr.bf16.mxu0 %v10547_v59  ;;  %v5159_v60 = vrot.slane %v5106_v26, 7  ;;  %v10616_v59 = vld [vmem:[#allocation10 + $0x7ec] ss:$16 sps:$4 sm:$0xff]   ;;  %v10674_v26 = vld [vmem:[#allocation10 + $0x928] ss:$16 sps:$4 sm:$0xff]  }
 0x64b   :  { %8048 = vmatprep.subr.bf16.mxu1 %v10550_v16  ;;  %v4992_v16 = vrot.slane %v13224_v5, 4 }
 0x64d   :  { %7762 = vmatpush1.bf16.msra.mxu0 %v10545_v11  ;;  %v8723_v11 = vrot.slane %v5133_v14, 13  ;;  %v5011_v17 = vsel %vm5004_vm11, %v4992_v16, %v10212_v41  ;;  %v10682_v41 = vld [vmem:[#allocation10 + $0x94c] ss:$16 sps:$4 sm:$0xff]   ;;  %v10677_v14 = vld [vmem:[#allocation10 + $0x940] ss:$16 sps:$4 sm:$0xff]  }
 0x64e   :  { %8049 = vmatpush1.bf16.msra.mxu1 %v10548_v27  ;;  %7763 = vmatprep.subr.bf16.mxu0 %v10553_v3  ;;  %v5046_v27 = vrot.slane %v5038_v10, 6  ;;  %v10611_v3 = vld [vmem:[#allocation10 + $0x7e0] ss:$16 sps:$4 sm:$0xff]   ;;  %v5185_v44 = vsel %vm2578_vm7, %v5011_v17, %v5159_v60  ;;  %v10680_v10 = vld [vmem:[#allocation10 + $0x948] ss:$16 sps:$4 sm:$0xff]  }
 0x64f   :  { %8050 = vmatprep.subr.bf16.mxu1 %v10556_v55  ;;  %v10619_v55 = vld [vmem:[#allocation10 + $0x804] ss:$16 sps:$4 sm:$0xff]   ;;  %v5198_v5 = vpack.c.bf16 %v5185_v44, %v5185_v44  ;;  %v10683_v60 = vld [vmem:[#allocation10 + $0x960] ss:$16 sps:$4 sm:$0xff]   ;;  %v10221_v44 = vunpack.i.l.bf16 %v13556_v43 }
 0x650   :  { %v10691_v16 = vld [vmem:[#allocation10 + $0x984] ss:$16 sps:$4 sm:$0xff]  }
 0x651   :  { %7764 = vmatpush1.bf16.msra.mxu0 %v10551_v13  ;;  %v10622_v13 = vld [vmem:[#allocation10 + $0x80c] ss:$16 sps:$4 sm:$0xff]   ;;  %v10697_v17 = vld [vmem:[#allocation10 + $0x9a4] ss:$16 sps:$4 sm:$0xff]  }
 0x652   :  { %8051 = vmatpush1.bf16.msra.mxu1 %v10554_v62  ;;  %7765 = vmatprep.subr.bf16.mxu0 %v10559_v20  ;;  %v10617_v62 = vld [vmem:[#allocation10 + $0x800] ss:$16 sps:$4 sm:$0xff]   ;;  %v5188_v20 = vsel %vm2578_vm7, %v5046_v27, %v8723_v11  ;;  %v10694_v11 = vld [vmem:[#allocation10 + $0x98c] ss:$16 sps:$4 sm:$0xff]  }
 0x653   :  { %8052 = vmatprep.subr.bf16.mxu1 %v10562_v6  ;;  %v10620_v6 = vld [vmem:[#allocation10 + $0x808] ss:$16 sps:$4 sm:$0xff]   ;;  %v10689_v27 = vld [vmem:[#allocation10 + $0x980] ss:$16 sps:$4 sm:$0xff]  }
 0x655   :  { %7766 = vmatpush1.bf16.msra.mxu0 %v10557_v4  ;;  %v10625_v4 = vld [vmem:[#allocation10 + $0x824] ss:$16 sps:$4 sm:$0xff]  }
 0x656   :  { %8053 = vmatpush1.bf16.msra.mxu1 %v10560_v9  ;;  %7767 = vmatprep.subr.bf16.mxu0 %v10565_v46  ;;  %v5201_v9 = vpack.c.bf16 %v5188_v20, %v5188_v20  ;;  %v10628_v46 = vld [vmem:[#allocation10 + $0x82c] ss:$16 sps:$4 sm:$0xff]   ;;  %v10703_v20 = vld [vmem:[#allocation10 + $0x9c4] ss:$16 sps:$4 sm:$0xff]  }
 0x657   :  { %8054 = vmatprep.subr.bf16.mxu1 %v10568_v32  ;;  %v10623_v32 = vld [vmem:[#allocation10 + $0x820] ss:$16 sps:$4 sm:$0xff]  }
 0x659   :  { %7768 = vmatpush1.bf16.msra.mxu0 %v10563_v19  ;;  %v10626_v19 = vld [vmem:[#allocation10 + $0x828] ss:$16 sps:$4 sm:$0xff]  }
 0x65a   :  { %8055 = vmatpush1.bf16.msra.mxu1 %v10566_v33  ;;  %7769 = vmatprep.subr.bf16.mxu0 %v10571_v58  ;;  %v10631_v33 = vld [vmem:[#allocation10 + $0x844] ss:$16 sps:$4 sm:$0xff]   ;;  %v10634_v58 = vld [vmem:[#allocation10 + $0x84c] ss:$16 sps:$4 sm:$0xff]  }
 0x65b   :  { %8056 = vmatprep.subr.bf16.mxu1 %v10574_v38  ;;  %v10629_v38 = vld [vmem:[#allocation10 + $0x840] ss:$16 sps:$4 sm:$0xff]  }
 0x65d   :  { %7770 = vmatpush1.bf16.msra.mxu0 %v10569_v24  ;;  %v10632_v24 = vld [vmem:[#allocation10 + $0x848] ss:$16 sps:$4 sm:$0xff]  }
 0x65e   :  { %8057 = vmatpush1.bf16.msra.mxu1 %v10572_v51  ;;  %7771 = vmatprep.subr.bf16.mxu0 %v10577_v49  ;;  %v10637_v51 = vld [vmem:[#allocation10 + $0x864] ss:$16 sps:$4 sm:$0xff]   ;;  %v10640_v49 = vld [vmem:[#allocation10 + $0x86c] ss:$16 sps:$4 sm:$0xff]  }
 0x65f   :  { %8058 = vmatprep.subr.bf16.mxu1 %v10580_v12  ;;  %v10635_v12 = vld [vmem:[#allocation10 + $0x860] ss:$16 sps:$4 sm:$0xff]  }
 0x661   :  { %7772 = vmatpush1.bf16.msra.mxu0 %v10575_v34  ;;  %v10638_v34 = vld [vmem:[#allocation10 + $0x868] ss:$16 sps:$4 sm:$0xff]  }
 0x662   :  { %8059 = vmatpush1.bf16.msra.mxu1 %v10578_v18  ;;  %7773 = vmatprep.subr.bf16.mxu0 %v10583_v8  ;;  %v10643_v18 = vld [vmem:[#allocation10 + $0x884] ss:$16 sps:$4 sm:$0xff]   ;;  %v10646_v8 = vld [vmem:[#allocation10 + $0x88c] ss:$16 sps:$4 sm:$0xff]  }
 0x663   :  { %8060 = vmatprep.subr.bf16.mxu1 %v10586_v61  ;;  %v10641_v61 = vld [vmem:[#allocation10 + $0x880] ss:$16 sps:$4 sm:$0xff]  }
 0x665   :  { %7774 = vmatpush1.bf16.msra.mxu0 %v10581_v54  ;;  %v10644_v54 = vld [vmem:[#allocation10 + $0x888] ss:$16 sps:$4 sm:$0xff]  }
 0x666   :  { %8061 = vmatpush1.bf16.msra.mxu1 %v10584_v56  ;;  %7775 = vmatprep.subr.bf16.mxu0 %v10589_v48  ;;  %v10649_v56 = vld [vmem:[#allocation10 + $0x8a4] ss:$16 sps:$4 sm:$0xff]   ;;  %v10652_v48 = vld [vmem:[#allocation10 + $0x8ac] ss:$16 sps:$4 sm:$0xff]  }
 0x667   :  { %8062 = vmatprep.subr.bf16.mxu1 %v10592_v22  ;;  %v10647_v22 = vld [vmem:[#allocation10 + $0x8a0] ss:$16 sps:$4 sm:$0xff]  }
 0x669   :  { %7776 = vmatpush1.bf16.msra.mxu0 %v10587_v35  ;;  %v10650_v35 = vld [vmem:[#allocation10 + $0x8a8] ss:$16 sps:$4 sm:$0xff]  }
 0x66a   :  { %8063 = vmatpush1.bf16.msra.mxu1 %v10590_v7  ;;  %7777 = vmatprep.subr.bf16.mxu0 %v10595_v1  ;;  %v10655_v7 = vld [vmem:[#allocation10 + $0x8c4] ss:$16 sps:$4 sm:$0xff]   ;;  %v10658_v1 = vld [vmem:[#allocation10 + $0x8cc] ss:$16 sps:$4 sm:$0xff]  }
 0x66b   :  { %8064 = vmatprep.subr.bf16.mxu1 %v10598_v30  ;;  %v10653_v30 = vld [vmem:[#allocation10 + $0x8c0] ss:$16 sps:$4 sm:$0xff]  }
 0x66d   :  { %7778 = vmatpush1.bf16.msra.mxu0 %v10593_v15  ;;  %v10656_v15 = vld [vmem:[#allocation10 + $0x8c8] ss:$16 sps:$4 sm:$0xff]  }
 0x66e   :  { %8065 = vmatpush1.bf16.msra.mxu1 %v10596_v28  ;;  %7779 = vmatprep.subr.bf16.mxu0 %v10601_v39  ;;  %v10661_v28 = vld [vmem:[#allocation10 + $0x8e4] ss:$16 sps:$4 sm:$0xff]   ;;  %v10664_v39 = vld [vmem:[#allocation10 + $0x8ec] ss:$16 sps:$4 sm:$0xff]  }
 0x66f   :  { %8066 = vmatprep.subr.bf16.mxu1 %v10604_v47  ;;  %v10659_v47 = vld [vmem:[#allocation10 + $0x8e0] ss:$16 sps:$4 sm:$0xff]  }
 0x671   :  { %7780 = vmatpush1.bf16.msra.mxu0 %v10599_v63  ;;  %v10667_v63 = vld [vmem:[#allocation10 + $0x904] ss:$16 sps:$4 sm:$0xff]  }
 0x672   :  { %8067 = vmatpush1.bf16.msra.mxu1 %v10602_v45  ;;  %7781 = vmatprep.subr.bf16.mxu0 %v10607_v40  ;;  %v10673_v45 = vld [vmem:[#allocation10 + $0x924] ss:$16 sps:$4 sm:$0xff]   ;;  %v10676_v40 = vld [vmem:[#allocation10 + $0x92c] ss:$16 sps:$4 sm:$0xff]  }
 0x673   :  { %8068 = vmatprep.subr.bf16.mxu1 %v10610_v0  ;;  %v10671_v0 = vld [vmem:[#allocation10 + $0x920] ss:$16 sps:$4 sm:$0xff]  }
 0x675   :  { %7782 = vmatpush1.bf16.msra.mxu0 %v10605_v21  ;;  %v10679_v21 = vld [vmem:[#allocation10 + $0x944] ss:$16 sps:$4 sm:$0xff]  }
 0x676   :  { %8069 = vmatpush1.bf16.msra.mxu1 %v10608_v37  ;;  %7783 = vmatprep.subr.bf16.mxu0 %v10613_v36  ;;  %v10685_v37 = vld [vmem:[#allocation10 + $0x964] ss:$16 sps:$4 sm:$0xff]   ;;  %v10688_v36 = vld [vmem:[#allocation10 + $0x96c] ss:$16 sps:$4 sm:$0xff]  }
 0x677   :  { %8070 = vmatprep.subr.bf16.mxu1 %v10616_v59  ;;  %v10686_v59 = vld [vmem:[#allocation10 + $0x968] ss:$16 sps:$4 sm:$0xff]  }
 0x679   :  { %7784 = vmatpush1.bf16.msra.mxu0 %v10611_v3  ;;  %v10692_v3 = vld [vmem:[#allocation10 + $0x988] ss:$16 sps:$4 sm:$0xff]  }
 0x67a   :  { %8071 = vmatpush1.bf16.msra.mxu1 %v10614_v42  ;;  %7794 = vmatprep.subr.bf16.mxu0 %v10619_v55  ;;  %v10700_v42 = vld [vmem:[#allocation10 + $0x9ac] ss:$16 sps:$4 sm:$0xff]   ;;  %v10222_v55 = vunpack.i.h.bf16 %v13556_v43  ;;  %v10709_v43 = vld [vmem:[#allocation10 + $0x9e4] ss:$16 sps:$4 sm:$0xff]  }
 0x67b   :  { %8081 = vmatprep.subr.bf16.mxu1 %v10622_v13  ;;  %v10695_v13 = vld [vmem:[#allocation10 + $0x9a0] ss:$16 sps:$4 sm:$0xff]  }
 0x67c   :  { %7786 = vmatmul.mubr.bf16.vlgmr.msra.gmra.mrb[56].mxu0 %v5198_v5 }
 0x67d   :  { %8073 = vmatmul.mubr.bf16.vlgmr.msra.gmra.mrb[64].mxu1 %v5198_v5  ;;  %7795 = vmatpush1.bf16.msra.mxu0 %v10617_v62  ;;  %v10698_v62 = vld [vmem:[#allocation10 + $0x9a8] ss:$16 sps:$4 sm:$0xff]   ;;  %v10706_v5 = vld [vmem:[#allocation10 + $0x9cc] ss:$16 sps:$4 sm:$0xff]  }
 0x67e   :  { %7826 = vmatprep.mubr.bf16.mxu0 %v5201_v9  ;;  %8082 = vmatpush1.bf16.msra.mxu1 %v10620_v6  ;;  %v5132_v6 = vsel %vm5004_vm11, %v13471_v52, %v10222_v55  ;;  %v10776_v55 = vld [vmem:[#allocation10 + $0xb48] ss:$16 sps:$4 sm:$0xff]  }
 0x67f   :  { %8113 = vmatprep.mubr.bf16.mxu1 %v5201_v9  ;;  %7796 = vmatprep.subr.bf16.mxu0 %v10625_v4  ;;  %v5037_v4 = vsel %vm5004_vm11, %v14014_v23, %v10221_v44  ;;  %v10701_v9 = vld [vmem:[#allocation10 + $0x9c0] ss:$16 sps:$4 sm:$0xff]   ;;  %v10718_v23 = vld [vmem:[#allocation10 + $0xa0c] ss:$16 sps:$4 sm:$0xff]   ;;  %v10781_v44 = vld [vmem:[#allocation10 + $0xb64] ss:$16 sps:$4 sm:$0xff]  }
 0x680   :  { %8083 = vmatprep.subr.bf16.mxu1 %v10628_v46  ;;  %v10704_v46 = vld [vmem:[#allocation10 + $0x9c8] ss:$16 sps:$4 sm:$0xff]  }
 0x681   :  { %7797 = vmatpush1.bf16.msra.mxu0 %v10623_v32  ;;  %v8722_v32 = vrot.slane %v5132_v6, 13  ;;  %v10790_v6 = vld [vmem:[#allocation10 + $0xb8c] ss:$16 sps:$4 sm:$0xff]  }
 0x682   :  { %8084 = vmatpush1.bf16.msra.mxu1 %v10626_v19  ;;  %7798 = vmatprep.subr.bf16.mxu0 %v10631_v33  ;;  %v5045_v19 = vrot.slane %v5037_v4, 6  ;;  %v10712_v33 = vld [vmem:[#allocation10 + $0x9ec] ss:$16 sps:$4 sm:$0xff]   ;;  %v10785_v4 = vld [vmem:[#allocation10 + $0xb80] ss:$16 sps:$4 sm:$0xff]  }
 0x683   :  { %8085 = vmatprep.subr.bf16.mxu1 %v10634_v58  ;;  %v10707_v58 = vld [vmem:[#allocation10 + $0x9e0] ss:$16 sps:$4 sm:$0xff]  }
 0x684   :  { %v5187_v52 = vsel %vm2578_vm7, %v5045_v19, %v8722_v32  ;;  %v10791_v32 = vld [vmem:[#allocation10 + $0xba0] ss:$16 sps:$4 sm:$0xff]   ;;  %v10794_v19 = vld [vmem:[#allocation10 + $0xba8] ss:$16 sps:$4 sm:$0xff]  }
 0x685   :  { %7799 = vmatpush1.bf16.msra.mxu0 %v10629_v38  ;;  %v10710_v38 = vld [vmem:[#allocation10 + $0x9e8] ss:$16 sps:$4 sm:$0xff]  }
 0x686   :  { %8086 = vmatpush1.bf16.msra.mxu1 %v10632_v24  ;;  %7800 = vmatprep.subr.bf16.mxu0 %v10637_v51  ;;  %v10715_v24 = vld [vmem:[#allocation10 + $0xa04] ss:$16 sps:$4 sm:$0xff]   ;;  %v10713_v51 = vld [vmem:[#allocation10 + $0xa00] ss:$16 sps:$4 sm:$0xff]  }
 0x687   :  { %8087 = vmatprep.subr.bf16.mxu1 %v10640_v49  ;;  %v5200_v49 = vpack.c.bf16 %v5187_v52, %v5187_v52  ;;  %v10805_v52 = vld [vmem:[#allocation10 + $0xbe4] ss:$16 sps:$4 sm:$0xff]  }
 0x689   :  { %7801 = vmatpush1.bf16.msra.mxu0 %v10635_v12  ;;  %v10716_v12 = vld [vmem:[#allocation10 + $0xa08] ss:$16 sps:$4 sm:$0xff]  }
 0x68a   :  { %8088 = vmatpush1.bf16.msra.mxu1 %v10638_v34  ;;  %7802 = vmatprep.subr.bf16.mxu0 %v10643_v18  ;;  %v10721_v34 = vld [vmem:[#allocation10 + $0xa24] ss:$16 sps:$4 sm:$0xff]   ;;  %v5203_v18 = vpack.c.bf16 %v13593_v25, %v13593_v25  ;;  %v10736_v25 = vld [vmem:[#allocation10 + $0xa6c] ss:$16 sps:$4 sm:$0xff]  }
 0x68b   :  { %8089 = vmatprep.subr.bf16.mxu1 %v10646_v8  ;;  %v10724_v8 = vld [vmem:[#allocation10 + $0xa2c] ss:$16 sps:$4 sm:$0xff]  }
 0x68d   :  { %7803 = vmatpush1.bf16.msra.mxu0 %v10641_v61  ;;  %v10719_v61 = vld [vmem:[#allocation10 + $0xa20] ss:$16 sps:$4 sm:$0xff]  }
 0x68e   :  { %8090 = vmatpush1.bf16.msra.mxu1 %v10644_v54  ;;  %7804 = vmatprep.subr.bf16.mxu0 %v10649_v56  ;;  %v10722_v54 = vld [vmem:[#allocation10 + $0xa28] ss:$16 sps:$4 sm:$0xff]   ;;  %v10727_v56 = vld [vmem:[#allocation10 + $0xa44] ss:$16 sps:$4 sm:$0xff]  }
 0x68f   :  { %8091 = vmatprep.subr.bf16.mxu1 %v10652_v48  ;;  %v10730_v48 = vld [vmem:[#allocation10 + $0xa4c] ss:$16 sps:$4 sm:$0xff]  }
 0x691   :  { %7805 = vmatpush1.bf16.msra.mxu0 %v10647_v22  ;;  %v10725_v22 = vld [vmem:[#allocation10 + $0xa40] ss:$16 sps:$4 sm:$0xff]  }
 0x692   :  { %8092 = vmatpush1.bf16.msra.mxu1 %v10650_v35  ;;  %7806 = vmatprep.subr.bf16.mxu0 %v10655_v7  ;;  %v10728_v35 = vld [vmem:[#allocation10 + $0xa48] ss:$16 sps:$4 sm:$0xff]   ;;  %v10733_v7 = vld [vmem:[#allocation10 + $0xa64] ss:$16 sps:$4 sm:$0xff]  }
 0x693   :  { %8093 = vmatprep.subr.bf16.mxu1 %v10658_v1  ;;  %v10731_v1 = vld [vmem:[#allocation10 + $0xa60] ss:$16 sps:$4 sm:$0xff]  }
 0x695   :  { %7807 = vmatpush1.bf16.msra.mxu0 %v10653_v30  ;;  %v10734_v30 = vld [vmem:[#allocation10 + $0xa68] ss:$16 sps:$4 sm:$0xff]  }
 0x696   :  { %8094 = vmatpush1.bf16.msra.mxu1 %v10656_v15  ;;  %7808 = vmatprep.subr.bf16.mxu0 %v10661_v28  ;;  %v10739_v15 = vld [vmem:[#allocation10 + $0xa84] ss:$16 sps:$4 sm:$0xff]   ;;  %v10742_v28 = vld [vmem:[#allocation10 + $0xa8c] ss:$16 sps:$4 sm:$0xff]  }
 0x697   :  { %8095 = vmatprep.subr.bf16.mxu1 %v10664_v39  ;;  %v10737_v39 = vld [vmem:[#allocation10 + $0xa80] ss:$16 sps:$4 sm:$0xff]  }
 0x699   :  { %7809 = vmatpush1.bf16.msra.mxu0 %v10659_v47  ;;  %v10740_v47 = vld [vmem:[#allocation10 + $0xa88] ss:$16 sps:$4 sm:$0xff]  }
 0x69a   :  { %8096 = vmatpush1.bf16.msra.mxu1 %v10662_v31  ;;  %7810 = vmatprep.subr.bf16.mxu0 %v10667_v63  ;;  %v10745_v31 = vld [vmem:[#allocation10 + $0xaa4] ss:$16 sps:$4 sm:$0xff]   ;;  %v10748_v63 = vld [vmem:[#allocation10 + $0xaac] ss:$16 sps:$4 sm:$0xff]  }
 0x69b   :  { %8097 = vmatprep.subr.bf16.mxu1 %v10670_v29  ;;  %v10743_v29 = vld [vmem:[#allocation10 + $0xaa0] ss:$16 sps:$4 sm:$0xff]  }
 0x69d   :  { %7811 = vmatpush1.bf16.msra.mxu0 %v10665_v50  ;;  %v10746_v50 = vld [vmem:[#allocation10 + $0xaa8] ss:$16 sps:$4 sm:$0xff]  }
 0x69e   :  { %8098 = vmatpush1.bf16.msra.mxu1 %v10668_v53  ;;  %7812 = vmatprep.subr.bf16.mxu0 %v10673_v45  ;;  %v10751_v53 = vld [vmem:[#allocation10 + $0xac4] ss:$16 sps:$4 sm:$0xff]   ;;  %v10754_v45 = vld [vmem:[#allocation10 + $0xacc] ss:$16 sps:$4 sm:$0xff]  }
 0x69f   :  { %8099 = vmatprep.subr.bf16.mxu1 %v10676_v40  ;;  %v10749_v40 = vld [vmem:[#allocation10 + $0xac0] ss:$16 sps:$4 sm:$0xff]  }
 0x6a1   :  { %7813 = vmatpush1.bf16.msra.mxu0 %v10671_v0  ;;  %v10752_v0 = vld [vmem:[#allocation10 + $0xac8] ss:$16 sps:$4 sm:$0xff]  }
 0x6a2   :  { %8100 = vmatpush1.bf16.msra.mxu1 %v10674_v26  ;;  %7814 = vmatprep.subr.bf16.mxu0 %v10679_v21  ;;  %v10757_v26 = vld [vmem:[#allocation10 + $0xae4] ss:$16 sps:$4 sm:$0xff]   ;;  %v10760_v21 = vld [vmem:[#allocation10 + $0xaec] ss:$16 sps:$4 sm:$0xff]  }
 0x6a3   :  { %8101 = vmatprep.subr.bf16.mxu1 %v10682_v41  ;;  %v10755_v41 = vld [vmem:[#allocation10 + $0xae0] ss:$16 sps:$4 sm:$0xff]  }
 0x6a5   :  { %7815 = vmatpush1.bf16.msra.mxu0 %v10677_v14  ;;  %v10758_v14 = vld [vmem:[#allocation10 + $0xae8] ss:$16 sps:$4 sm:$0xff]  }
 0x6a6   :  { %8102 = vmatpush1.bf16.msra.mxu1 %v10680_v10  ;;  %7816 = vmatprep.subr.bf16.mxu0 %v10685_v37  ;;  %v10763_v10 = vld [vmem:[#allocation10 + $0xb04] ss:$16 sps:$4 sm:$0xff]   ;;  %v10766_v37 = vld [vmem:[#allocation10 + $0xb0c] ss:$16 sps:$4 sm:$0xff]  }
 0x6a7   :  { %8103 = vmatprep.subr.bf16.mxu1 %v10688_v36  ;;  %v10761_v36 = vld [vmem:[#allocation10 + $0xb00] ss:$16 sps:$4 sm:$0xff]  }
 0x6a9   :  { %7817 = vmatpush1.bf16.msra.mxu0 %v10683_v60  ;;  %v10764_v60 = vld [vmem:[#allocation10 + $0xb08] ss:$16 sps:$4 sm:$0xff]  }
 0x6aa   :  { %8104 = vmatpush1.bf16.msra.mxu1 %v10686_v59  ;;  %7818 = vmatprep.subr.bf16.mxu0 %v10691_v16  ;;  %v10769_v59 = vld [vmem:[#allocation10 + $0xb24] ss:$16 sps:$4 sm:$0xff]   ;;  %v10772_v16 = vld [vmem:[#allocation10 + $0xb2c] ss:$16 sps:$4 sm:$0xff]  }
 0x6ab   :  { %8105 = vmatprep.subr.bf16.mxu1 %v10694_v11  ;;  %v10767_v11 = vld [vmem:[#allocation10 + $0xb20] ss:$16 sps:$4 sm:$0xff]  }
 0x6ad   :  { %7819 = vmatpush1.bf16.msra.mxu0 %v10689_v27  ;;  %v10770_v27 = vld [vmem:[#allocation10 + $0xb28] ss:$16 sps:$4 sm:$0xff]  }
 0x6ae   :  { %8106 = vmatpush1.bf16.msra.mxu1 %v10692_v3  ;;  %7820 = vmatprep.subr.bf16.mxu0 %v10697_v17  ;;  %v10775_v3 = vld [vmem:[#allocation10 + $0xb44] ss:$16 sps:$4 sm:$0xff]   ;;  %v10778_v17 = vld [vmem:[#allocation10 + $0xb4c] ss:$16 sps:$4 sm:$0xff]  }
 0x6af   :  { %8107 = vmatprep.subr.bf16.mxu1 %v10700_v42  ;;  %v10773_v42 = vld [vmem:[#allocation10 + $0xb40] ss:$16 sps:$4 sm:$0xff]  }
 0x6b1   :  { %7821 = vmatpush1.bf16.msra.mxu0 %v10695_v13  ;;  %v10784_v13 = vld [vmem:[#allocation10 + $0xb6c] ss:$16 sps:$4 sm:$0xff]  }
 0x6b2   :  { %8108 = vmatpush1.bf16.msra.mxu1 %v10698_v62  ;;  %7822 = vmatprep.subr.bf16.mxu0 %v10703_v20  ;;  %v10779_v62 = vld [vmem:[#allocation10 + $0xb60] ss:$16 sps:$4 sm:$0xff]   ;;  %v10782_v20 = vld [vmem:[#allocation10 + $0xb68] ss:$16 sps:$4 sm:$0xff]  }
 0x6b3   :  { %8109 = vmatprep.subr.bf16.mxu1 %v10706_v5  ;;  %v10787_v5 = vld [vmem:[#allocation10 + $0xb84] ss:$16 sps:$4 sm:$0xff]  }
 0x6b5   :  { %7823 = vmatpush1.bf16.msra.mxu0 %v10701_v9  ;;  %v10788_v9 = vld [vmem:[#allocation10 + $0xb88] ss:$16 sps:$4 sm:$0xff]  }
 0x6b6   :  { %8110 = vmatpush1.bf16.msra.mxu1 %v10704_v46  ;;  %7824 = vmatprep.subr.bf16.mxu0 %v10709_v43  ;;  %v10793_v46 = vld [vmem:[#allocation10 + $0xba4] ss:$16 sps:$4 sm:$0xff]   ;;  %v10796_v43 = vld [vmem:[#allocation10 + $0xbac] ss:$16 sps:$4 sm:$0xff]  }
 0x6b7   :  { %8111 = vmatprep.subr.bf16.mxu1 %v10712_v33  ;;  %v10799_v33 = vld [vmem:[#allocation10 + $0xbc4] ss:$16 sps:$4 sm:$0xff]  }
 0x6b9   :  { %7825 = vmatpush1.bf16.msra.mxu0 %v10707_v58  ;;  %v10802_v58 = vld [vmem:[#allocation10 + $0xbcc] ss:$16 sps:$4 sm:$0xff]  }
 0x6ba   :  { %8112 = vmatpush1.bf16.msra.mxu1 %v10710_v38  ;;  %7835 = vmatprep.subr.bf16.mxu0 %v10715_v24  ;;  %v10797_v38 = vld [vmem:[#allocation10 + $0xbc0] ss:$16 sps:$4 sm:$0xff]   ;;  %v10800_v24 = vld [vmem:[#allocation10 + $0xbc8] ss:$16 sps:$4 sm:$0xff]  }
 0x6bb   :  { %8122 = vmatprep.subr.bf16.mxu1 %v10718_v23  ;;  %v10808_v23 = vld [vmem:[#allocation10 + $0xbec] ss:$16 sps:$4 sm:$0xff]  }
 0x6bc   :  { %7827 = vmatmul.mubr.bf16.vlgmr.msra.gmra.mrb[56].mxu0 %v5200_v49 }
 0x6bd   :  { %8114 = vmatmul.mubr.bf16.vlgmr.msra.gmra.mrb[64].mxu1 %v5200_v49  ;;  %7836 = vmatpush1.bf16.msra.mxu0 %v10713_v51  ;;  %v10803_v51 = vld [vmem:[#allocation10 + $0xbe0] ss:$16 sps:$4 sm:$0xff]   ;;  %v10806_v49 = vld [vmem:[#allocation10 + $0xbe8] ss:$16 sps:$4 sm:$0xff]  }
 0x6be   :  { %7867 = vmatprep.mubr.bf16.mxu0 %v5203_v18  ;;  %8123 = vmatpush1.bf16.msra.mxu1 %v10716_v12  ;;  %v10811_v12 = vld [vmem:[#allocation10 + $0xc04] ss:$16 sps:$4 sm:$0xff]  }
 0x6bf   :  { %8154 = vmatprep.mubr.bf16.mxu1 %v5203_v18  ;;  %7837 = vmatprep.subr.bf16.mxu0 %v10721_v34  ;;  %v10814_v34 = vld [vmem:[#allocation10 + $0xc0c] ss:$16 sps:$4 sm:$0xff]   ;;  %v10809_v18 = vld [vmem:[#allocation10 + $0xc00] ss:$16 sps:$4 sm:$0xff]  }
 0x6c0   :  { %8124 = vmatprep.subr.bf16.mxu1 %v10724_v8  ;;  %v5202_v8 = vpack.c.bf16 %v13561_v57, %v13561_v57  ;;  %v10821_v57 = vld [vmem:[#allocation10 + $0xc40] ss:$16 sps:$4 sm:$0xff]  }
 0x6c1   :  { %7838 = vmatpush1.bf16.msra.mxu0 %v10719_v61  ;;  %v10812_v61 = vld [vmem:[#allocation10 + $0xc08] ss:$16 sps:$4 sm:$0xff]  }
 0x6c2   :  { %8125 = vmatpush1.bf16.msra.mxu1 %v10722_v54  ;;  %7839 = vmatprep.subr.bf16.mxu0 %v10727_v56  ;;  %v10817_v54 = vld [vmem:[#allocation10 + $0xc24] ss:$16 sps:$4 sm:$0xff]   ;;  %v10820_v56 = vld [vmem:[#allocation10 + $0xc2c] ss:$16 sps:$4 sm:$0xff]  }
 0x6c3   :  { %8126 = vmatprep.subr.bf16.mxu1 %v10730_v48  ;;  %v10815_v48 = vld [vmem:[#allocation10 + $0xc20] ss:$16 sps:$4 sm:$0xff]  }
 0x6c5   :  { %7840 = vmatpush1.bf16.msra.mxu0 %v10725_v22  ;;  %v10818_v22 = vld [vmem:[#allocation10 + $0xc28] ss:$16 sps:$4 sm:$0xff]  }
 0x6c6   :  { %8127 = vmatpush1.bf16.msra.mxu1 %v10728_v35  ;;  %7841 = vmatprep.subr.bf16.mxu0 %v10733_v7  ;;  %v10823_v35 = vld [vmem:[#allocation10 + $0xc44] ss:$16 sps:$4 sm:$0xff]   ;;  %v10826_v7 = vld [vmem:[#allocation10 + $0xc4c] ss:$16 sps:$4 sm:$0xff]  }
 0x6c7   :  { %8128 = vmatprep.subr.bf16.mxu1 %v10736_v25  ;;  %v11048_v25 = vmov 0  }
 0x6c9   :  { %7842 = vmatpush1.bf16.msra.mxu0 %v10731_v1  ;;  %v10824_v1 = vld [vmem:[#allocation10 + $0xc48] ss:$16 sps:$4 sm:$0xff]  }
 0x6ca   :  { %8129 = vmatpush1.bf16.msra.mxu1 %v10734_v30  ;;  %7843 = vmatprep.subr.bf16.mxu0 %v10739_v15  ;;  %v10829_v30 = vld [vmem:[#allocation10 + $0xc64] ss:$16 sps:$4 sm:$0xff]   ;;  %v10832_v15 = vld [vmem:[#allocation10 + $0xc6c] ss:$16 sps:$4 sm:$0xff]  }
 0x6cb   :  { %8130 = vmatprep.subr.bf16.mxu1 %v10742_v28  ;;  %v8224_v28 = vld [vmem:[%s13883_s7 + $0x80] sm:$0xff] }
 0x6cd   :  { %7844 = vmatpush1.bf16.msra.mxu0 %v10737_v39  ;;  %v8225_v39 = vld [vmem:[%s13883_s7 + $0x88] sm:$0xff] }
 0x6ce   :  { %8131 = vmatpush1.bf16.msra.mxu1 %v10740_v47  ;;  %7845 = vmatprep.subr.bf16.mxu0 %v10745_v31  ;;  %v10827_v47 = vld [vmem:[#allocation10 + $0xc60] ss:$16 sps:$4 sm:$0xff]   ;;  %v10830_v31 = vld [vmem:[#allocation10 + $0xc68] ss:$16 sps:$4 sm:$0xff]  }
 0x6cf   :  { %8132 = vmatprep.subr.bf16.mxu1 %v10748_v63  ;;  %v9790_v63 = vpack.c.bf16 %v8225_v39, %v8224_v28 }
 0x6d1   :  { %7846 = vmatpush1.bf16.msra.mxu0 %v10743_v29  ;;  %v8208_v29 = vld [vmem:[%s13883_s7] sm:$0xff] }
 0x6d2   :  { %8133 = vmatpush1.bf16.msra.mxu1 %v10746_v50  ;;  %7847 = vmatprep.subr.bf16.mxu0 %v10751_v53  ;;  %v8209_v50 = vld [vmem:[%s13883_s7 + $0x8] sm:$0xff]  ;;  %v8226_v53 = vld [vmem:[%s13883_s7 + $0x90] sm:$0xff] }
 0x6d3   :  { %8134 = vmatprep.subr.bf16.mxu1 %v10754_v45  ;;  %v8227_v45 = vld [vmem:[%s13883_s7 + $0x98] sm:$0xff] }
 0x6d5   :  { %7848 = vmatpush1.bf16.msra.mxu0 %v10749_v40  ;;  %v9792_v40 = vpack.c.bf16 %v8209_v50, %v8208_v29 }
 0x6d6   :  { %8135 = vmatpush1.bf16.msra.mxu1 %v10752_v0  ;;  %7849 = vmatprep.subr.bf16.mxu0 %v10757_v26  ;;  %v5204_v0 = vpack.c.bf16 %v13540_v2, %v13540_v2  ;;  %v9794_v26 = vpack.c.bf16 %v8227_v45, %v8226_v53  ;;  %v8258_v53 = vld [vmem:[%s13883_s7 + $0x190] sm:$0xff]  ;;  %v8259_v45 = vld [vmem:[%s13883_s7 + $0x198] sm:$0xff] }
 0x6d7   :  { %8136 = vmatprep.subr.bf16.mxu1 %v10760_v21  ;;  %v8210_v21 = vld [vmem:[%s13883_s7 + $0x10] sm:$0xff] }
 0x6d9   :  { %7850 = vmatpush1.bf16.msra.mxu0 %v10755_v41  ;;  %v8211_v41 = vld [vmem:[%s13883_s7 + $0x18] sm:$0xff] }
 0x6da   :  { %8137 = vmatpush1.bf16.msra.mxu1 %v10758_v14  ;;  %7851 = vmatprep.subr.bf16.mxu0 %v10763_v10  ;;  %v8228_v14 = vld [vmem:[%s13883_s7 + $0xa0] sm:$0xff]  ;;  %v8229_v10 = vld [vmem:[%s13883_s7 + $0xa8] sm:$0xff]  ;;  %v9796_v2 = vpack.c.bf16 %v8211_v41, %v8210_v21 }
 0x6db   :  { %8138 = vmatprep.subr.bf16.mxu1 %v10766_v37  ;;  %v9798_v37 = vpack.c.bf16 %v8229_v10, %v8228_v14 }
 0x6dd   :  { %7852 = vmatpush1.bf16.msra.mxu0 %v10761_v36  ;;  %v8212_v36 = vld [vmem:[%s13883_s7 + $0x20] sm:$0xff] }
 0x6de   :  { %8139 = vmatpush1.bf16.msra.mxu1 %v10764_v60  ;;  %7853 = vmatprep.subr.bf16.mxu0 %v10769_v59  ;;  %v8213_v60 = vld [vmem:[%s13883_s7 + $0x28] sm:$0xff]  ;;  %v8230_v59 = vld [vmem:[%s13883_s7 + $0xb0] sm:$0xff] }
 0x6df   :  { %8140 = vmatprep.subr.bf16.mxu1 %v10772_v16  ;;  %v8231_v16 = vld [vmem:[%s13883_s7 + $0xb8] sm:$0xff] }
 0x6e1   :  { %7854 = vmatpush1.bf16.msra.mxu0 %v10767_v11  ;;  %v9800_v11 = vpack.c.bf16 %v8213_v60, %v8212_v36  ;;  %v8243_v36 = vld [vmem:[%s13883_s7 + $0x118] sm:$0xff] }
 0x6e2   :  { %8141 = vmatpush1.bf16.msra.mxu1 %v10770_v27  ;;  %7855 = vmatprep.subr.bf16.mxu0 %v10775_v3  ;;  %v9802_v27 = vpack.c.bf16 %v8231_v16, %v8230_v59  ;;  %v8214_v3 = vld [vmem:[%s13883_s7 + $0x30] sm:$0xff]  ;;  %v8260_v59 = vld [vmem:[%s13883_s7 + $0x1a0] sm:$0xff]  ;;  %v8261_v16 = vld [vmem:[%s13883_s7 + $0x1a8] sm:$0xff] }
 0x6e3   :  { %8142 = vmatprep.subr.bf16.mxu1 %v10778_v17  ;;  %v8215_v17 = vld [vmem:[%s13883_s7 + $0x38] sm:$0xff] }
 0x6e5   :  { %7856 = vmatpush1.bf16.msra.mxu0 %v10773_v42  ;;  %v8232_v42 = vld [vmem:[%s13883_s7 + $0xc0] sm:$0xff] }
 0x6e6   :  { %8143 = vmatpush1.bf16.msra.mxu1 %v10776_v55  ;;  %7857 = vmatprep.subr.bf16.mxu0 %v10781_v44  ;;  %v8233_v55 = vld [vmem:[%s13883_s7 + $0xc8] sm:$0xff]  ;;  %v9804_v44 = vpack.c.bf16 %v8215_v17, %v8214_v3  ;;  %v8244_v3 = vld [vmem:[%s13883_s7 + $0x120] sm:$0xff] }
 0x6e7   :  { %8144 = vmatprep.subr.bf16.mxu1 %v10784_v13  ;;  %v9806_v13 = vpack.c.bf16 %v8233_v55, %v8232_v42  ;;  %v8245_v17 = vld [vmem:[%s13883_s7 + $0x128] sm:$0xff]  ;;  %v8262_v42 = vld [vmem:[%s13883_s7 + $0x1b0] sm:$0xff]  ;;  %v8263_v55 = vld [vmem:[%s13883_s7 + $0x1b8] sm:$0xff] }
 0x6e9   :  { %7858 = vmatpush1.bf16.msra.mxu0 %v10779_v62  ;;  %v8216_v62 = vld [vmem:[%s13883_s7 + $0x40] sm:$0xff] }
 0x6ea   :  { %8145 = vmatpush1.bf16.msra.mxu1 %v10782_v20  ;;  %7859 = vmatprep.subr.bf16.mxu0 %v10787_v5  ;;  %v8217_v20 = vld [vmem:[%s13883_s7 + $0x48] sm:$0xff]  ;;  %v8234_v5 = vld [vmem:[%s13883_s7 + $0xd0] sm:$0xff] }
 0x6eb   :  { %8146 = vmatprep.subr.bf16.mxu1 %v10790_v6  ;;  %v8235_v6 = vld [vmem:[%s13883_s7 + $0xd8] sm:$0xff] }
 0x6ed   :  { %7860 = vmatpush1.bf16.msra.mxu0 %v10785_v4  ;;  %v9808_v4 = vpack.c.bf16 %v8217_v20, %v8216_v62  ;;  %v8246_v62 = vld [vmem:[%s13883_s7 + $0x130] sm:$0xff]  ;;  %v8247_v20 = vld [vmem:[%s13883_s7 + $0x138] sm:$0xff] }
 0x6ee   :  { %8147 = vmatpush1.bf16.msra.mxu1 %v10788_v9  ;;  %7861 = vmatprep.subr.bf16.mxu0 %v10793_v46  ;;  %v9810_v9 = vpack.c.bf16 %v8235_v6, %v8234_v5  ;;  %v8218_v46 = vld [vmem:[%s13883_s7 + $0x50] sm:$0xff]  ;;  %v8264_v5 = vld [vmem:[%s13883_s7 + $0x1c0] sm:$0xff]  ;;  %v8265_v6 = vld [vmem:[%s13883_s7 + $0x1c8] sm:$0xff] }
 0x6ef   :  { %8148 = vmatprep.subr.bf16.mxu1 %v10796_v43  ;;  %v8219_v43 = vld [vmem:[%s13883_s7 + $0x58] sm:$0xff] }
 0x6f1   :  { %7862 = vmatpush1.bf16.msra.mxu0 %v10791_v32  ;;  %v8236_v32 = vld [vmem:[%s13883_s7 + $0xe0] sm:$0xff] }
 0x6f2   :  { %8149 = vmatpush1.bf16.msra.mxu1 %v10794_v19  ;;  %7863 = vmatprep.subr.bf16.mxu0 %v10799_v33  ;;  %v8237_v19 = vld [vmem:[%s13883_s7 + $0xe8] sm:$0xff]  ;;  %v9812_v33 = vpack.c.bf16 %v8219_v43, %v8218_v46  ;;  %v8248_v46 = vld [vmem:[%s13883_s7 + $0x140] sm:$0xff] }
 0x6f3   :  { %8150 = vmatprep.subr.bf16.mxu1 %v10802_v58  ;;  %v9814_v58 = vpack.c.bf16 %v8237_v19, %v8236_v32  ;;  %v8249_v43 = vld [vmem:[%s13883_s7 + $0x148] sm:$0xff]  ;;  %v8266_v32 = vld [vmem:[%s13883_s7 + $0x1d0] sm:$0xff]  ;;  %v8267_v19 = vld [vmem:[%s13883_s7 + $0x1d8] sm:$0xff] }
 0x6f5   :  { %7864 = vmatpush1.bf16.msra.mxu0 %v10797_v38  ;;  %v8220_v38 = vld [vmem:[%s13883_s7 + $0x60] sm:$0xff] }
 0x6f6   :  { %8151 = vmatpush1.bf16.msra.mxu1 %v10800_v24  ;;  %7865 = vmatprep.subr.bf16.mxu0 %v10805_v52  ;;  %v8221_v24 = vld [vmem:[%s13883_s7 + $0x68] sm:$0xff] }
 0x6f7   :  { %8152 = vmatprep.subr.bf16.mxu1 %v10808_v23  ;;  %v9816_v52 = vpack.c.bf16 %v8221_v24, %v8220_v38  ;;  %v8238_v23 = vld [vmem:[%s13883_s7 + $0xf0] sm:$0xff]  ;;  %v8251_v24 = vld [vmem:[%s13883_s7 + $0x158] sm:$0xff] }
 0x6f8   :  { %v8250_v38 = vld [vmem:[%s13883_s7 + $0x150] sm:$0xff] }
 0x6f9   :  { %7866 = vmatpush1.bf16.msra.mxu0 %v10803_v51  ;;  %v8239_v51 = vld [vmem:[%s13883_s7 + $0xf8] sm:$0xff] }
 0x6fa   :  { %8153 = vmatpush1.bf16.msra.mxu1 %v10806_v49  ;;  %7876 = vmatprep.subr.bf16.mxu0 %v10811_v12  ;;  %v8222_v49 = vld [vmem:[%s13883_s7 + $0x70] sm:$0xff]  ;;  %v9818_v12 = vpack.c.bf16 %v8239_v51, %v8238_v23  ;;  %v8269_v23 = vld [vmem:[%s13883_s7 + $0x1e8] sm:$0xff]  ;;  %v9844_v51 = vpack.c.bf16 %v8251_v24, %v8250_v38 }
 0x6fb   :  { %8163 = vmatprep.subr.bf16.mxu1 %v10814_v34  ;;  %v8223_v34 = vld [vmem:[%s13883_s7 + $0x78] sm:$0xff] }
 0x6fc   :  { %7868 = vmatmul.mubr.bf16.vlgmr.msra.gmra.mrb[56].mxu0 %v5202_v8 }
 0x6fd   :  { %8155 = vmatmul.mubr.bf16.vlgmr.msra.gmra.mrb[64].mxu1 %v5202_v8  ;;  %7877 = vmatpush1.bf16.msra.mxu0 %v10809_v18  ;;  %v8256_v18 = vld [vmem:[%s13883_s7 + $0x180] sm:$0xff]  ;;  %v8257_v8 = vld [vmem:[%s13883_s7 + $0x188] sm:$0xff] }
 0x6fe   :  { %8164 = vmatpush1.bf16.msra.mxu1 %v10812_v61  ;;  %7878 = vmatprep.subr.bf16.mxu0 %v10817_v54  ;;  %v9820_v61 = vpack.c.bf16 %v8223_v34, %v8222_v49  ;;  %v9822_v54 = vpack.c.bf16 %v8257_v8, %v8256_v18  ;;  %v8253_v34 = vld [vmem:[%s13883_s7 + $0x168] sm:$0xff]  ;;  %v8270_v18 = vld [vmem:[%s13883_s7 + $0x1f0] sm:$0xff]  ;;  %v8271_v8 = vld [vmem:[%s13883_s7 + $0x1f8] sm:$0xff] }
 0x6ff   :  { %8165 = vmatprep.subr.bf16.mxu1 %v10820_v56  ;;  %7908 = vmatprep.mubr.bf16.mxu0 %v11048_v25  ;;  %v13754_v56 = vld [vmem:[#allocation11] sm:$0xf] }
 0x700   :  { %8195 = vmatprep.mubr.bf16.mxu1 %v11048_v25 }
 0x701   :  { %7879 = vmatpush1.bf16.msra.mxu0 %v10815_v48  ;;  %v14016_v48 = vld [vmem:[#allocation20_spill] sm:$0xff] }
 0x702   :  { %8166 = vmatpush1.bf16.msra.mxu1 %v10818_v22  ;;  %7880 = vmatprep.subr.bf16.mxu0 %v10823_v35  ;;  %v14017_v22 = vsub.s32 0, %v14016_v48 }
 0x703   :  { %8167 = vmatprep.subr.bf16.mxu1 %v10826_v7  ;;  %v14018_v7 = vsub.s32 1, %v14016_v48 }
 0x704   :  { %v5610_v35 = vrot.slane %v13754_v56, %v14017_v22 }
 0x705   :  { %7881 = vmatpush1.bf16.msra.mxu0 %v10821_v57  ;;  %v5614_v25 = vrot.slane %v13754_v56, %v14018_v7  ;;  %v14019_v57 = vsub.s32 3, %v14016_v48  ;;  %v8254_v7 = vld [vmem:[%s13883_s7 + $0x170] sm:$0xff] }
 0x706   :  { %8168 = vmatpush1.bf16.msra.mxu1 %v10824_v1  ;;  %7882 = vmatprep.subr.bf16.mxu0 %v10829_v30 }
 0x707   :  { %8169 = vmatprep.subr.bf16.mxu1 %v10832_v15  ;;  %v5622_v1 = vrot.slane %v13754_v56, %v14019_v57 }
 0x709   :  { %7883 = vmatpush1.bf16.msra.mxu0 %v10827_v47  ;;  %v8240_v47 = vld [vmem:[%s13883_s7 + $0x100] sm:$0xff] }
 0x70a   :  { %8170 = vmatpush1.bf16.msra.mxu1 %v10830_v31  ;;  %9791 = vmatprep.subr.bf16.mxu0 %v9790_v63  ;;  %v8241_v31 = vld [vmem:[%s13883_s7 + $0x108] sm:$0xff] }
 0x70b   :  { %v9824_v14 = vpack.c.bf16 %v8241_v31, %v8240_v47 }
 0x70c   :  { %9127 = vmatmul.mubr.msk.bf16.vlgmr.msra.gmra.mrb[56].mxu0 %vm5004_vm11, %v5204_v0 }
 0x70d   :  { %9128 = vmatmul.mubr.msk.bf16.vlgmr.msra.gmra.mrb[64].mxu1 %vm5004_vm11, %v5204_v0  ;;  %9793 = vmatpush3.bf16.msra.mxu0 %v9792_v40 }
 0x70e   :  { %9795 = vmatprep.subr.bf16.mxu0 %v9794_v26 }
 0x711   :  { %9797 = vmatpush3.bf16.msra.mxu0 %v9796_v2  ;;  %v9826_v2 = vpack.c.bf16 %v8259_v45, %v8258_v53 }
 0x712   :  { %9799 = vmatprep.subr.bf16.mxu0 %v9798_v37  ;;  %v8242_v37 = vld [vmem:[%s13883_s7 + $0x110] sm:$0xff] }
 0x715   :  { %9801 = vmatpush3.bf16.msra.mxu0 %v9800_v11  ;;  %v9828_v11 = vpack.c.bf16 %v8243_v36, %v8242_v37 }
 0x716   :  { %9803 = vmatprep.subr.bf16.mxu0 %v9802_v27  ;;  %v9830_v27 = vpack.c.bf16 %v8261_v16, %v8260_v59 }
 0x719   :  { %9805 = vmatpush3.bf16.msra.mxu0 %v9804_v44  ;;  %v9832_v44 = vpack.c.bf16 %v8245_v17, %v8244_v3 }
 0x71a   :  { %9807 = vmatprep.subr.bf16.mxu0 %v9806_v13  ;;  %v9834_v13 = vpack.c.bf16 %v8263_v55, %v8262_v42 }
 0x71d   :  { %9809 = vmatpush3.bf16.msra.mxu0 %v9808_v4  ;;  %v9836_v4 = vpack.c.bf16 %v8247_v20, %v8246_v62 }
 0x71e   :  { %9811 = vmatprep.subr.bf16.mxu0 %v9810_v9  ;;  %v9838_v9 = vpack.c.bf16 %v8265_v6, %v8264_v5 }
 0x721   :  { %9813 = vmatpush3.bf16.msra.mxu0 %v9812_v33  ;;  %v9840_v33 = vpack.c.bf16 %v8249_v43, %v8248_v46 }
 0x722   :  { %9815 = vmatprep.subr.bf16.mxu0 %v9814_v58  ;;  %v9842_v58 = vpack.c.bf16 %v8267_v19, %v8266_v32 }
 0x725   :  { %9817 = vmatpush3.bf16.msra.mxu0 %v9816_v52  ;;  %v8268_v52 = vld [vmem:[%s13883_s7 + $0x1e0] sm:$0xff] }
 0x726   :  { %9819 = vmatprep.subr.bf16.mxu0 %v9818_v12  ;;  %v9846_v49 = vpack.c.bf16 %v8269_v23, %v8268_v52  ;;  %v8252_v12 = vld [vmem:[%s13883_s7 + $0x160] sm:$0xff] }
 0x729   :  { %9821 = vmatpush3.bf16.msra.mxu0 %v9820_v61  ;;  %v9848_v61 = vpack.c.bf16 %v8253_v34, %v8252_v12 }
 0x72a   :  { %9823 = vmatprep.subr.bf16.mxu0 %v9822_v54  ;;  %v14020_v54 = vsub.s32 2, %v14016_v48 }
 0x72c   :  { %v5618_v22 = vrot.slane %v13754_v56, %v14020_v54 }
 0x7df   :  { %v7910_v30 = vpop.f32.mrb[56].mxu0 }
 0x7e0   :  { %v9896_v15 = vadd.f32 %v7910_v30, %v5610_v35  ;;  %v13765_v28 = vpop.f32.mrb[64].mxu1  ;;  %v7912_v39 = vpop.f32.mrb[57].mxu0  ;;  %v9850_v35 = vpack.c.bf16 %v8271_v8, %v8270_v18 }
 0x7e1   :  { %v9897_v63 = vadd.f32 %v7912_v39, %v5614_v25  ;;  %v8199_v29 = vpop.f32.mrb[65].mxu1  ;;  %v7914_v50 = vpop.f32.mrb[58].mxu0  ;;  %v8255_v25 = vld [vmem:[%s13883_s7 + $0x178] sm:$0xff]  ;;  %v9129_v39 = vld [vmem:[#allocation13] ss:$0 sm:$0xff]  ;;  %s11049_s7 = smov [#allocation14]  }
 0x7e2   :  { %v9899_v40 = vadd.f32 %v8199_v29, %v5622_v1  ;;  %v8201_v0 = vpop.f32.mrb[66].mxu1  ;;  %v7915_v26 = vpop.f32.mrb[59].mxu0  ;;  %v8204_v10 = vmax.f32 %v9896_v15, 0.0  ;;  %v9852_v57 = vpack.c.bf16 %v8255_v25, %v8254_v7  ;;  %v9898_v1 = vadd.f32 %v13765_v28, %v5618_v22  ;;  %s8439_s20 = sshll.u32 %s11049_s7, 4  ;;  %s8440_s20 = int_to_ptr.vmem [resolvable:$true] %s8439_s20 }
 0x7e3   :  { %v8205_v21 = vmax.f32 %v9897_v63, 0.0  ;;  %v8202_v41 = vpop.f32.mrb[67].mxu1  ;;  %s10999_s21 = scalar_lea.vmem %s8440_s20, 32  ;;  %p11004_p1 = scmp.lt.s32.totalorder %s8440_s20, %s8440_s20 }
 0x7e4   :  { %v8207_v60 = vmax.f32 %v9899_v40, 0.0  ;;  %v8206_v30 = vmax.f32 %v9898_v1, 0.0  ;;  %p11000_p0 = scmp.ne.s32.totalorder %s8440_s20, %s10999_s21  ;;  %p11005_p2 = scmp.lt.s32.totalorder %s10999_s21, %s10999_s21 }
 0x7e5   :  { %8343 = vmatprep.mubr.f32.mxu0 %v8205_v21 }
 0x7e6   :  { %8344 = vmatmul.mubr.f32.vlgmr.msra.gmra.mrb[60].mxu0 %v8204_v10  ;;  %p11006_p3 = por %p11005_p2, %p11004_p1 }
 0x7e7   :  { %9825 = vmatpush3.bf16.msra.mxu0 %v9824_v14  ;;  %8413 = vmatprep.mubr.f32.mxu0 %v8207_v60 }
 0x7e8   :  { %9827 = vmatprep.subr.bf16.mxu0 %v9826_v2  ;;  %p11007_p4 = pnand %p11006_p3, %p11000_p0 }
 0x7eb   :  { %9829 = vmatpush3.bf16.msra.mxu0 %v9828_v11 }
 0x7ec   :  { %9831 = vmatprep.subr.bf16.mxu0 %v9830_v27 }
 0x7ef   :  { %9833 = vmatpush3.bf16.msra.mxu0 %v9832_v44 }
 0x7f0   :  { %9835 = vmatprep.subr.bf16.mxu0 %v9834_v13 }
 0x7f3   :  { %9837 = vmatpush3.bf16.msra.mxu0 %v9836_v4 }
 0x7f4   :  { %9839 = vmatprep.subr.bf16.mxu0 %v9838_v9 }
 0x7f7   :  { %9841 = vmatpush3.bf16.msra.mxu0 %v9840_v33 }
 0x7f8   :  { %9843 = vmatprep.subr.bf16.mxu0 %v9842_v58 }
 0x7fb   :  { %9845 = vmatpush3.bf16.msra.mxu0 %v9844_v51 }
 0x7fc   :  { %9847 = vmatprep.subr.bf16.mxu0 %v9846_v49 }
 0x7ff   :  { %9849 = vmatpush3.bf16.msra.mxu0 %v9848_v61 }
 0x800   :  { %9851 = vmatprep.subr.bf16.mxu0 %v9850_v35 }
 0x803   :  { %9853 = vmatpush3.bf16.msra.mxu0 %v9852_v57 }
 0x806   :  { %8414 = vmatmul.mubr.f32.vlgmr.msra.gmra.mrb[62].mxu0 %v8206_v30 }
 0x8b9   :  { %v9322_v48 = vpop.f32.mrb[60].mxu0 }
 0x8ba   :  { %v9323_v56 = vpop.f32.mrb[61].mxu0 }
 0x8bb   :  { %v9324_v15 = vadd.f32 %v9323_v56, %v9322_v48 }
 0x8bd   :  { %v8346_v63 = vadd.f32 %v9324_v15, %v9129_v39 }
 0x8d9   :  { %v9357_v47 = vpop.f32.mrb[62].mxu0 }
 0x8da   :  { %v9358_v31 = vpop.f32.mrb[63].mxu0 }
 0x8db   :  { %v9359_v29 = vadd.f32 %v9358_v31, %v9357_v47 }
 0x8dd   :  { %v8416_v50 = vadd.f32 %v9359_v29, %v8346_v63 }
 0x8df   :  { %v8420_v53 = vsel %vm8419_vm12, %v8416_v50, -inf }
 0x8e0   :  { %8421 = vmax.xlane.f32.xlu0 %v8420_v53 }
 0x96d   :  { %v8422_v45 = vpop.xlane.xlu0 %8421 }
 0x96e   :  { %v8423_v40 = vsub.f32 %v8416_v50, %v8422_v45 }
 0x970   :  { %v8424_v28 = vmul.f32 1.442695, %v8423_v40 }
 0x972   :  { %10833 = vpow2.f32 %v8424_v28 }
 0x97c   :  { %v10834_v0 = vpop.eup %10833 }
 0x97d   :  { %v8426_v26 = vsel %vm8419_vm12, %v10834_v0, 0.0 }
 0x97e   :  { %8427 = vadd.xlane.f32.xlu1 %v8426_v26 }
 0xa0b   :  { %v8428_v21 = vpop.xlane.xlu1 %8427 }
 0xa0c   :  { %10835 = vlog2.f32 %v8428_v21 }
 0xa16   :  { %v10836_v41 = vpop.eup %10835 }
 0xa17   :  { %v8430_v14 = vmul.f32 0.6931472, %v10836_v41 }
 0xa19   :  { %v8431_v10 = vsub.f32 %v8423_v40, %v8430_v14 }
 0xa1b   :  { %8432 = vst.msk [vmem:[#allocation14] sm:$0x3] %vm8419_vm12, %v8431_v10 }
 0xa1c   :  { %11010 = shalt.err (!%p11007_p4)
}
 0xa1d   :  { %s11011_s4 = scalar_lea.hbm %s13885_s9, 32 }
 0xa1e   :  { %p11012_p5 = scmp.ne.s32.totalorder %s13885_s9, %s11011_s4  ;;  %p11015_p6 = scmp.lt.u32.totalorder %s11011_s4, %s13885_s9 }
 0xa20   :  { %p11017_p7 = pnand %p11015_p6, %p11012_p5 }
 0xa22   :  { %11020 = shalt.err (!%p11017_p7)
}
 0xa23   :  { %8442 = dma.vmem_to_hbm [thread:$0]  %s8440_s20, 32, %s13885_s9, [#allocation4]  }
 0xa24   :  { %11029 = dma.done.wait [#allocation4], 32  }
 0xa25   :  { %11030 = vsyncadd [#allocation4], 4294967264 }
 0xa26   :  { %8446 = vsyncpa [#allocation3], 1 }
 0xa27   :  { %8447 = vsyncpa [#allocation6], 1 }
 0xa28   :  { %8448 = vsyncpa [#allocation9], 1 }
 0xa29   :  { %8449 = vsyncpa [#allocation12], 1 }
 0xa2a   :  { %8450 = vsyncpa [#allocation4], 1 }

</bundles_post_ra>
